<compile_context>
chip_gen: v7x
topology: tpu7x:2x2x1
jax: 0.10.0
libtpu: 0.0.40
codegen_flags: <defaults>
</compile_context>

<pallas_src>
import functools

import jax
import jax.numpy as jnp
from jax.experimental import pallas as pl
from jax.experimental.pallas import tpu as pltpu

DIM = 512
IN_FEATURES = 2


def _elementwise_dtype():
    """bf16 elementwise chain on chips with a bf16 VALU (v6e/v7x); f32 otherwise."""
    try:
        kind = jax.devices()[0].device_kind.lower()
    except Exception:
        return jnp.float32
    if any(v in kind for v in ("v2", "v3", "v4", "v5")):
        return jnp.float32
    return jnp.bfloat16


def _disc_kernel(x_ref, w1_ref, b1_ref, w2_ref, b2_ref, w3_ref, b3_ref,
                 w4_ref, b4_ref, o_ref, *, elem_dtype):
    """4-layer MLP for one batch tile; weights are grid-invariant blocks."""
    x = x_ref[...]                                 # (T, 2) f32
    w1 = w1_ref[...]                               # (2, DIM) f32

    # Layer 1 (K = 2): broadcast-FMA on the VPU (an MXU pass would use only 2
    # of its 128/256 systolic rows).  Computed in f32, then cast to the
    # elementwise dtype for the rest of the chain.
    h = x[:, 0:1] * w1[0:1, :] + x[:, 1:2] * w1[1:2, :] + b1_ref[...]
    h = jnp.maximum(h, 0.0).astype(elem_dtype)

    # Layers 2 & 3: bf16 MXU matmuls with f32 accumulation; bias + ReLU run in
    # elem_dtype (bf16 on v6e/v7x, f32 on v5e).
    h = jnp.dot(h.astype(jnp.bfloat16), w2_ref[...],
                preferred_element_type=jnp.float32).astype(elem_dtype)
    h = jnp.maximum(h + b2_ref[...], 0.0)

    h = jnp.dot(h.astype(jnp.bfloat16), w3_ref[...],
                preferred_element_type=jnp.float32).astype(elem_dtype)
    h = jnp.maximum(h + b3_ref[...], 0.0)

    # Layer 4 (N = 1): VPU multiply + XLU lane reduction (f32 for accuracy);
    # final bias is a scalar read from SMEM.  Store as a lane-dense (1, T)
    # block instead of a masked (T, 1) column.
    out = jnp.sum(h.astype(jnp.float32) * w4_ref[...], axis=-1) + b4_ref[0, 0]
    o_ref[...] = out[None, :].astype(o_ref.dtype)


def prepare_params(params, elementwise_dtype=None):
    """One-time conversion of PyTorch-layout params into the kernel layout.

    Hoists the per-call casts out of the forward: w2/w3 are stored in bf16 for
    the MXU, b2/b3 in the elementwise dtype, w4 as a lane-dense (1, DIM) f32
    row, b4 as a (1, 1) f32 scalar for SMEM.
    """
    if elementwise_dtype is None:
        elementwise_dtype = _elementwise_dtype()
    w1, b1, w2, b2, w3, b3, w4, b4 = params
    return (
        w1.astype(jnp.float32),
        jnp.reshape(b1, (1, DIM)).astype(jnp.float32),
        w2.astype(jnp.bfloat16),
        jnp.reshape(b2, (1, DIM)).astype(elementwise_dtype),
        w3.astype(jnp.bfloat16),
        jnp.reshape(b3, (1, DIM)).astype(elementwise_dtype),
        jnp.reshape(w4, (1, DIM)).astype(jnp.float32),
        jnp.reshape(b4, (1, 1)).astype(jnp.float32),
    )


def _pick_batch_tile(B):
    """Large tiles to amortize grid-step overhead, but >=2 grid steps when the
    batch allows it so the v7x megacore can split the batch axis."""
    b256 = -(-B // 256) * 256
    if b256 >= 512:
        return min(1024, (b256 // 2 // 256) * 256)
    return 256


@jax.jit
def discriminator_forward(x, prepared_params):
    """x: (B, 2) float32.  Returns (B,) float32, same as PyTorch .view(-1)."""
    w1, b1, w2b, b2, w3b, b3, w4_row, b4 = prepared_params
    B = x.shape[0]
    elem_dtype = b2.dtype                      # chosen once in prepare_params

    batch_tile = _pick_batch_tile(B)
    n_tiles = -(-B // batch_tile)
    Bp = n_tiles * batch_tile
    x_p = jnp.pad(x, ((0, Bp - B), (0, 0))) if Bp != B else x

    x_spec = pl.BlockSpec((batch_tile, IN_FEATURES), lambda i: (i, 0))
    # Grid-invariant blocks: constant index_map, single-buffered (no dead
    # double-buffer VMEM, no redundant re-fetch).
    rep = lambda a: pl.BlockSpec(a.shape, lambda i: (0, 0),
                                 pipeline_mode=pl.Buffered(buffer_count=1))
    # Lane-dense output: one (1, batch_tile) row-block per grid step.
    out_spec = pl.BlockSpec((1, batch_tile), lambda i: (0, i))
    smem_spec = pl.BlockSpec(memory_space=pltpu.MemorySpace.SMEM)

    out = pl.pallas_call(
        functools.partial(_disc_kernel, elem_dtype=elem_dtype),
        out_shape=jax.ShapeDtypeStruct((1, Bp), jnp.float32),
        grid_spec=pltpu.PrefetchScalarGridSpec(
            num_scalar_prefetch=0,
            grid=(n_tiles,),
            in_specs=[
                x_spec,
                rep(w1), rep(b1),
                rep(w2b), rep(b2),
                rep(w3b), rep(b3),
                rep(w4_row), smem_spec,
            ],
            out_specs=out_spec,
        ),
        compiler_params=pltpu.CompilerParams(
            dimension_semantics=("parallel",),
            vmem_limit_bytes=32 * 1024 * 1024),
    )(x_p, w1, b1, w2b, b2, w3b, b3, w4_row, b4)

    return out.reshape(-1)[:B]   # output.view(-1)


def init_params(key):
    """Deterministic init mimicking PyTorch nn.Linear default (U(-k, k), k=1/sqrt(fan_in))."""
    dims = [(IN_FEATURES, DIM), (DIM, DIM), (DIM, DIM), (DIM, 1)]
    params = []
    for (fan_in, fan_out) in dims:
        key, kw, kb = jax.random.split(key, 3)
        bound = 1.0 / jnp.sqrt(jnp.float32(fan_in))
        w = jax.random.uniform(kw, (fan_in, fan_out), jnp.float32, -bound, bound)
        b = jax.random.uniform(kb, (1, fan_out), jnp.float32, -bound, bound)
        params += [w, b]
    return tuple(params)


def _reference_forward(x, params):
    """Pure-f32 JAX reference (matches the PyTorch module)."""
    w1, b1, w2, b2, w3, b3, w4, b4 = params
    h = jnp.maximum(x @ w1 + b1, 0.0)
    h = jnp.maximum(h @ w2 + b2, 0.0)
    h = jnp.maximum(h @ w3 + b3, 0.0)
    return (h @ w4 + b4).reshape(-1)


if __name__ == "__main__":
    key = jax.random.PRNGKey(0)
    k_params, k_x = jax.random.split(key)

    params = init_params(k_params)
    prepped = prepare_params(params)   # one-time cast/reshape, outside the hot path

    batch = 300  # NOT a multiple of the tile (exercises padding + 2 grid steps)
    x = jax.random.normal(k_x, (batch, IN_FEATURES), jnp.float32)

    out = discriminator_forward(x, prepped)
    out = jax.block_until_ready(out)

    ref = _reference_forward(x, params)
    assert out.shape == (batch,)
    # bf16 weights/activations (and bf16 bias/ReLU chain on v6e/v7x) in layers
    # 2-3 -> compare vs f32 reference with a looser tolerance.
    assert jnp.allclose(out, ref, atol=5e-2, rtol=5e-2), (
        f"mismatch vs JAX reference, max abs err={jnp.max(jnp.abs(out - ref))}")

    print("KERNEL_OK")
</pallas_src>

<mosaic_0001>
module attributes {stable_mosaic.version = 11 : i64} {
  func.func @_disc_kernel(%arg0: i32, %arg1: memref<256x2xf32, #tpu.memory_space<vmem>>, %arg2: memref<2x512xf32, #tpu.memory_space<vmem>>, %arg3: memref<1x512xf32, #tpu.memory_space<vmem>>, %arg4: memref<512x512xbf16, #tpu.memory_space<vmem>>, %arg5: memref<1x512xbf16, #tpu.memory_space<vmem>>, %arg6: memref<512x512xbf16, #tpu.memory_space<vmem>>, %arg7: memref<1x512xbf16, #tpu.memory_space<vmem>>, %arg8: memref<1x512xf32, #tpu.memory_space<vmem>>, %arg9: memref<1x1xf32, #tpu.memory_space<smem>>, %arg10: memref<1x256xf32, #tpu.memory_space<vmem>>) attributes {dimension_semantics = [#tpu.dimension_semantics<parallel>], iteration_bounds = array<i64: 2>, scalar_prefetch = 0 : i64, scratch_operands = 0 : i64, tpu.core_type = #tpu.core_type<tc>, window_params = [{transform_indices = @transform_0, window_bounds = array<i64: 256, 2>}, {pipeline_mode = #tpu.pipeline_mode<synchronous>, transform_indices = @transform_1, window_bounds = array<i64: 2, 512>}, {pipeline_mode = #tpu.pipeline_mode<synchronous>, transform_indices = @transform_2, window_bounds = array<i64: 1, 512>}, {pipeline_mode = #tpu.pipeline_mode<synchronous>, transform_indices = @transform_3, window_bounds = array<i64: 512, 512>}, {pipeline_mode = #tpu.pipeline_mode<synchronous>, transform_indices = @transform_4, window_bounds = array<i64: 1, 512>}, {pipeline_mode = #tpu.pipeline_mode<synchronous>, transform_indices = @transform_5, window_bounds = array<i64: 512, 512>}, {pipeline_mode = #tpu.pipeline_mode<synchronous>, transform_indices = @transform_6, window_bounds = array<i64: 1, 512>}, {pipeline_mode = #tpu.pipeline_mode<synchronous>, transform_indices = @transform_7, window_bounds = array<i64: 1, 512>}, {transform_indices = @transform_8, window_bounds = array<i64: 1, 1>}, {transform_indices = @transform_9, window_bounds = array<i64: 1, 256>}]} {
    %c0 = arith.constant 0 : index
    %c0_0 = arith.constant 0 : index
    %0 = vector.load %arg1[%c0, %c0_0] : memref<256x2xf32, #tpu.memory_space<vmem>>, vector<256x2xf32>
    %c0_1 = arith.constant 0 : index
    %c0_2 = arith.constant 0 : index
    %1 = vector.load %arg2[%c0_1, %c0_2] : memref<2x512xf32, #tpu.memory_space<vmem>>, vector<2x512xf32>
    %2 = vector.extract_strided_slice %0 {offsets = [0, 0], sizes = [256, 1], strides = [1, 1]} : vector<256x2xf32> to vector<256x1xf32>
    %3 = vector.extract_strided_slice %1 {offsets = [0, 0], sizes = [1, 512], strides = [1, 1]} : vector<2x512xf32> to vector<1x512xf32>
    %4 = vector.broadcast %2 : vector<256x1xf32> to vector<256x512xf32>
    %5 = vector.broadcast %3 : vector<1x512xf32> to vector<256x512xf32>
    %6 = arith.mulf %4, %5 : vector<256x512xf32>
    %7 = vector.extract_strided_slice %0 {offsets = [0, 1], sizes = [256, 1], strides = [1, 1]} : vector<256x2xf32> to vector<256x1xf32>
    %8 = vector.extract_strided_slice %1 {offsets = [1, 0], sizes = [1, 512], strides = [1, 1]} : vector<2x512xf32> to vector<1x512xf32>
    %9 = vector.broadcast %7 : vector<256x1xf32> to vector<256x512xf32>
    %10 = vector.broadcast %8 : vector<1x512xf32> to vector<256x512xf32>
    %11 = arith.mulf %9, %10 : vector<256x512xf32>
    %12 = arith.addf %6, %11 : vector<256x512xf32>
    %c0_3 = arith.constant 0 : index
    %c0_4 = arith.constant 0 : index
    %13 = vector.load %arg3[%c0_3, %c0_4] : memref<1x512xf32, #tpu.memory_space<vmem>>, vector<1x512xf32>
    %14 = vector.broadcast %13 : vector<1x512xf32> to vector<256x512xf32>
    %15 = arith.addf %12, %14 : vector<256x512xf32>
    %cst = arith.constant 0.000000e+00 : f32
    %16 = vector.broadcast %cst : f32 to vector<256x512xf32>
    %17 = arith.maximumf %15, %16 : vector<256x512xf32>
    %18 = arith.truncf %17 : vector<256x512xf32> to vector<256x512xbf16>
    %c0_5 = arith.constant 0 : index
    %c0_6 = arith.constant 0 : index
    %19 = vector.load %arg4[%c0_5, %c0_6] : memref<512x512xbf16, #tpu.memory_space<vmem>>, vector<512x512xbf16>
    %cst_7 = arith.constant dense<0.000000e+00> : vector<256x512xf32>
    %20 = tpu.matmul %18, %19, %cst_7 {dimension_numbers = #tpu.dot_dimension_numbers<[1], [0], [0], [1], [0, 0, 1, 1], [], []>} : vector<256x512xbf16>, vector<512x512xbf16>, vector<256x512xf32> -> vector<256x512xf32>
    %21 = arith.truncf %20 : vector<256x512xf32> to vector<256x512xbf16>
    %c0_8 = arith.constant 0 : index
    %c0_9 = arith.constant 0 : index
    %22 = vector.load %arg5[%c0_8, %c0_9] : memref<1x512xbf16, #tpu.memory_space<vmem>>, vector<1x512xbf16>
    %23 = vector.broadcast %22 : vector<1x512xbf16> to vector<256x512xbf16>
    %24 = arith.addf %21, %23 : vector<256x512xbf16>
    %cst_10 = arith.constant 0.000000e+00 : bf16
    %25 = vector.broadcast %cst_10 : bf16 to vector<256x512xbf16>
    %26 = arith.maximumf %24, %25 : vector<256x512xbf16>
    %c0_11 = arith.constant 0 : index
    %c0_12 = arith.constant 0 : index
    %27 = vector.load %arg6[%c0_11, %c0_12] : memref<512x512xbf16, #tpu.memory_space<vmem>>, vector<512x512xbf16>
    %cst_13 = arith.constant dense<0.000000e+00> : vector<256x512xf32>
    %28 = tpu.matmul %26, %27, %cst_13 {dimension_numbers = #tpu.dot_dimension_numbers<[1], [0], [0], [1], [0, 0, 1, 1], [], []>} : vector<256x512xbf16>, vector<512x512xbf16>, vector<256x512xf32> -> vector<256x512xf32>
    %29 = arith.truncf %28 : vector<256x512xf32> to vector<256x512xbf16>
    %c0_14 = arith.constant 0 : index
    %c0_15 = arith.constant 0 : index
    %30 = vector.load %arg7[%c0_14, %c0_15] : memref<1x512xbf16, #tpu.memory_space<vmem>>, vector<1x512xbf16>
    %31 = vector.broadcast %30 : vector<1x512xbf16> to vector<256x512xbf16>
    %32 = arith.addf %29, %31 : vector<256x512xbf16>
    %cst_16 = arith.constant 0.000000e+00 : bf16
    %33 = vector.broadcast %cst_16 : bf16 to vector<256x512xbf16>
    %34 = arith.maximumf %32, %33 : vector<256x512xbf16>
    %35 = arith.extf %34 : vector<256x512xbf16> to vector<256x512xf32>
    %c0_17 = arith.constant 0 : index
    %c0_18 = arith.constant 0 : index
    %36 = vector.load %arg8[%c0_17, %c0_18] : memref<1x512xf32, #tpu.memory_space<vmem>>, vector<1x512xf32>
    %37 = vector.broadcast %36 : vector<1x512xf32> to vector<256x512xf32>
    %38 = arith.mulf %35, %37 : vector<256x512xf32>
    %cst_19 = arith.constant dense<0.000000e+00> : vector<256xf32>
    %39 = vector.multi_reduction <add>, %38, %cst_19 [1] : vector<256x512xf32> to vector<256xf32>
    %c0_20 = arith.constant 0 : index
    %c0_21 = arith.constant 0 : index
    %40 = memref.load %arg9[%c0_20, %c0_21] : memref<1x1xf32, #tpu.memory_space<smem>>
    %41 = vector.broadcast %40 : f32 to vector<256xf32>
    %42 = arith.addf %39, %41 : vector<256xf32>
    %43 = vector.shape_cast %42 : vector<256xf32> to vector<1x256xf32>
    %c0_22 = arith.constant 0 : index
    %c0_23 = arith.constant 0 : index
    %44 = vector.load %arg10[%c0_22, %c0_23] : memref<1x256xf32, #tpu.memory_space<vmem>>, vector<1x256xf32>
    tpu.vector_store %arg10[%c0_22, %c0_23], %43 {strides = array<i32>} : memref<1x256xf32, #tpu.memory_space<vmem>>, vector<1x256xf32>,
    return
  }
  func.func @transform_0(%arg0: i32) -> (i32, i32) {
    %c0_i32 = arith.constant 0 : i32
    %c0_i32_0 = arith.constant 0 : i32
    return %arg0, %c0_i32 : i32, i32
  }
  func.func @transform_1(%arg0: i32) -> (i32, i32) {
    %c0_i32 = arith.constant 0 : i32
    %c0_i32_0 = arith.constant 0 : i32
    %c0_i32_1 = arith.constant 0 : i32
    return %c0_i32, %c0_i32_0 : i32, i32
  }
  func.func @transform_2(%arg0: i32) -> (i32, i32) {
    %c0_i32 = arith.constant 0 : i32
    %c0_i32_0 = arith.constant 0 : i32
    %c0_i32_1 = arith.constant 0 : i32
    return %c0_i32, %c0_i32_0 : i32, i32
  }
  func.func @transform_3(%arg0: i32) -> (i32, i32) {
    %c0_i32 = arith.constant 0 : i32
    %c0_i32_0 = arith.constant 0 : i32
    %c0_i32_1 = arith.constant 0 : i32
    return %c0_i32, %c0_i32_0 : i32, i32
  }
  func.func @transform_4(%arg0: i32) -> (i32, i32) {
    %c0_i32 = arith.constant 0 : i32
    %c0_i32_0 = arith.constant 0 : i32
    %c0_i32_1 = arith.constant 0 : i32
    return %c0_i32, %c0_i32_0 : i32, i32
  }
  func.func @transform_5(%arg0: i32) -> (i32, i32) {
    %c0_i32 = arith.constant 0 : i32
    %c0_i32_0 = arith.constant 0 : i32
    %c0_i32_1 = arith.constant 0 : i32
    return %c0_i32, %c0_i32_0 : i32, i32
  }
  func.func @transform_6(%arg0: i32) -> (i32, i32) {
    %c0_i32 = arith.constant 0 : i32
    %c0_i32_0 = arith.constant 0 : i32
    %c0_i32_1 = arith.constant 0 : i32
    return %c0_i32, %c0_i32_0 : i32, i32
  }
  func.func @transform_7(%arg0: i32) -> (i32, i32) {
    %c0_i32 = arith.constant 0 : i32
    %c0_i32_0 = arith.constant 0 : i32
    %c0_i32_1 = arith.constant 0 : i32
    return %c0_i32, %c0_i32_0 : i32, i32
  }
  func.func @transform_8(%arg0: i32) -> (i32, i32) {
    %c0_i32 = arith.constant 0 : i32
    %c0_i32_0 = arith.constant 0 : i32
    %c0_i32_1 = arith.constant 0 : i32
    return %c0_i32, %c0_i32_0 : i32, i32
  }
  func.func @transform_9(%arg0: i32) -> (i32, i32) {
    %c0_i32 = arith.constant 0 : i32
    %c0_i32_0 = arith.constant 0 : i32
    return %c0_i32, %arg0 : i32, i32
  }
}

</mosaic_0001>

<bundles_post_ra>
// kernel: discriminator_forward.1
= control target key start
LH: loop header
LB: loop body
LE: loop exit
PB: predicated region body
PF: predicated region fallthrough
CT: control target
= control target key end

     0   :  { %s12796_s0 = inlined_call_operand.vmem [shape: f32[512,2], index: 0, kind: input, shape index: {}]   ;;  %s12797_s1 = inlined_call_operand.vmem [shape: f32[2,512], index: 1, kind: input, shape index: {}]   ;;  %s12798_s2 = inlined_call_operand.vmem [shape: f32[1,512], index: 2, kind: input, shape index: {}]   ;;  %s12799_s3 = inlined_call_operand.vmem [shape: bf16[512,512], index: 3, kind: input, shape index: {}]   ;;  %s12800_s4 = inlined_call_operand.vmem [shape: bf16[1,512], index: 4, kind: input, shape index: {}]   ;;  %s12801_s5 = inlined_call_operand.hbm [shape: bf16[512,512], index: 5, kind: input, shape index: {}]   ;;  %s12802_s6 = inlined_call_operand.vmem [shape: bf16[1,512], index: 6, kind: input, shape index: {}]   ;;  %s12803_s7 = inlined_call_operand.vmem [shape: f32[1,512], index: 7, kind: input, shape index: {}]   ;;  %s12804_s8 = inlined_call_operand.<no memory space> [shape: f32[1,1], index: 8, kind: input, shape index: {}]   ;;  %s12805_s9 = inlined_call_operand.vmem [shape: f32[1,512], index: 9, kind: output, shape index: {}]  }
   0x1   :  { %14 = sst [smem:[#allocation2]] %s12804_s8 }
   0x2   :  { %15 = vsyncpa [#allocation4], 0  ;;  %s9585_s11 = smov 0  }
   0x3 LB: > { %s9591_s12 = sadd.s32 4294967295, %s9524_s11   ;;  %p8510_p0 = scmp.ge.s32.totalorder %s9524_s11, 1  ;;  %s9524_s11 = sphi %s9585_s11, %s21_s11  }
   0x4   : > { %p246_p1 = scmp.lt.s32.totalorder %s9524_s11, 3  ;;  %s9526_s13 = smov [#allocation3]  }
   0x5   : > { %s270_s14 = sshll.u32 %s9526_s13, 4  ;;  %p12806_p3 = scmp.eq.s32.totalorder %s9591_s12, 0  ;;  %s271_s14 = int_to_ptr.vmem [resolvable:$true] %s270_s14 }
   0x6   : > { %p9595_p2 = pnand %p8510_p0, %p246_p1  ;;  %s9486_s18 = scalar_lea.hbm %s12801_s5, 16384 }
   0x7   : > { %p9487_p6 = scmp.ne.s32.totalorder %s12801_s5, %s9486_s18  ;;  %p9493_p10 = scmp.lt.u32.totalorder %s9486_s18, %s12801_s5 }
   0x8   : > { %s12903_s8 = scalar_select %p9595_p2, 1, 0 }
   0x9   : > { %p9038_p4 = pneg %p9595_p2 }
   0xb   : > { %p9604_p5 = pnand %p12806_p3, %p9038_p4 }
   0xd   : > { %p9488_p7 = pneg %p9604_p5 }
   0xf   : > { %p9489_p8 = pnand %p9488_p7, %p9487_p6 }
  0x11   : > { %p9490_p9 = pneg %p9489_p8 }
  0x13   : > { %p9495_p11 = pnand %p9493_p10, %p9490_p9 }
  0x15   : > { %9498 = shalt.err (!%p9495_p11)
}
  0x16   : > { %s9499_s23 = scalar_lea.vmem %s271_s14, 16384  ;;  %p9507_p1 = scmp.lt.s32.totalorder %s271_s14, %s271_s14 }
  0x17   : > { %p9500_p12 = scmp.ne.s32.totalorder %s271_s14, %s9499_s23  ;;  %p9508_p4 = scmp.lt.s32.totalorder %s9499_s23, %s9499_s23 }
  0x19   : > { %p9502_p13 = pnand %p9500_p12, %p9488_p7  ;;  %p9509_p3 = por %p9508_p4, %p9507_p1 }
  0x1b   : > { %p9503_p0 = pneg %p9502_p13 }
  0x1d   : > { %p9510_p2 = pnand %p9509_p3, %p9503_p0 }
  0x1f   : > { %9513 = shalt.err (!%p9510_p2)
}
  0x20   : > { %s9527_s24 = smov 256   ;;  %s9528_s25 = smov 16  }
  0x21   : > { %9041 = dma.hbm_to_vmem [thread:$0]  (!%p9604_p5), %s12801_s5, 16384, %s271_s14, [#allocation4], %s9527_s24, %s9527_s24, %s9528_s25  }
  0x22   : > { %p12905_p6 = scmp.ne.s32.totalorder %s12903_s8, 0 }
  0x24   : > { %304 = sbr.rel (%p12905_p6) target bundleno = 1428 (0x594), region = 56 }
  0x2b   : > { %p12906_p8 = scmp.eq.s32.totalorder %s9591_s12, 0 }
  0x2d   : > { %9519 = dma.done.wait (%p12906_p8), [#allocation4], 16384   ;;  %p12907_p7 = pmov %p12906_p8 }
  0x2e   : > { %s8515_s28 = sshll.u32 %s9591_s12, 5  ;;  %v12812_v0 = vmov 1   ;;  %v12810_v1 = vmov 0   ;;  %v9101_v5 = vld [vmem:[%s12799_s3 + $0x4] ss:$16 sps:$4 sm:$0xff]   ;;  %vm8246_vm0 = vcmask 130112  }
  0x2f   : > { %9521 = vsyncadd (%p12907_p7), [#allocation4], 4294950912  ;;  %9059 = vset.pattern.permute.xlu1 %v12812_v0  ;;  %9058 = vset.pattern.permute.xlu0 %v12810_v1  ;;  %p340_p2 = scmp.lt.s32.totalorder %s8515_s28, 63  ;;  %v9103_v6 = vld [vmem:[%s12799_s3 + $0xc] ss:$16 sps:$4 sm:$0xff]   ;;  %vm8253_vm1 = vcmask 195712  }
  0x30   : > { %2239 = vmatprep.subr.bf16.mxu0 %v9101_v5  ;;  %v9105_v8 = vld [vmem:[%s12799_s3] ss:$16 sps:$4 sm:$0xff]   ;;  %v9106_v9 = vld [vmem:[%s12799_s3 + $0x8] ss:$16 sps:$4 sm:$0xff]   ;;  %2625 = vmatprep.subr.bf16.mxu1 %v9103_v6  ;;  %v9107_v10 = vld [vmem:[%s12799_s3 + $0x24] ss:$16 sps:$4 sm:$0xff]  }
  0x31   : > { %s13069_s28 = smov (!%p340_p2, %s8515_s28), 63  ;;  %v9109_v11 = vld [vmem:[%s12799_s3 + $0x2c] ss:$16 sps:$4 sm:$0xff]   ;;  %2240 = vmatpush1.bf16.msra.mxu0 %v9105_v8  ;;  %2626 = vmatpush1.bf16.msra.mxu1 %v9106_v9  ;;  %v9111_v12 = vld [vmem:[%s12799_s3 + $0x20] ss:$16 sps:$4 sm:$0xff]   ;;  %vm8260_vm2 = vcmask 261312  }
  0x32   : > { %s8516_s29 = sshll.u32 %s13069_s28, 3  ;;  %2241 = vmatprep.subr.bf16.mxu0 %v9107_v10  ;;  %2627 = vmatprep.subr.bf16.mxu1 %v9109_v11  ;;  %v9112_v13 = vld [vmem:[%s12799_s3 + $0x28] ss:$16 sps:$4 sm:$0xff]   ;;  %v9113_v14 = vld [vmem:[%s12799_s3 + $0x44] ss:$16 sps:$4 sm:$0xff]   ;;  %vm8267_vm3 = vcmask 326912  }
  0x33   : > { %s9636_s13 = scalar_lea.vmem %s12796_s0, %s8516_s29  ;;  %v9115_v15 = vld [vmem:[%s12799_s3 + $0x4c] ss:$16 sps:$4 sm:$0xff]   ;;  %v9117_v18 = vld [vmem:[%s12799_s3 + $0x40] ss:$16 sps:$4 sm:$0xff]   ;;  %v9118_v19 = vld [vmem:[%s12799_s3 + $0x48] ss:$16 sps:$4 sm:$0xff]  }
  0x34   : > { %v351_v2 = vld [vmem:[%s9636_s13] sm:$0xff]  ;;  %v352_v3 = vld [vmem:[%s9636_s13 + $0x8] sm:$0xff]  ;;  %v353_v4 = vld [vmem:[%s9636_s13 + $0x10] sm:$0xff]  ;;  %s5481_s29 = sld [smem:[#allocation2]]  ;;  %vm8274_vm4 = vcmask 392512   ;;  %vm8281_vm5 = vcmask 458112  }
  0x35   : > { %710 = vperm.xlu1 %9059, %v351_v2   ;;  %386 = vperm.xlu0 %9058, %v351_v2   ;;  %v354_v7 = vld [vmem:[%s9636_s13 + $0x18] sm:$0xff]  ;;  %v355_v16 = vld [vmem:[%s9636_s13 + $0x20] sm:$0xff]  ;;  %v357_v17 = vld [vmem:[%s9636_s13 + $0x30] sm:$0xff]  ;;  %vm8288_vm6 = vcmask 523712   ;;  %vm8295_vm7 = vcmask 589312   ;;  %vm8302_vm8 = vcmask 654912  }
  0x36   : > { %2242 = vmatpush1.bf16.msra.mxu0 %v9111_v12  ;;  %2628 = vmatpush1.bf16.msra.mxu1 %v9112_v13  ;;  %v9119_v20 = vld [vmem:[%s12799_s3 + $0x64] ss:$16 sps:$4 sm:$0xff]   ;;  %v9121_v21 = vld [vmem:[%s12799_s3 + $0x6c] ss:$16 sps:$4 sm:$0xff]   ;;  %v9123_v23 = vld [vmem:[%s12799_s3 + $0x60] ss:$16 sps:$4 sm:$0xff]  }
  0x37   : > { %2243 = vmatprep.subr.bf16.mxu0 %v9113_v14  ;;  %2629 = vmatprep.subr.bf16.mxu1 %v9115_v15  ;;  %v356_v22 = vld [vmem:[%s9636_s13 + $0x28] sm:$0xff]  ;;  %v9125_v25 = vld [vmem:[%s12799_s3 + $0x84] ss:$16 sps:$4 sm:$0xff]   ;;  %v9129_v27 = vld [vmem:[%s12799_s3 + $0x80] ss:$16 sps:$4 sm:$0xff]   ;;  %vm8309_vm9 = vcmask 720512  }
  0x38   : > { %v9124_v24 = vld [vmem:[%s12799_s3 + $0x68] ss:$16 sps:$4 sm:$0xff]   ;;  %v9127_v26 = vld [vmem:[%s12799_s3 + $0x8c] ss:$16 sps:$4 sm:$0xff]   ;;  %v9131_v29 = vld [vmem:[%s12799_s3 + $0xa4] ss:$16 sps:$4 sm:$0xff]  }
  0x39   : > { %714 = vperm.xlu1 %9059, %v352_v3   ;;  %391 = vperm.xlu0 %9058, %v352_v3   ;;  %v9130_v28 = vld [vmem:[%s12799_s3 + $0x88] ss:$16 sps:$4 sm:$0xff]   ;;  %v9133_v30 = vld [vmem:[%s12799_s3 + $0xac] ss:$16 sps:$4 sm:$0xff]   ;;  %v9135_v32 = vld [vmem:[%s12799_s3 + $0xa0] ss:$16 sps:$4 sm:$0xff]  }
  0x3a   : > { %2244 = vmatpush1.bf16.msra.mxu0 %v9117_v18  ;;  %2630 = vmatpush1.bf16.msra.mxu1 %v9118_v19  ;;  %v9718_v31 = vld [vmem:[%s9636_s13 + $0x48] sm:$0xff]  ;;  %v9137_v34 = vld [vmem:[%s12799_s3 + $0xc4] ss:$16 sps:$4 sm:$0xff]   ;;  %v358_v36 = vld [vmem:[%s9636_s13 + $0x38] sm:$0xff]  ;;  %vm8316_vm10 = vcmask 786112   ;;  %vm8323_vm11 = vcmask 851712  }
  0x3b   : > { %2245 = vmatprep.subr.bf16.mxu0 %v9119_v20  ;;  %2631 = vmatprep.subr.bf16.mxu1 %v9121_v21  ;;  %v9136_v33 = vld [vmem:[%s12799_s3 + $0xa8] ss:$16 sps:$4 sm:$0xff]   ;;  %v9139_v35 = vld [vmem:[%s12799_s3 + $0xcc] ss:$16 sps:$4 sm:$0xff]   ;;  %v361_v37 = vld [vmem:[%s9636_s13 + $0x50] sm:$0xff]  ;;  %vm8330_vm12 = vcmask 917312  }
  0x3c   : > { %v9141_v38 = vld [vmem:[%s12799_s3 + $0xc0] ss:$16 sps:$4 sm:$0xff]   ;;  %v9142_v39 = vld [vmem:[%s12799_s3 + $0xc8] ss:$16 sps:$4 sm:$0xff]   ;;  %v9143_v40 = vld [vmem:[%s12799_s3 + $0xe4] ss:$16 sps:$4 sm:$0xff]  }
  0x3d   : > { %9060 = vset.pattern.permute.xlu1 %v12810_v1  ;;  %396 = vperm.xlu0 %9058, %v353_v4   ;;  %v9145_v41 = vld [vmem:[%s12799_s3 + $0xec] ss:$16 sps:$4 sm:$0xff]   ;;  %v9147_v42 = vld [vmem:[%s12799_s3 + $0xe0] ss:$16 sps:$4 sm:$0xff]   ;;  %v9148_v43 = vld [vmem:[%s12799_s3 + $0xe8] ss:$16 sps:$4 sm:$0xff]  }
  0x3e   : > { %401 = vperm.xlu1 %9060, %v354_v7   ;;  %2246 = vmatpush1.bf16.msra.mxu0 %v9123_v23  ;;  %v9149_v44 = vld [vmem:[%s12799_s3 + $0x104] ss:$16 sps:$4 sm:$0xff]   ;;  %v9151_v45 = vld [vmem:[%s12799_s3 + $0x10c] ss:$16 sps:$4 sm:$0xff]   ;;  %v9153_v48 = vld [vmem:[%s12799_s3 + $0x100] ss:$16 sps:$4 sm:$0xff]  }
  0x3f   : > { %2632 = vmatpush1.bf16.msra.mxu1 %v9124_v24  ;;  %2247 = vmatprep.subr.bf16.mxu0 %v9125_v25  ;;  %v359_v46 = vld [vmem:[%s9636_s13 + $0x40] sm:$0xff]  ;;  %v365_v47 = vld [vmem:[%s9636_s13 + $0x70] sm:$0xff]  ;;  %v9154_v49 = vld [vmem:[%s12799_s3 + $0x108] ss:$16 sps:$4 sm:$0xff]   ;;  %s8517_s30 = sshll.u32 %s9591_s12, 1  ;;  %vm8337_vm13 = vcmask 982912  }
  0x40   : > { %2633 = vmatprep.subr.bf16.mxu1 %v9127_v26  ;;  %v9155_v50 = vld [vmem:[%s12799_s3 + $0x124] ss:$16 sps:$4 sm:$0xff]   ;;  %v9157_v51 = vld [vmem:[%s12799_s3 + $0x12c] ss:$16 sps:$4 sm:$0xff]   ;;  %v9159_v53 = vld [vmem:[%s12799_s3 + $0x120] ss:$16 sps:$4 sm:$0xff]  }
  0x41   : > { %9061 = vset.pattern.permute.xlu0 %v12812_v0  ;;  %v9778_v52 = vld [vmem:[%s9636_s13 + $0x68] sm:$0xff]  ;;  %v9161_v55 = vld [vmem:[%s12799_s3 + $0x144] ss:$16 sps:$4 sm:$0xff]   ;;  %v9165_v57 = vld [vmem:[%s12799_s3 + $0x140] ss:$16 sps:$4 sm:$0xff]   ;;  %p346_p3 = scmp.lt.s32.totalorder %s8517_s30, 3 }
  0x42   : > { %9062 = vset.pattern.permute.xlu1 %v12812_v0  ;;  %718 = vperm.xlu0 %9061, %v353_v4   ;;  %v9160_v54 = vld [vmem:[%s12799_s3 + $0x128] ss:$16 sps:$4 sm:$0xff]   ;;  %v9163_v56 = vld [vmem:[%s12799_s3 + $0x14c] ss:$16 sps:$4 sm:$0xff]   ;;  %v9167_v59 = vld [vmem:[%s12799_s3 + $0x164] ss:$16 sps:$4 sm:$0xff]  }
  0x43   : > { %722 = vperm.xlu1 %9062, %v354_v7   ;;  %2248 = vmatpush1.bf16.msra.mxu0 %v9129_v27  ;;  %v9166_v58 = vld [vmem:[%s12799_s3 + $0x148] ss:$16 sps:$4 sm:$0xff]   ;;  %v9169_v60 = vld [vmem:[%s12799_s3 + $0x16c] ss:$16 sps:$4 sm:$0xff]   ;;  %v9171_v63 = vld [vmem:[%s12799_s3 + $0x160] ss:$16 sps:$4 sm:$0xff]  }
  0x44   : > { %2634 = vmatpush1.bf16.msra.mxu1 %v9130_v28  ;;  %2249 = vmatprep.subr.bf16.mxu0 %v9131_v29  ;;  %v9808_v61 = vld [vmem:[%s9636_s13 + $0x88] sm:$0xff]  ;;  %v362_v62 = vld [vmem:[%s9636_s13 + $0x58] sm:$0xff]  ;;  %v9173_v3 = vld [vmem:[%s12799_s3 + $0x184] ss:$16 sps:$4 sm:$0xff]   ;;  %vm8344_vm14 = vcmask 1048512   ;;  %s13071_s30 = smov (!%p346_p3, %s8517_s30), 3 }
  0x45   : > { %2635 = vmatprep.subr.bf16.mxu1 %v9133_v30  ;;  %v9172_v2 = vld [vmem:[%s12799_s3 + $0x168] ss:$16 sps:$4 sm:$0xff]   ;;  %v9175_v4 = vld [vmem:[%s12799_s3 + $0x18c] ss:$16 sps:$4 sm:$0xff]   ;;  %v369_v5 = vld [vmem:[%s9636_s13 + $0x90] sm:$0xff]  ;;  %s348_s14 = scalar_lea.vmem %s12805_s9, %s13071_s30 }
  0x46   : > { %734 = vperm.xlu0 %9061, %v357_v17   ;;  %v9177_v6 = vld [vmem:[%s12799_s3 + $0x180] ss:$16 sps:$4 sm:$0xff]   ;;  %v9178_v7 = vld [vmem:[%s12799_s3 + $0x188] ss:$16 sps:$4 sm:$0xff]   ;;  %v9179_v8 = vld [vmem:[%s12799_s3 + $0x1a4] ss:$16 sps:$4 sm:$0xff]  }
  0x47   : > { %9063 = vset.pattern.permute.xlu1 %v12810_v1  ;;  %2250 = vmatpush1.bf16.msra.mxu0 %v9135_v32  ;;  %v9181_v9 = vld [vmem:[%s12799_s3 + $0x1ac] ss:$16 sps:$4 sm:$0xff]   ;;  %v9183_v10 = vld [vmem:[%s12799_s3 + $0x1a0] ss:$16 sps:$4 sm:$0xff]   ;;  %v9184_v11 = vld [vmem:[%s12799_s3 + $0x1a8] ss:$16 sps:$4 sm:$0xff]  }
  0x48   : > { %406 = vperm.xlu1 %9063, %v355_v16   ;;  %2636 = vmatpush1.bf16.msra.mxu1 %v9136_v33  ;;  %v9185_v12 = vld [vmem:[%s12799_s3 + $0x1c4] ss:$16 sps:$4 sm:$0xff]   ;;  %v9187_v14 = vld [vmem:[%s12799_s3 + $0x1cc] ss:$16 sps:$4 sm:$0xff]   ;;  %v9189_v15 = vld [vmem:[%s12799_s3 + $0x1c0] ss:$16 sps:$4 sm:$0xff]  }
  0x49   : > { %2251 = vmatprep.subr.bf16.mxu0 %v9137_v34  ;;  %2637 = vmatprep.subr.bf16.mxu1 %v9139_v35  ;;  %v363_v13 = vld [vmem:[%s9636_s13 + $0x60] sm:$0xff]  ;;  %v9193_v19 = vld [vmem:[%s12799_s3 + $0x1ec] ss:$16 sps:$4 sm:$0xff]   ;;  %v9196_v21 = vld [vmem:[%s12799_s3 + $0x1e8] ss:$16 sps:$4 sm:$0xff]  }
  0x4a   : > { %9066 = vset.pattern.permute.xlu0 %v12810_v1  ;;  %v9191_v18 = vld [vmem:[%s12799_s3 + $0x1e4] ss:$16 sps:$4 sm:$0xff]   ;;  %v9195_v20 = vld [vmem:[%s12799_s3 + $0x1e0] ss:$16 sps:$4 sm:$0xff]   ;;  %v366_v24 = vld [vmem:[%s9636_s13 + $0x78] sm:$0xff] }
  0x4b   : > { %411 = vperm.xlu0 %9066, %v356_v22   ;;  %2252 = vmatpush1.bf16.msra.mxu0 %v9141_v38  ;;  %v9199_v23 = vld [vmem:[%s12799_s3 + $0x204] ss:$16 sps:$4 sm:$0xff]   ;;  %v9883_v25 = vld [vmem:[%s9636_s13 + $0xc8] sm:$0xff]  ;;  %v370_v30 = vld [vmem:[%s9636_s13 + $0x98] sm:$0xff] }
  0x4c   : > { %9064 = vset.pattern.permute.xlu1 %v12812_v0  ;;  %2638 = vmatpush1.bf16.msra.mxu1 %v9142_v39  ;;  %v377_v26 = vld [vmem:[%s9636_s13 + $0xd0] sm:$0xff]  ;;  %v367_v27 = vld [vmem:[%s9636_s13 + $0x80] sm:$0xff]  ;;  %v9894_v28 = vld [vmem:[%s9636_s13 + $0xe8] sm:$0xff] }
  0x4d   : > { %726 = vperm.xlu1 %9064, %v355_v16   ;;  %2253 = vmatprep.subr.bf16.mxu0 %v9143_v40  ;;  %v373_v16 = vld [vmem:[%s9636_s13 + $0xb0] sm:$0xff]  ;;  %v371_v32 = vld [vmem:[%s9636_s13 + $0xa0] sm:$0xff] }
  0x4e   : > { %2639 = vmatprep.subr.bf16.mxu1 %v9145_v41  ;;  %v381_v29 = vld [vmem:[%s9636_s13 + $0xf0] sm:$0xff]  ;;  %v9913_v34 = vld [vmem:[%s12797_s1] sm:$0xff] }
  0x4f   : > { %416 = vperm.xlu0 %9066, %v357_v17   ;;  %2254 = vmatpush1.bf16.msra.mxu0 %v9147_v42  ;;  %v9190_v17 = vld [vmem:[%s12799_s3 + $0x1c8] ss:$16 sps:$4 sm:$0xff]  }
  0x50   : > { %2640 = vmatpush1.bf16.msra.mxu1 %v9148_v43  ;;  %2255 = vmatprep.subr.bf16.mxu0 %v9149_v44 }
  0x51   : > { %730 = vperm.xlu1 %9064, %v356_v22   ;;  %2641 = vmatprep.subr.bf16.mxu1 %v9151_v45  ;;  %v372_v22 = vld [vmem:[%s9636_s13 + $0xa8] sm:$0xff]  ;;  %v374_v45 = vld [vmem:[%s9636_s13 + $0xb8] sm:$0xff] }
  0x53   : > { %431 = vperm.xlu0 %9066, %v9718_v31   ;;  %2256 = vmatpush1.bf16.msra.mxu0 %v9153_v48 }
  0x54   : > { %2642 = vmatpush1.bf16.msra.mxu1 %v9154_v49  ;;  %2257 = vmatprep.subr.bf16.mxu0 %v9155_v50 }
  0x55   : > { %9065 = vset.pattern.permute.xlu1 %v12810_v1  ;;  %2643 = vmatprep.subr.bf16.mxu1 %v9157_v51  ;;  %v1129_v51 = vld [vmem:[%s12798_s2] sm:$0xf] }
  0x56   : > { %421 = vperm.xlu1 %9065, %v358_v36  }
  0x57   : > { %436 = vperm.xlu0 %9066, %v361_v37   ;;  %2258 = vmatpush1.bf16.msra.mxu0 %v9159_v53 }
  0x58   : > { %2644 = vmatpush1.bf16.msra.mxu1 %v9160_v54  ;;  %2259 = vmatprep.subr.bf16.mxu0 %v9161_v55 }
  0x59   : > { %2645 = vmatprep.subr.bf16.mxu1 %v9163_v56 }
  0x5a   : > { %9067 = vset.pattern.permute.xlu1 %v12812_v0 }
  0x5b   : > { %738 = vperm.xlu1 %9067, %v358_v36   ;;  %9071 = vset.pattern.permute.xlu0 %v12812_v0 }
  0x5c   : > { %750 = vperm.xlu0 %9071, %v361_v37   ;;  %2260 = vmatpush1.bf16.msra.mxu0 %v9165_v57 }
  0x5d   : > { %2646 = vmatpush1.bf16.msra.mxu1 %v9166_v58  ;;  %2261 = vmatprep.subr.bf16.mxu0 %v9167_v59 }
  0x5e   : > { %2647 = vmatprep.subr.bf16.mxu1 %v9169_v60 }
  0x5f   : > { %9068 = vset.pattern.permute.xlu1 %v12810_v1 }
  0x60   : > { %426 = vperm.xlu1 %9068, %v359_v46   ;;  %766 = vperm.xlu0 %9071, %v365_v47  }
  0x61   : > { %2262 = vmatpush1.bf16.msra.mxu0 %v9171_v63  ;;  %2648 = vmatpush1.bf16.msra.mxu1 %v9172_v2 }
  0x62   : > { %2263 = vmatprep.subr.bf16.mxu0 %v9173_v3  ;;  %2649 = vmatprep.subr.bf16.mxu1 %v9175_v4 }
  0x64   : > { %9069 = vset.pattern.permute.xlu1 %v12812_v0  ;;  %9076 = vset.pattern.permute.xlu0 %v12810_v1 }
  0x65   : > { %742 = vperm.xlu1 %9069, %v359_v46   ;;  %451 = vperm.xlu0 %9076, %v9778_v52  }
  0x66   : > { %2264 = vmatpush1.bf16.msra.mxu0 %v9177_v6  ;;  %2650 = vmatpush1.bf16.msra.mxu1 %v9178_v7  ;;  %v375_v6 = vld [vmem:[%s9636_s13 + $0xc0] sm:$0xff]  ;;  %v9226_v7 = vld [vmem:[%s12799_s3 + $0x20c] ss:$16 sps:$4 sm:$0xff]  }
  0x67   : > { %2265 = vmatprep.subr.bf16.mxu0 %v9179_v8  ;;  %2651 = vmatprep.subr.bf16.mxu1 %v9181_v9 }
  0x69   : > { %746 = vperm.xlu1 %9069, %v9718_v31   ;;  %456 = vperm.xlu0 %9076, %v365_v47   ;;  %v12808_v31 = vlaneseq }
  0x6a   : > { %2266 = vmatpush1.bf16.msra.mxu0 %v9183_v10  ;;  %2652 = vmatpush1.bf16.msra.mxu1 %v9184_v11 }
  0x6b   : > { %2267 = vmatprep.subr.bf16.mxu0 %v9185_v12  ;;  %2653 = vmatprep.subr.bf16.mxu1 %v9187_v14  ;;  %v9908_v33 = vshrl.u32 %v12808_v31, 7 }
  0x6d   : > { %9070 = vset.pattern.permute.xlu1 %v12810_v1  ;;  %471 = vperm.xlu0 %9076, %v9808_v61   ;;  %12908 = vst [vmem:[#allocation6_spill] sm:$0xff] %v9908_v33  ;;  %v9916_v35 = vsub.s32 1, %v9908_v33  ;;  %v9919_v36 = vsub.s32 0, %v9908_v33  ;;  %v9923_v37 = vsub.s32 2, %v9908_v33  ;;  %v9926_v38 = vsub.s32 3, %v9908_v33 }
  0x6e   : > { %441 = vperm.xlu1 %9070, %v362_v62   ;;  %2268 = vmatpush1.bf16.msra.mxu0 %v9189_v15 }
  0x6f   : > { %2654 = vmatpush1.bf16.msra.mxu1 %v9190_v17  ;;  %2269 = vmatprep.subr.bf16.mxu0 %v9191_v18  ;;  %12909 = vst [vmem:[#allocation7_spill] sm:$0xff] %v9916_v35  ;;  %12910 = vst [vmem:[#allocation8_spill] sm:$0xff] %v9919_v36  ;;  %v840_v39 = vrot.slane %v9913_v34, %v9916_v35  ;;  %v548_v40 = vrot.slane %v9913_v34, %v9919_v36 }
  0x70   : > { %2655 = vmatprep.subr.bf16.mxu1 %v9193_v19  ;;  %12911 = vst [vmem:[#allocation9_spill] sm:$0xff] %v9923_v37  ;;  %12912 = vst [vmem:[#allocation10_spill] sm:$0xff] %v9926_v38  ;;  %v552_v41 = vrot.slane %v9913_v34, %v9923_v37  ;;  %v844_v42 = vrot.slane %v9913_v34, %v9926_v38  ;;  %v9975_v59 = vrot.slane %v1129_v51, %v9919_v36 }
  0x71   : > { %476 = vperm.xlu0 %9076, %v369_v5   ;;  %v9937_v43 = vrot.slane %v840_v39, %v9916_v35  ;;  %v9940_v44 = vrot.slane %v548_v40, %v9919_v36  ;;  %v9984_v4 = vrot.slane %v1129_v51, %v9916_v35 }
  0x72   : > { %9072 = vset.pattern.permute.xlu1 %v12812_v0  ;;  %2270 = vmatpush1.bf16.msra.mxu0 %v9195_v20  ;;  %v9948_v48 = vrot.slane %v552_v41, %v9919_v36  ;;  %v9951_v49 = vrot.slane %v844_v42, %v9916_v35 }
  0x73   : > { %754 = vperm.xlu1 %9072, %v362_v62   ;;  %2656 = vmatpush1.bf16.msra.mxu1 %v9196_v21 }
  0x74   : > { %2432 = vmatprep.subr.bf16.mxu0 %v9199_v23  ;;  %2818 = vmatprep.subr.bf16.mxu1 %v9226_v7 }
  0x75   : > { %9081 = vset.pattern.permute.xlu0 %v12812_v0 }
  0x76   : > { %782 = vperm.xlu0 %9081, %v369_v5  }
  0x77   : > { %9073 = vset.pattern.permute.xlu1 %v12810_v1 }
  0x78   : > { %446 = vperm.xlu1 %9073, %v363_v13  }
  0x7a   : > { %798 = vperm.xlu0 %9081, %v373_v16  }
  0x7c   : > { %9074 = vset.pattern.permute.xlu1 %v12812_v0 }
  0x7d   : > { %758 = vperm.xlu1 %9074, %v363_v13  }
  0x7e   : > { %9086 = vset.pattern.permute.xlu0 %v12810_v1 }
  0x7f   : > { %491 = vperm.xlu0 %9086, %v372_v22  }
  0x81   : > { %762 = vperm.xlu1 %9074, %v9778_v52  }
  0x83   : > { %496 = vperm.xlu0 %9086, %v373_v16  }
  0x85   : > { %9075 = vset.pattern.permute.xlu1 %v12810_v1 }
  0x86   : > { %461 = vperm.xlu1 %9075, %v366_v24  }
  0x87   : > { %511 = vperm.xlu0 %9086, %v9883_v25  }
  0x8a   : > { %9077 = vset.pattern.permute.xlu1 %v12812_v0 }
  0x8b   : > { %770 = vperm.xlu1 %9077, %v366_v24   ;;  %9091 = vset.pattern.permute.xlu0 %v12812_v0 }
  0x8c   : > { %814 = vperm.xlu0 %9091, %v377_v26  }
  0x8f   : > { %9078 = vset.pattern.permute.xlu1 %v12810_v1 }
  0x90   : > { %466 = vperm.xlu1 %9078, %v367_v27   ;;  %9092 = vset.pattern.permute.xlu0 %v12810_v1 }
  0x91   : > { %516 = vperm.xlu0 %9092, %v377_v26  }
  0x94   : > { %9079 = vset.pattern.permute.xlu1 %v12812_v0 }
  0x95   : > { %774 = vperm.xlu1 %9079, %v367_v27   ;;  %531 = vperm.xlu0 %9092, %v9894_v28  }
  0x99   : > { %778 = vperm.xlu1 %9079, %v9808_v61   ;;  %536 = vperm.xlu0 %9092, %v381_v29  }
  0x9d   : > { %9080 = vset.pattern.permute.xlu1 %v12810_v1  ;;  %9097 = vset.pattern.permute.xlu0 %v12812_v0 }
  0x9e   : > { %481 = vperm.xlu1 %9080, %v370_v30   ;;  %830 = vperm.xlu0 %9097, %v381_v29  }
  0xa2   : > { %9082 = vset.pattern.permute.xlu1 %v12812_v0  ;;  %9099 = vset.pattern.permute.xlu0 %v12810_v1 }
  0xa3   : > { %786 = vperm.xlu1 %9082, %v370_v30  }
  0xa7   : > { %9083 = vset.pattern.permute.xlu1 %v12810_v1 }
  0xa8   : > { %486 = vperm.xlu1 %9083, %v371_v32  }
  0xac   : > { %9084 = vset.pattern.permute.xlu1 %v12812_v0 }
  0xad   : > { %790 = vperm.xlu1 %9084, %v371_v32  }
  0xb1   : > { %794 = vperm.xlu1 %9084, %v372_v22  }
  0xb4   : > { %v9943_v46 = vpop.permute.xlu1 %710  ;;  %v9945_v47 = vpop.permute.xlu0 %386 }
  0xb5   : > { %9085 = vset.pattern.permute.xlu1 %v12810_v1  ;;  %v873_v50 = vmul.f32 %v9937_v43, %v9943_v46  ;;  %v581_v52 = vmul.f32 %v9940_v44, %v9945_v47  ;;  %v582_v55 = vmul.f32 %v9948_v48, %v9945_v47  ;;  %v874_v56 = vmul.f32 %v9951_v49, %v9943_v46 }
  0xb6   : > { %501 = vperm.xlu1 %9085, %v374_v45  }
  0xb7   : > { %v1001_v62 = vadd.f32 %v873_v50, %v581_v52  ;;  %v1002_v3 = vadd.f32 %v874_v56, %v582_v55  ;;  %v9202_v56 = vld [vmem:[%s12799_s3 + $0x224] ss:$16 sps:$4 sm:$0xff]  }
  0xb8   : > { %v9961_v53 = vpop.permute.xlu1 %714  ;;  %v9963_v54 = vpop.permute.xlu0 %391 }
  0xb9   : > { %v877_v57 = vmul.f32 %v9937_v43, %v9961_v53  ;;  %v585_v58 = vmul.f32 %v9940_v44, %v9963_v54  ;;  %v586_v60 = vmul.f32 %v9948_v48, %v9963_v54  ;;  %v878_v61 = vmul.f32 %v9951_v49, %v9961_v53 }
  0xba   : > { %9087 = vset.pattern.permute.xlu1 %v12812_v0  ;;  %v1151_v9 = vadd.f32 %v9975_v59, %v1001_v62  ;;  %v1152_v13 = vadd.f32 %v9984_v4, %v1002_v3 }
  0xbb   : > { %802 = vperm.xlu1 %9087, %v374_v45   ;;  %v1005_v63 = vadd.f32 %v877_v57, %v585_v58  ;;  %v1006_v8 = vadd.f32 %v878_v61, %v586_v60  ;;  %v9197_v45 = vld [vmem:[%s12799_s3 + $0x200] ss:$16 sps:$4 sm:$0xff]   ;;  %v9224_v57 = vld [vmem:[%s12799_s3 + $0x208] ss:$16 sps:$4 sm:$0xff]   ;;  %v9229_v58 = vld [vmem:[%s12799_s3 + $0x22c] ss:$16 sps:$4 sm:$0xff]  }
  0xbc   : > { %v9981_v2 = vpop.permute.xlu0 %396  ;;  %v1279_v24 = vmax.f32 %v1151_v9, 0.0  ;;  %v1280_v26 = vmax.f32 %v1152_v13, 0.0  ;;  %v378_v9 = vld [vmem:[%s9636_s13 + $0xd8] sm:$0xff] }
  0xbd   : > { %v9986_v5 = vpop.permute.xlu1 %401  ;;  %v1155_v10 = vadd.f32 %v9975_v59, %v1005_v63  ;;  %v589_v11 = vmul.f32 %v9940_v44, %v9981_v2  ;;  %v590_v12 = vmul.f32 %v9948_v48, %v9981_v2  ;;  %v1156_v15 = vadd.f32 %v9984_v4, %v1006_v8 }
  0xbe   : > { %v593_v17 = vmul.f32 %v9940_v44, %v9986_v5  ;;  %v594_v21 = vmul.f32 %v9948_v48, %v9986_v5 }
  0xbf   : > { %9088 = vset.pattern.permute.xlu1 %v12810_v1  ;;  %v1283_v16 = vmax.f32 %v1155_v10, 0.0  ;;  %v1284_v27 = vmax.f32 %v1156_v15, 0.0  ;;  %v9200_v10 = vld [vmem:[%s12799_s3 + $0x220] ss:$16 sps:$4 sm:$0xff]  }
  0xc0   : > { %506 = vperm.xlu1 %9088, %v375_v6  }
  0xc1   : > { %v10000_v14 = vpop.permute.xlu0 %718  ;;  %v1407_v32 = vpack.c.bf16 %v1283_v16, %v1279_v24  ;;  %v1408_v42 = vpack.c.bf16 %v1284_v27, %v1280_v26  ;;  %v10075_v24 = vsub.s32 4, %v9908_v33 }
  0xc2   : > { %v10005_v18 = vpop.permute.xlu1 %722  ;;  %v881_v19 = vmul.f32 %v9937_v43, %v10000_v14  ;;  %v882_v20 = vmul.f32 %v9951_v49, %v10000_v14 }
  0xc3   : > { %v885_v22 = vmul.f32 %v9937_v43, %v10005_v18  ;;  %v886_v23 = vmul.f32 %v9951_v49, %v10005_v18  ;;  %2271 = vmatprep.mubr.bf16.mxu0 %v1408_v42  ;;  %2657 = vmatprep.mubr.bf16.mxu1 %v1408_v42  ;;  %12919 = vst [vmem:[#allocation17_spill] sm:$0xff] %v10075_v24 }
  0xc4   : > { %9089 = vset.pattern.permute.xlu1 %v12812_v0  ;;  %v1010_v29 = vadd.f32 %v882_v20, %v590_v12  ;;  %v1009_v30 = vadd.f32 %v881_v19, %v589_v11  ;;  %2272 = vmatmul.mubr.bf16.vlgmr.msra.gmra.mrb[0].mxu0 %v1407_v32  ;;  %v9227_v11 = vld [vmem:[%s12799_s3 + $0x228] ss:$16 sps:$4 sm:$0xff]   ;;  %v9205_v19 = vld [vmem:[%s12799_s3 + $0x244] ss:$16 sps:$4 sm:$0xff]   ;;  %v10065_v20 = vsub.s32 5, %v9908_v33 }
  0xc5   : > { %806 = vperm.xlu1 %9089, %v375_v6   ;;  %v10018_v39 = vpop.permute.xlu0 %734  ;;  %v1014_v40 = vadd.f32 %v886_v23, %v594_v21  ;;  %v1013_v41 = vadd.f32 %v885_v22, %v593_v17  ;;  %2658 = vmatmul.mubr.bf16.vlgmr.msra.gmra.mrb[0].mxu1 %v1407_v32  ;;  %v10068_v21 = vsub.s32 7, %v9908_v33  ;;  %v10082_v32 = vsub.s32 6, %v9908_v33 }
  0xc6   : > { %12913 = vst [vmem:[#allocation11_spill] sm:$0xff] %v10018_v39  ;;  %v1160_v51 = vadd.f32 %v9984_v4, %v1010_v29  ;;  %v1159_v55 = vadd.f32 %v9975_v59, %v1009_v30  ;;  %2433 = vmatpush1.bf16.msra.mxu0 %v9197_v45  ;;  %2819 = vmatpush1.bf16.msra.mxu1 %v9224_v57  ;;  %12917 = vst [vmem:[#allocation15_spill] sm:$0xff] %v10065_v20  ;;  %v9203_v45 = vld [vmem:[%s12799_s3 + $0x240] ss:$16 sps:$4 sm:$0xff]  }
  0xc7   : > { %v10023_v50 = vpop.permute.xlu1 %406  ;;  %v1164_v52 = vadd.f32 %v9984_v4, %v1014_v40  ;;  %v1163_v62 = vadd.f32 %v9975_v59, %v1013_v41  ;;  %2434 = vmatprep.subr.bf16.mxu0 %v9202_v56  ;;  %2820 = vmatprep.subr.bf16.mxu1 %v9229_v58  ;;  %12918 = vst [vmem:[#allocation16_spill] sm:$0xff] %v10068_v21  ;;  %12920 = vst [vmem:[#allocation18_spill] sm:$0xff] %v10082_v32  ;;  %v9208_v56 = vld [vmem:[%s12799_s3 + $0x264] ss:$16 sps:$4 sm:$0xff]  }
  0xc8   : > { %12914 = vst [vmem:[#allocation12_spill] sm:$0xff] %v10023_v50  ;;  %v1288_v60 = vmax.f32 %v1160_v51, 0.0  ;;  %v1287_v63 = vmax.f32 %v1159_v55, 0.0  ;;  %v597_v13 = vmul.f32 %v9940_v44, %v10023_v50  ;;  %v598_v15 = vmul.f32 %v9948_v48, %v10023_v50 }
  0xc9   : > { %v1292_v61 = vmax.f32 %v1164_v52, 0.0  ;;  %810 = vperm.xlu1 %9089, %v9883_v25   ;;  %v1291_v7 = vmax.f32 %v1163_v62, 0.0  ;;  %v898_v26 = vmul.f32 %v9951_v49, %v10018_v39  ;;  %v897_v51 = vmul.f32 %v9937_v43, %v10018_v39 }
  0xca   : > { %v10039_v3 = vpop.permute.xlu0 %411  ;;  %2435 = vmatpush1.bf16.msra.mxu0 %v9200_v10  ;;  %2821 = vmatpush1.bf16.msra.mxu1 %v9227_v11  ;;  %v848_v57 = vrot.slane %v9913_v34, %v10065_v20  ;;  %v852_v62 = vrot.slane %v9913_v34, %v10068_v21  ;;  %v9233_v10 = vld [vmem:[%s12799_s3 + $0x248] ss:$16 sps:$4 sm:$0xff]   ;;  %v560_v11 = vrot.slane %v9913_v34, %v10082_v32  ;;  %v12930_v21 = vmov 1  }
  0xcb   : > { %v1412_v6 = vpack.c.bf16 %v1292_v61, %v1288_v60  ;;  %v1411_v16 = vpack.c.bf16 %v1291_v7, %v1287_v63  ;;  %v601_v22 = vmul.f32 %v9940_v44, %v10039_v3  ;;  %v602_v23 = vmul.f32 %v9948_v48, %v10039_v3  ;;  %2436 = vmatprep.subr.bf16.mxu0 %v9205_v19  ;;  %v9235_v61 = vld [vmem:[%s12799_s3 + $0x24c] ss:$16 sps:$4 sm:$0xff]  }
  0xcc   : > { %v10041_v8 = vpop.permute.xlu1 %726  ;;  %v556_v63 = vrot.slane %v9913_v34, %v10075_v24  ;;  %v9238_v34 = vld [vmem:[%s12799_s3 + $0x26c] ss:$16 sps:$4 sm:$0xff]   ;;  %2822 = vmatprep.subr.bf16.mxu1 %v9235_v61 }
  0xcd   : > { %12915 = vst [vmem:[#allocation13_spill] sm:$0xff] %v10041_v8  ;;  %v889_v25 = vmul.f32 %v9937_v43, %v10041_v8  ;;  %v890_v12 = vmul.f32 %v9951_v49, %v10041_v8  ;;  %2281 = vmatprep.mubr.bf16.mxu0 %v1412_v6  ;;  %9090 = vset.pattern.permute.xlu1 %v12810_v1 }
  0xce   : > { %2667 = vmatprep.mubr.bf16.mxu1 %v1412_v6  ;;  %v10059_v17 = vpop.permute.xlu0 %416  ;;  %521 = vperm.xlu1 %9090, %v378_v9  }
  0xcf   : > { %12916 = vst [vmem:[#allocation14_spill] sm:$0xff] %v10059_v17  ;;  %v1018_v29 = vadd.f32 %v890_v12, %v598_v15  ;;  %v1017_v30 = vadd.f32 %v889_v25, %v597_v13  ;;  %2282 = vmatmul.mubr.bf16.gmra.mrb[4].mxu0 %v1411_v16  ;;  %2668 = vmatmul.mubr.bf16.gmra.mrb[4].mxu1 %v1411_v16 }
  0xd0   : > { %v10079_v27 = vpop.permute.xlu1 %730  ;;  %v606_v42 = vmul.f32 %v9948_v48, %v10059_v17  ;;  %v605_v52 = vmul.f32 %v9940_v44, %v10059_v17  ;;  %2437 = vmatpush1.bf16.msra.mxu0 %v9203_v45  ;;  %2823 = vmatpush1.bf16.msra.mxu1 %v9233_v10  ;;  %v10143_v45 = vrot.slane %v560_v11, %v9919_v36 }
  0xd1   : > { %v893_v40 = vmul.f32 %v9937_v43, %v10079_v27  ;;  %v894_v41 = vmul.f32 %v9951_v49, %v10079_v27  ;;  %v1168_v6 = vadd.f32 %v9984_v4, %v1018_v29  ;;  %v1167_v7 = vadd.f32 %v9975_v59, %v1017_v30  ;;  %2438 = vmatprep.subr.bf16.mxu0 %v9208_v56 }
  0xd2   : > { %v10097_v55 = vpop.permute.xlu0 %431  ;;  %9093 = vset.pattern.permute.xlu1 %v12812_v0  ;;  %v1026_v12 = vadd.f32 %v898_v26, %v606_v42  ;;  %v1025_v16 = vadd.f32 %v897_v51, %v605_v52  ;;  %v10139_v42 = vrot.slane %v556_v63, %v9919_v36  ;;  %2824 = vmatprep.subr.bf16.mxu1 %v9238_v34 }
  0xd3   : > { %12921 = vst [vmem:[#allocation19_spill] sm:$0xff] %v10097_v55  ;;  %v1021_v58 = vadd.f32 %v893_v40, %v601_v22  ;;  %v1022_v60 = vadd.f32 %v894_v41, %v602_v23  ;;  %818 = vperm.xlu1 %9093, %v378_v9   ;;  %v379_v9 = vld [vmem:[%s9636_s13 + $0xe0] sm:$0xff]  ;;  %v1296_v23 = vmax.f32 %v1168_v6, 0.0  ;;  %v1295_v29 = vmax.f32 %v1167_v7, 0.0 }
  0xd4   : > { %v9206_v22 = vld [vmem:[%s12799_s3 + $0x260] ss:$16 sps:$4 sm:$0xff]   ;;  %v10133_v40 = vrot.slane %v848_v57, %v9916_v35  ;;  %v10136_v41 = vrot.slane %v852_v62, %v9916_v35  ;;  %v1176_v56 = vadd.f32 %v9984_v4, %v1026_v12  ;;  %v9211_v62 = vld [vmem:[%s12799_s3 + $0x284] ss:$16 sps:$4 sm:$0xff]  }
  0xd5   : > { %v10119_v25 = vpop.permute.xlu1 %421  ;;  %v1172_v13 = vadd.f32 %v9984_v4, %v1022_v60  ;;  %v1171_v15 = vadd.f32 %v9975_v59, %v1021_v58  ;;  %v1175_v60 = vadd.f32 %v9975_v59, %v1025_v16  ;;  %2439 = vmatpush1.bf16.msra.mxu0 %v9206_v22  ;;  %v9209_v12 = vld [vmem:[%s12799_s3 + $0x280] ss:$16 sps:$4 sm:$0xff]   ;;  %v9214_v16 = vld [vmem:[%s12799_s3 + $0x2a4] ss:$16 sps:$4 sm:$0xff]  }
  0xd6   : > { %12922 = vst [vmem:[#allocation20_spill] sm:$0xff] %v10119_v25  ;;  %v10124_v19 = vpop.permute.xlu0 %436  ;;  %v609_v57 = vmul.f32 %v9940_v44, %v10119_v25  ;;  %v610_v63 = vmul.f32 %v9948_v48, %v10119_v25  ;;  %2440 = vmatprep.subr.bf16.mxu0 %v9211_v62 }
  0xd7   : > { %v1300_v26 = vmax.f32 %v1172_v13, 0.0  ;;  %v1299_v30 = vmax.f32 %v1171_v15, 0.0  ;;  %9094 = vset.pattern.permute.xlu1 %v12810_v1  ;;  %v623_v61 = vmul.f32 %v10139_v42, %v10124_v19  ;;  %v624_v10 = vmul.f32 %v10143_v45, %v10124_v19  ;;  %v9236_v13 = vld [vmem:[%s12799_s3 + $0x268] ss:$16 sps:$4 sm:$0xff]  }
  0xd8   : > { %526 = vperm.xlu1 %9094, %v379_v9   ;;  %2825 = vmatpush1.bf16.msra.mxu1 %v9236_v13 }
  0xd9   : > { %v1416_v51 = vpack.c.bf16 %v1300_v26, %v1296_v23  ;;  %v1415_v52 = vpack.c.bf16 %v1299_v30, %v1295_v29  ;;  %v9244_v26 = vld [vmem:[%s12799_s3 + $0x28c] ss:$16 sps:$4 sm:$0xff]   ;;  %v1304_v29 = vmax.f32 %v1176_v56, 0.0  ;;  %2441 = vmatpush1.bf16.msra.mxu0 %v9209_v12  ;;  %v9242_v56 = vld [vmem:[%s12799_s3 + $0x288] ss:$16 sps:$4 sm:$0xff]  }
  0xda   : > { %v10148_v58 = vpop.permute.xlu1 %738  ;;  %2442 = vmatprep.subr.bf16.mxu0 %v9214_v16  ;;  %2826 = vmatprep.subr.bf16.mxu1 %v9244_v26  ;;  %v9220_v26 = vld [vmem:[%s12799_s3 + $0x2e4] ss:$16 sps:$4 sm:$0xff]  }
  0xdb   : > { %12923 = vst [vmem:[#allocation21_spill] sm:$0xff] %v10148_v58  ;;  %v901_v6 = vmul.f32 %v9937_v43, %v10148_v58  ;;  %v902_v7 = vmul.f32 %v9951_v49, %v10148_v58  ;;  %2291 = vmatprep.mubr.bf16.mxu0 %v1416_v51  ;;  %v10164_v11 = vpop.permute.xlu0 %750  ;;  %2677 = vmatprep.mubr.bf16.mxu1 %v1416_v51 }
  0xdc   : > { %2292 = vmatmul.mubr.bf16.gmra.mrb[8].mxu0 %v1415_v52  ;;  %v915_v15 = vmul.f32 %v10133_v40, %v10164_v11  ;;  %9095 = vset.pattern.permute.xlu1 %v12812_v0  ;;  %v916_v23 = vmul.f32 %v10136_v41, %v10164_v11 }
  0xdd   : > { %2678 = vmatmul.mubr.bf16.gmra.mrb[8].mxu1 %v1415_v52  ;;  %v1030_v22 = vadd.f32 %v902_v7, %v610_v63  ;;  %v1029_v34 = vadd.f32 %v901_v6, %v609_v57  ;;  %822 = vperm.xlu1 %9095, %v379_v9   ;;  %v1303_v63 = vmax.f32 %v1175_v60, 0.0  ;;  %v9212_v9 = vld [vmem:[%s12799_s3 + $0x2a0] ss:$16 sps:$4 sm:$0xff]   ;;  %v9217_v60 = vld [vmem:[%s12799_s3 + $0x2c4] ss:$16 sps:$4 sm:$0xff]  }
  0xde   : > { %v10183_v30 = vadd.f32 %v915_v15, %v623_v61  ;;  %v10189_v57 = vadd.f32 %v916_v23, %v624_v10  ;;  %v9247_v61 = vld [vmem:[%s12799_s3 + $0x2ac] ss:$16 sps:$4 sm:$0xff]   ;;  %2443 = vmatpush1.bf16.msra.mxu0 %v9212_v9  ;;  %2827 = vmatpush1.bf16.msra.mxu1 %v9242_v56 }
  0xdf   : > { %v10185_v51 = vpop.permute.xlu1 %426  ;;  %v1180_v31 = vadd.f32 %v9984_v4, %v1030_v22  ;;  %v1179_v52 = vadd.f32 %v9975_v59, %v1029_v34  ;;  %v10191_v6 = vpop.permute.xlu0 %766  ;;  %v382_v15 = vld [vmem:[%s9636_s13 + $0xf8] sm:$0xff]  ;;  %v9215_v22 = vld [vmem:[%s12799_s3 + $0x2c0] ss:$16 sps:$4 sm:$0xff]   ;;  %2444 = vmatprep.subr.bf16.mxu0 %v9217_v60  ;;  %2828 = vmatprep.subr.bf16.mxu1 %v9247_v61 }
  0xe0   : > { %12924 = vst [vmem:[#allocation22_spill] sm:$0xff] %v10183_v30  ;;  %12925 = vst [vmem:[#allocation23_spill] sm:$0xff] %v10185_v51  ;;  %v931_v32 = vmul.f32 %v10133_v40, %v10191_v6  ;;  %v932_v20 = vmul.f32 %v10136_v41, %v10191_v6 }
  0xe1   : > { %12926 = vst [vmem:[#allocation24_spill] sm:$0xff] %v10189_v57  ;;  %v1308_v62 = vmax.f32 %v1180_v31, 0.0  ;;  %v1307_v7 = vmax.f32 %v1179_v52, 0.0  ;;  %826 = vperm.xlu1 %9095, %v9894_v28   ;;  %v613_v31 = vmul.f32 %v9940_v44, %v10185_v51  ;;  %v614_v28 = vmul.f32 %v9948_v48, %v10185_v51  ;;  %v9245_v52 = vld [vmem:[%s12799_s3 + $0x2a8] ss:$16 sps:$4 sm:$0xff]  }
  0xe2   : > { %2445 = vmatpush1.bf16.msra.mxu0 %v9215_v22  ;;  %v9223_v22 = vld [vmem:[%s12799_s3 + $0x304] ss:$16 sps:$4 sm:$0xff]   ;;  %2829 = vmatpush1.bf16.msra.mxu1 %v9245_v52 }
  0xe3   : > { %v1420_v10 = vpack.c.bf16 %v1308_v62, %v1304_v29  ;;  %v1419_v12 = vpack.c.bf16 %v1307_v7, %v1303_v63  ;;  %v617_v29 = vmul.f32 %v9940_v44, %v10097_v55  ;;  %v618_v63 = vmul.f32 %v9948_v48, %v10097_v55  ;;  %v9218_v62 = vld [vmem:[%s12799_s3 + $0x2e0] ss:$16 sps:$4 sm:$0xff]   ;;  %2446 = vmatprep.subr.bf16.mxu0 %v9220_v26 }
  0xe4   : > { %v10206_v13 = vpop.permute.xlu1 %742  ;;  %v10209_v16 = vpop.permute.xlu0 %451 }
  0xe5   : > { %12927 = vst [vmem:[#allocation25_spill] sm:$0xff] %v10206_v13  ;;  %12928 = vst [vmem:[#allocation26_spill] sm:$0xff] %v10209_v16  ;;  %v905_v34 = vmul.f32 %v9937_v43, %v10206_v13  ;;  %v906_v23 = vmul.f32 %v9951_v49, %v10206_v13  ;;  %2301 = vmatprep.mubr.bf16.mxu0 %v1420_v10  ;;  %9096 = vset.pattern.permute.xlu1 %v12810_v1 }
  0xe6   : > { %2687 = vmatprep.mubr.bf16.mxu1 %v1420_v10  ;;  %541 = vperm.xlu1 %9096, %v382_v15  }
  0xe7   : > { %2302 = vmatmul.mubr.bf16.gmra.mrb[12].mxu0 %v1419_v12  ;;  %v1034_v9 = vadd.f32 %v906_v23, %v614_v28  ;;  %v1033_v56 = vadd.f32 %v905_v34, %v613_v31  ;;  %2688 = vmatmul.mubr.bf16.gmra.mrb[12].mxu1 %v1419_v12  ;;  %v621_v28 = vmul.f32 %v9940_v44, %v10124_v19 }
  0xe8   : > { %v10233_v60 = vpop.permute.xlu1 %746  ;;  %v10235_v61 = vpop.permute.xlu0 %456  ;;  %v622_v12 = vmul.f32 %v9948_v48, %v10124_v19  ;;  %v913_v31 = vmul.f32 %v9937_v43, %v10164_v11  ;;  %v914_v34 = vmul.f32 %v9951_v49, %v10164_v11  ;;  %v9253_v19 = vld [vmem:[%s12799_s3 + $0x2cc] ss:$16 sps:$4 sm:$0xff]   ;;  %v9251_v11 = vld [vmem:[%s12799_s3 + $0x2c8] ss:$16 sps:$4 sm:$0xff]   ;;  %2447 = vmatpush1.bf16.msra.mxu0 %v9218_v62 }
  0xe9   : > { %12929 = vst [vmem:[#allocation27_spill] sm:$0xff] %v10233_v60  ;;  %v909_v7 = vmul.f32 %v9937_v43, %v10233_v60  ;;  %v910_v10 = vmul.f32 %v9951_v49, %v10233_v60  ;;  %v1184_v23 = vadd.f32 %v9984_v4, %v1034_v9  ;;  %v1183_v1 = vadd.f32 %v9975_v59, %v1033_v56  ;;  %v9256_v62 = vld [vmem:[%s12799_s3 + $0x2ec] ss:$16 sps:$4 sm:$0xff]  }
  0xea   : > { %9098 = vset.pattern.permute.xlu1 %v12930_v21  ;;  %v639_v52 = vmul.f32 %v10139_v42, %v10235_v61  ;;  %v9221_v21 = vld [vmem:[%s12799_s3 + $0x300] ss:$16 sps:$4 sm:$0xff]   ;;  %2448 = vmatprep.subr.bf16.mxu0 %v9223_v22  ;;  %v1042_v24 = vadd.f32 %v914_v34, %v622_v12  ;;  %v12936_v34 = vmov 0  }
  0xeb   : > { %v1037_v26 = vadd.f32 %v909_v7, %v617_v29  ;;  %v1038_v0 = vadd.f32 %v910_v10, %v618_v63  ;;  %834 = vperm.xlu1 %9098, %v382_v15   ;;  %v640_v29 = vmul.f32 %v10143_v45, %v10235_v61  ;;  %v9232_v15 = vld [vmem:[%s12799_s3 + $0x324] ss:$16 sps:$4 sm:$0xff]   ;;  %v1041_v10 = vadd.f32 %v913_v31, %v621_v28 }
  0xec   : > { %v10272_v63 = vpop.permute.xlu0 %471  ;;  %v1312_v35 = vmax.f32 %v1184_v23, 0.0  ;;  %v1311_v36 = vmax.f32 %v1183_v1, 0.0  ;;  %2830 = vmatprep.subr.bf16.mxu1 %v9253_v19  ;;  %v10287_v57 = vadd.f32 %v931_v32, %v639_v52  ;;  %2449 = vmatpush1.bf16.msra.mxu0 %v9221_v21  ;;  %v9230_v1 = vld [vmem:[%s12799_s3 + $0x320] ss:$16 sps:$4 sm:$0xff]   ;;  %v1192_v31 = vadd.f32 %v9984_v4, %v1042_v24  ;;  %v9262_v23 = vld [vmem:[%s12799_s3 + $0x30c] ss:$16 sps:$4 sm:$0xff]  }
  0xed   : > { %12931 = vst [vmem:[#allocation28_spill] sm:$0xff] %v10272_v63  ;;  %v10277_v9 = vpop.permute.xlu1 %441  ;;  %v1188_v56 = vadd.f32 %v9984_v4, %v1038_v0  ;;  %v1187_v7 = vadd.f32 %v9975_v59, %v1037_v26  ;;  %v10289_v0 = vadd.f32 %v932_v20, %v640_v29  ;;  %2831 = vmatpush1.bf16.msra.mxu1 %v9251_v11  ;;  %v9241_v20 = vld [vmem:[%s12799_s3 + $0x344] ss:$16 sps:$4 sm:$0xff]   ;;  %v9239_v29 = vld [vmem:[%s12799_s3 + $0x340] ss:$16 sps:$4 sm:$0xff]  }
  0xee   : > { %12932 = vst [vmem:[#allocation29_spill] sm:$0xff] %v10277_v9  ;;  %12933 = vst [vmem:[#allocation30_spill] sm:$0xff] %v10287_v57  ;;  %2450 = vmatprep.subr.bf16.mxu0 %v9232_v15  ;;  %v1191_v32 = vadd.f32 %v9975_v59, %v1041_v10  ;;  %2832 = vmatprep.subr.bf16.mxu1 %v9256_v62  ;;  %v9250_v10 = vld [vmem:[%s12799_s3 + $0x364] ss:$16 sps:$4 sm:$0xff]  }
  0xef   : > { %v1316_v33 = vmax.f32 %v1188_v56, 0.0  ;;  %v1315_v30 = vmax.f32 %v1187_v7, 0.0  ;;  %12934 = vst [vmem:[#allocation31_spill] sm:$0xff] %v10289_v0  ;;  %9100 = vset.pattern.permute.xlu1 %v12936_v34 }
  0xf0   : > { %v10291_v22 = vpop.permute.xlu0 %476  ;;  %2451 = vmatpush1.bf16.msra.mxu0 %v9230_v1 }
  0xf1   : > { %v1424_v26 = vpack.c.bf16 %v1316_v33, %v1312_v35  ;;  %v1423_v28 = vpack.c.bf16 %v1315_v30, %v1311_v36  ;;  %v625_v33 = vmul.f32 %v9940_v44, %v10277_v9  ;;  %v626_v35 = vmul.f32 %v9948_v48, %v10277_v9  ;;  %v9254_v30 = vld [vmem:[%s12799_s3 + $0x2e8] ss:$16 sps:$4 sm:$0xff]   ;;  %2452 = vmatprep.subr.bf16.mxu0 %v9241_v20  ;;  %v9265_v20 = vld [vmem:[%s12799_s3 + $0x32c] ss:$16 sps:$4 sm:$0xff]  }
  0xf2   : > { %v10296_v12 = vpop.permute.xlu1 %754  ;;  %v655_v21 = vmul.f32 %v10139_v42, %v10291_v22  ;;  %v656_v56 = vmul.f32 %v10143_v45, %v10291_v22  ;;  %2833 = vmatpush1.bf16.msra.mxu1 %v9254_v30 }
  0xf3   : > { %12935 = vst [vmem:[#allocation32_spill] sm:$0xff] %v10296_v12  ;;  %v917_v36 = vmul.f32 %v9937_v43, %v10296_v12  ;;  %v918_v24 = vmul.f32 %v9951_v49, %v10296_v12  ;;  %2311 = vmatprep.mubr.bf16.mxu0 %v1424_v26  ;;  %2697 = vmatprep.mubr.bf16.mxu1 %v1424_v26 }
  0xf4   : > { %2312 = vmatmul.mubr.bf16.gmra.mrb[16].mxu0 %v1423_v28  ;;  %2698 = vmatmul.mubr.bf16.gmra.mrb[16].mxu1 %v1423_v28  ;;  %v1320_v28 = vmax.f32 %v1192_v31, 0.0 }
  0xf5   : > { %v1046_v19 = vadd.f32 %v918_v24, %v626_v35  ;;  %v1045_v11 = vadd.f32 %v917_v36, %v625_v33  ;;  %v10318_v52 = vpop.permute.xlu0 %782  ;;  %v1319_v33 = vmax.f32 %v1191_v32, 0.0  ;;  %v9260_v35 = vld [vmem:[%s12799_s3 + $0x308] ss:$16 sps:$4 sm:$0xff]   ;;  %2834 = vmatprep.subr.bf16.mxu1 %v9262_v23  ;;  %2453 = vmatpush1.bf16.msra.mxu0 %v9239_v29  ;;  %v9248_v23 = vld [vmem:[%s12799_s3 + $0x360] ss:$16 sps:$4 sm:$0xff]  }
  0xf6   : > { %v947_v7 = vmul.f32 %v10133_v40, %v10318_v52  ;;  %v948_v15 = vmul.f32 %v10136_v41, %v10318_v52  ;;  %2454 = vmatprep.subr.bf16.mxu0 %v9250_v10  ;;  %2835 = vmatpush1.bf16.msra.mxu1 %v9260_v35 }
  0xf7   : > { %v10334_v62 = vpop.permute.xlu1 %446  ;;  %v1196_v26 = vadd.f32 %v9984_v4, %v1046_v19  ;;  %v1195_v1 = vadd.f32 %v9975_v59, %v1045_v11  ;;  %2836 = vmatprep.subr.bf16.mxu1 %v9265_v20 }
  0xf8   : > { %12937 = vst [vmem:[#allocation33_spill] sm:$0xff] %v10334_v62  ;;  %v10346_v19 = vadd.f32 %v947_v7, %v655_v21  ;;  %v10348_v31 = vadd.f32 %v948_v15, %v656_v56  ;;  %v629_v29 = vmul.f32 %v9940_v44, %v10334_v62  ;;  %v630_v21 = vmul.f32 %v9948_v48, %v10334_v62  ;;  %v9259_v15 = vld [vmem:[%s12799_s3 + $0x384] ss:$16 sps:$4 sm:$0xff]  }
  0xf9   : > { %v1324_v36 = vmax.f32 %v1196_v26, 0.0  ;;  %v1323_v24 = vmax.f32 %v1195_v1, 0.0  ;;  %v10344_v34 = vpop.permute.xlu0 %798  ;;  %v9263_v26 = vld [vmem:[%s12799_s3 + $0x328] ss:$16 sps:$4 sm:$0xff]   ;;  %v633_v1 = vmul.f32 %v9940_v44, %v10209_v16  ;;  %2455 = vmatpush1.bf16.msra.mxu0 %v9248_v23  ;;  %v9268_v23 = vld [vmem:[%s12799_s3 + $0x3a4] ss:$16 sps:$4 sm:$0xff]  }
  0xfa   : > { %12938 = vst [vmem:[#allocation34_spill] sm:$0xff] %v10346_v19  ;;  %12939 = vst [vmem:[#allocation35_spill] sm:$0xff] %v10348_v31  ;;  %2837 = vmatpush1.bf16.msra.mxu1 %v9263_v26  ;;  %2456 = vmatprep.subr.bf16.mxu0 %v9259_v15  ;;  %v930_v26 = vmul.f32 %v9951_v49, %v10191_v6  ;;  %v9274_v15 = vld [vmem:[%s12799_s3 + $0x36c] ss:$16 sps:$4 sm:$0xff]  }
  0xfb   : > { %v1428_v32 = vpack.c.bf16 %v1324_v36, %v1320_v28  ;;  %v1427_v30 = vpack.c.bf16 %v1323_v24, %v1319_v33  ;;  %v9271_v28 = vld [vmem:[%s12799_s3 + $0x34c] ss:$16 sps:$4 sm:$0xff]   ;;  %v634_v33 = vmul.f32 %v9948_v48, %v10209_v16  ;;  %v9257_v24 = vld [vmem:[%s12799_s3 + $0x380] ss:$16 sps:$4 sm:$0xff]  }
  0xfc   : > { %v10350_v11 = vpop.permute.xlu1 %758  ;;  %2838 = vmatprep.subr.bf16.mxu1 %v9271_v28 }
  0xfd   : > { %12940 = vst [vmem:[#allocation36_spill] sm:$0xff] %v10350_v11  ;;  %v921_v56 = vmul.f32 %v9937_v43, %v10350_v11  ;;  %v922_v7 = vmul.f32 %v9951_v49, %v10350_v11  ;;  %2321 = vmatprep.mubr.bf16.mxu0 %v1428_v32  ;;  %2707 = vmatprep.mubr.bf16.mxu1 %v1428_v32  ;;  %v9269_v32 = vld [vmem:[%s12799_s3 + $0x348] ss:$16 sps:$4 sm:$0xff]  }
  0xfe   : > { %2322 = vmatmul.mubr.bf16.gmra.mrb[20].mxu0 %v1427_v30  ;;  %v10369_v10 = vpop.permute.xlu0 %491  ;;  %2708 = vmatmul.mubr.bf16.gmra.mrb[20].mxu1 %v1427_v30  ;;  %v964_v11 = vmul.f32 %v10136_v41, %v10344_v34 }
  0xff   : > { %v1050_v35 = vadd.f32 %v922_v7, %v630_v21  ;;  %v1049_v20 = vadd.f32 %v921_v56, %v629_v29  ;;  %v929_v29 = vmul.f32 %v9937_v43, %v10191_v6  ;;  %v637_v21 = vmul.f32 %v9940_v44, %v10235_v61  ;;  %2457 = vmatpush1.bf16.msra.mxu0 %v9257_v24 }
 0x100   : > { %v10378_v36 = vpop.permute.xlu1 %762  ;;  %v638_v56 = vmul.f32 %v9948_v48, %v10235_v61  ;;  %v963_v6 = vmul.f32 %v10133_v40, %v10344_v34  ;;  %v9266_v61 = vld [vmem:[%s12799_s3 + $0x3a0] ss:$16 sps:$4 sm:$0xff]   ;;  %2839 = vmatpush1.bf16.msra.mxu1 %v9269_v32  ;;  %2458 = vmatprep.subr.bf16.mxu0 %v9268_v23 }
 0x101   : > { %12941 = vst [vmem:[#allocation37_spill] sm:$0xff] %v10378_v36  ;;  %v925_v30 = vmul.f32 %v9937_v43, %v10378_v36  ;;  %v926_v19 = vmul.f32 %v9951_v49, %v10378_v36  ;;  %v1200_v0 = vadd.f32 %v9984_v4, %v1050_v35  ;;  %v1199_v62 = vadd.f32 %v9975_v59, %v1049_v20  ;;  %v9272_v20 = vld [vmem:[%s12799_s3 + $0x368] ss:$16 sps:$4 sm:$0xff]  }
 0x102   : > { %v10401_v7 = vpop.permute.xlu0 %496  ;;  %v1057_v24 = vadd.f32 %v929_v29, %v637_v21  ;;  %2840 = vmatprep.subr.bf16.mxu1 %v9274_v15 }
 0x103   : > { %v1053_v31 = vadd.f32 %v925_v30, %v633_v1  ;;  %v1054_v57 = vadd.f32 %v926_v19, %v634_v33  ;;  %v671_v33 = vmul.f32 %v10139_v42, %v10401_v7  ;;  %v672_v35 = vmul.f32 %v10143_v45, %v10401_v7  ;;  %2459 = vmatpush1.bf16.msra.mxu0 %v9266_v61  ;;  %v9283_v61 = vld [vmem:[%s12799_s3 + $0x3ac] ss:$16 sps:$4 sm:$0xff]  }
 0x104   : > { %v1058_v30 = vadd.f32 %v930_v26, %v638_v56  ;;  %v1328_v32 = vmax.f32 %v1200_v0, 0.0  ;;  %v1327_v16 = vmax.f32 %v1199_v62, 0.0  ;;  %2841 = vmatpush1.bf16.msra.mxu1 %v9272_v20  ;;  %v1207_v15 = vadd.f32 %v9975_v59, %v1057_v24  ;;  %v9275_v0 = vld [vmem:[%s12799_s3 + $0x3c0] ss:$16 sps:$4 sm:$0xff]   ;;  %v9278_v62 = vld [vmem:[%s12799_s3 + $0x388] ss:$16 sps:$4 sm:$0xff]  }
 0x105   : > { %v10415_v28 = vpop.permute.xlu1 %461  ;;  %v1204_v19 = vadd.f32 %v9984_v4, %v1054_v57  ;;  %v1203_v1 = vadd.f32 %v9975_v59, %v1053_v31  ;;  %v9277_v57 = vld [vmem:[%s12799_s3 + $0x3c4] ss:$16 sps:$4 sm:$0xff]   ;;  %v9280_v31 = vld [vmem:[%s12799_s3 + $0x38c] ss:$16 sps:$4 sm:$0xff]   ;;  %v10434_v12 = vadd.f32 %v963_v6, %v671_v33  ;;  %v10436_v51 = vadd.f32 %v964_v11, %v672_v35  ;;  %v9281_v35 = vld [vmem:[%s12799_s3 + $0x3a8] ss:$16 sps:$4 sm:$0xff]  }
 0x106   : > { %12942 = vst [vmem:[#allocation38_spill] sm:$0xff] %v10415_v28  ;;  %v10432_v23 = vpop.permute.xlu0 %511  ;;  %v1208_v56 = vadd.f32 %v9984_v4, %v1058_v30  ;;  %2460 = vmatprep.subr.bf16.mxu0 %v9277_v57  ;;  %2842 = vmatprep.subr.bf16.mxu1 %v9280_v31  ;;  %v9284_v20 = vld [vmem:[%s12799_s3 + $0x3e0] ss:$16 sps:$4 sm:$0xff]  }
 0x107   : > { %v1332_v36 = vmax.f32 %v1204_v19, 0.0  ;;  %v1331_v9 = vmax.f32 %v1203_v1, 0.0  ;;  %v9286_v19 = vld [vmem:[%s12799_s3 + $0x3e4] ss:$16 sps:$4 sm:$0xff]   ;;  %2461 = vmatpush1.bf16.msra.mxu0 %v9275_v0 }
 0x108   : > { %2843 = vmatpush1.bf16.msra.mxu1 %v9278_v62  ;;  %v1336_v57 = vmax.f32 %v1208_v56, 0.0  ;;  %2462 = vmatprep.subr.bf16.mxu0 %v9286_v19 }
 0x109   : > { %v1432_v29 = vpack.c.bf16 %v1332_v36, %v1328_v32  ;;  %v1431_v26 = vpack.c.bf16 %v1331_v9, %v1327_v16  ;;  %v641_v16 = vmul.f32 %v9940_v44, %v10415_v28  ;;  %v642_v9 = vmul.f32 %v9948_v48, %v10415_v28  ;;  %2844 = vmatprep.subr.bf16.mxu1 %v9283_v61 }
 0x10a   : > { %v10438_v21 = vpop.permute.xlu1 %770  ;;  %v1335_v32 = vmax.f32 %v1207_v15, 0.0 }
 0x10b   : > { %12943 = vst [vmem:[#allocation39_spill] sm:$0xff] %v10438_v21  ;;  %v933_v11 = vmul.f32 %v9937_v43, %v10438_v21  ;;  %v934_v36 = vmul.f32 %v9951_v49, %v10438_v21  ;;  %2331 = vmatprep.mubr.bf16.mxu0 %v1432_v29  ;;  %v10456_v6 = vpop.permute.xlu0 %814  ;;  %2717 = vmatprep.mubr.bf16.mxu1 %v1432_v29  ;;  %v9289_v29 = vld [vmem:[%s12799_s3 + $0x3cc] ss:$16 sps:$4 sm:$0xff]  }
 0x10c   : > { %2332 = vmatmul.mubr.bf16.gmra.mrb[24].mxu0 %v1431_v26  ;;  %2718 = vmatmul.mubr.bf16.gmra.mrb[24].mxu1 %v1431_v26  ;;  %v979_v26 = vmul.f32 %v10133_v40, %v10456_v6  ;;  %v980_v0 = vmul.f32 %v10136_v41, %v10456_v6 }
 0x10d   : > { %v1062_v1 = vadd.f32 %v934_v36, %v642_v9  ;;  %v1061_v33 = vadd.f32 %v933_v11, %v641_v16  ;;  %2845 = vmatpush1.bf16.msra.mxu1 %v9281_v35  ;;  %2463 = vmatpush1.bf16.msra.mxu0 %v9284_v20 }
 0x10e   : > { %2846 = vmatprep.subr.bf16.mxu1 %v9289_v29  ;;  %v650_v29 = vmul.f32 %v9948_v48, %v10272_v63 }
 0x10f   : > { %v10470_v24 = vpop.permute.xlu1 %466  ;;  %v1212_v30 = vadd.f32 %v9984_v4, %v1062_v1  ;;  %v1211_v31 = vadd.f32 %v9975_v59, %v1061_v33  ;;  %v9287_v33 = vld [vmem:[%s12799_s3 + $0x3c8] ss:$16 sps:$4 sm:$0xff]  }
 0x110   : > { %12944 = vst [vmem:[#allocation40_spill] sm:$0xff] %v10470_v24  ;;  %v10481_v9 = vpop.permute.xlu0 %516  ;;  %v646_v35 = vmul.f32 %v9948_v48, %v10470_v24 }
 0x111   : > { %v1340_v62 = vmax.f32 %v1212_v30, 0.0  ;;  %v1339_v16 = vmax.f32 %v1211_v31, 0.0  ;;  %v687_v56 = vmul.f32 %v10139_v42, %v10481_v9  ;;  %v688_v15 = vmul.f32 %v10143_v45, %v10481_v9  ;;  %v9292_v31 = vld [vmem:[%s12799_s3 + $0x3ec] ss:$16 sps:$4 sm:$0xff]   ;;  %2847 = vmatpush1.bf16.msra.mxu1 %v9287_v33 }
 0x112   : > { %v645_v30 = vmul.f32 %v9940_v44, %v10470_v24  ;;  %2848 = vmatprep.subr.bf16.mxu1 %v9292_v31  ;;  %v945_v33 = vmul.f32 %v9937_v43, %v10318_v52 }
 0x113   : > { %v1436_v11 = vpack.c.bf16 %v1340_v62, %v1336_v57  ;;  %v1435_v36 = vpack.c.bf16 %v1339_v16, %v1335_v32  ;;  %v10489_v19 = vadd.f32 %v979_v26, %v687_v56  ;;  %v10491_v1 = vadd.f32 %v980_v0, %v688_v15  ;;  %v9290_v16 = vld [vmem:[%s12799_s3 + $0x3e8] ss:$16 sps:$4 sm:$0xff]  }
 0x114   : > { %v10487_v61 = vpop.permute.xlu1 %774  ;;  %v649_v32 = vmul.f32 %v9940_v44, %v10272_v63 }
 0x115   : > { %12945 = vst [vmem:[#allocation41_spill] sm:$0xff] %v10487_v61  ;;  %v937_v20 = vmul.f32 %v9937_v43, %v10487_v61  ;;  %v938_v57 = vmul.f32 %v9951_v49, %v10487_v61  ;;  %2341 = vmatprep.mubr.bf16.mxu0 %v1436_v11  ;;  %2727 = vmatprep.mubr.bf16.mxu1 %v1436_v11 }
 0x116   : > { %2342 = vmatmul.mubr.bf16.gmra.mrb[28].mxu0 %v1435_v36  ;;  %2728 = vmatmul.mubr.bf16.gmra.mrb[28].mxu1 %v1435_v36  ;;  %v653_v11 = vmul.f32 %v9940_v44, %v10291_v22  ;;  %v654_v36 = vmul.f32 %v9948_v48, %v10291_v22 }
 0x117   : > { %v1066_v26 = vadd.f32 %v938_v57, %v646_v35  ;;  %v1065_v0 = vadd.f32 %v937_v20, %v645_v30  ;;  %v946_v30 = vmul.f32 %v9951_v49, %v10318_v52  ;;  %2849 = vmatpush1.bf16.msra.mxu1 %v9290_v16 }
 0x118   : > { %v10511_v62 = vpop.permute.xlu1 %778  ;;  %v1073_v22 = vadd.f32 %v945_v33, %v653_v11 }
 0x119   : > { %12946 = vst [vmem:[#allocation42_spill] sm:$0xff] %v10511_v62  ;;  %v941_v56 = vmul.f32 %v9937_v43, %v10511_v62  ;;  %v942_v15 = vmul.f32 %v9951_v49, %v10511_v62  ;;  %v1216_v57 = vadd.f32 %v9984_v4, %v1066_v26  ;;  %v1215_v24 = vadd.f32 %v9975_v59, %v1065_v0 }
 0x11a   : > { %v1074_v63 = vadd.f32 %v946_v30, %v654_v36  ;;  %v1223_v0 = vadd.f32 %v9975_v59, %v1073_v22 }
 0x11b   : > { %v1069_v35 = vadd.f32 %v941_v56, %v649_v32  ;;  %v1070_v20 = vadd.f32 %v942_v15, %v650_v29  ;;  %v1344_v28 = vmax.f32 %v1216_v57, 0.0  ;;  %v1343_v13 = vmax.f32 %v1215_v24, 0.0 }
 0x11c   : > { %v1224_v26 = vadd.f32 %v9984_v4, %v1074_v63 }
 0x11d   : > { %v10530_v31 = vpop.permute.xlu1 %481  ;;  %v1220_v61 = vadd.f32 %v9984_v4, %v1070_v20  ;;  %v1219_v62 = vadd.f32 %v9975_v59, %v1069_v35 }
 0x11e   : > { %12947 = vst [vmem:[#allocation43_spill] sm:$0xff] %v10530_v31  ;;  %v657_v16 = vmul.f32 %v9940_v44, %v10530_v31  ;;  %v658_v56 = vmul.f32 %v9948_v48, %v10530_v31 }
 0x11f   : > { %v1348_v21 = vmax.f32 %v1220_v61, 0.0  ;;  %v1347_v60 = vmax.f32 %v1219_v62, 0.0  ;;  %v1351_v62 = vmax.f32 %v1223_v0, 0.0 }
 0x121   : > { %v1440_v52 = vpack.c.bf16 %v1348_v21, %v1344_v28  ;;  %v1439_v32 = vpack.c.bf16 %v1347_v60, %v1343_v13  ;;  %v1352_v21 = vmax.f32 %v1224_v26, 0.0  ;;  %v666_v26 = vmul.f32 %v9948_v48, %v10369_v10 }
 0x122   : > { %v10534_v29 = vpop.permute.xlu1 %786 }
 0x123   : > { %12948 = vst [vmem:[#allocation44_spill] sm:$0xff] %v10534_v29  ;;  %v949_v15 = vmul.f32 %v9937_v43, %v10534_v29  ;;  %v950_v24 = vmul.f32 %v9951_v49, %v10534_v29  ;;  %2351 = vmatprep.mubr.bf16.mxu0 %v1440_v52  ;;  %2737 = vmatprep.mubr.bf16.mxu1 %v1440_v52 }
 0x124   : > { %2352 = vmatmul.mubr.bf16.gmra.mrb[32].mxu0 %v1439_v32  ;;  %2738 = vmatmul.mubr.bf16.gmra.mrb[32].mxu1 %v1439_v32  ;;  %v665_v32 = vmul.f32 %v9940_v44, %v10369_v10 }
 0x125   : > { %v1078_v13 = vadd.f32 %v950_v24, %v658_v56  ;;  %v1077_v60 = vadd.f32 %v949_v15, %v657_v16  ;;  %v667_v56 = vmul.f32 %v10139_v42, %v10369_v10  ;;  %v668_v15 = vmul.f32 %v10143_v45, %v10369_v10 }
 0x126   : > { %v961_v24 = vmul.f32 %v9937_v43, %v10344_v34 }
 0x127   : > { %v10546_v63 = vpop.permute.xlu1 %486  ;;  %v1228_v28 = vadd.f32 %v9984_v4, %v1078_v13  ;;  %v1227_v61 = vadd.f32 %v9975_v59, %v1077_v60  ;;  %v962_v13 = vmul.f32 %v9951_v49, %v10344_v34  ;;  %v583_v34 = vmul.f32 %v10139_v42, %v9945_v47 }
 0x128   : > { %v661_v20 = vmul.f32 %v9940_v44, %v10546_v63  ;;  %v662_v57 = vmul.f32 %v9948_v48, %v10546_v63 }
 0x129   : > { %v1356_v11 = vmax.f32 %v1228_v28, 0.0  ;;  %v1355_v36 = vmax.f32 %v1227_v61, 0.0  ;;  %v669_v28 = vmul.f32 %v9940_v44, %v10401_v7 }
 0x12b   : > { %v1444_v33 = vpack.c.bf16 %v1356_v11, %v1352_v21  ;;  %v1443_v30 = vpack.c.bf16 %v1355_v36, %v1351_v62  ;;  %v670_v21 = vmul.f32 %v9948_v48, %v10401_v7  ;;  %v875_v36 = vmul.f32 %v10133_v40, %v9943_v46 }
 0x12c   : > { %v791_v35 = vpop.permute.xlu1 %790  ;;  %v1089_v31 = vadd.f32 %v961_v24, %v669_v28 }
 0x12d   : > { %v953_v22 = vmul.f32 %v9937_v43, %v791_v35  ;;  %v954_v52 = vmul.f32 %v9951_v49, %v791_v35  ;;  %2361 = vmatprep.mubr.bf16.mxu0 %v1444_v33  ;;  %2747 = vmatprep.mubr.bf16.mxu1 %v1444_v33  ;;  %v1090_v29 = vadd.f32 %v962_v13, %v670_v21 }
 0x12e   : > { %2362 = vmatmul.mubr.bf16.gmra.mrb[36].mxu0 %v1443_v30  ;;  %2748 = vmatmul.mubr.bf16.gmra.mrb[36].mxu1 %v1443_v30  ;;  %v10605_v13 = vmul.f32 %v10133_v40, %v9961_v53  ;;  %v1239_v21 = vadd.f32 %v9975_v59, %v1089_v31 }
 0x12f   : > { %v1081_v0 = vadd.f32 %v953_v22, %v661_v20  ;;  %v1082_v16 = vadd.f32 %v954_v52, %v662_v57  ;;  %v876_v52 = vmul.f32 %v10136_v41, %v9943_v46  ;;  %v1240_v28 = vadd.f32 %v9984_v4, %v1090_v29 }
 0x130   : > { %v795_v60 = vpop.permute.xlu1 %794 }
 0x131   : > { %v957_v61 = vmul.f32 %v9937_v43, %v795_v60  ;;  %v958_v62 = vmul.f32 %v9951_v49, %v795_v60  ;;  %v959_v11 = vmul.f32 %v10133_v40, %v795_v60  ;;  %v960_v10 = vmul.f32 %v10136_v41, %v795_v60 }
 0x132   : > { %v1232_v33 = vadd.f32 %v9984_v4, %v1082_v16  ;;  %v1231_v30 = vadd.f32 %v9975_v59, %v1081_v0  ;;  %v584_v60 = vmul.f32 %v10143_v45, %v9945_v47  ;;  %v10598_v0 = vadd.f32 %v875_v36, %v583_v34 }
 0x133   : > { %v1085_v20 = vadd.f32 %v957_v61, %v665_v32  ;;  %v1086_v7 = vadd.f32 %v958_v62, %v666_v26  ;;  %v10582_v57 = vadd.f32 %v959_v11, %v667_v56  ;;  %v10584_v22 = vadd.f32 %v960_v10, %v668_v15  ;;  %v9485_v32 = vld [vmem:[%s12798_s2] sm:$0xf] }
 0x134   : > { %v10596_v26 = vrot.slane %v9485_v32, %v9923_v37  ;;  %v10601_v46 = vrot.slane %v9485_v32, %v9926_v38  ;;  %v1360_v47 = vmax.f32 %v1232_v33, 0.0  ;;  %v1359_v15 = vmax.f32 %v1231_v30, 0.0 }
 0x135   : > { %v502_v55 = vpop.permute.xlu1 %501  ;;  %v1236_v25 = vadd.f32 %v9984_v4, %v1086_v7  ;;  %v1235_v16 = vadd.f32 %v9975_v59, %v1085_v20  ;;  %v10609_v61 = vadd.f32 %v876_v52, %v584_v60  ;;  %v955_v62 = vmul.f32 %v10133_v40, %v791_v35 }
 0x136   : > { %v956_v11 = vmul.f32 %v10136_v41, %v791_v35  ;;  %v674_v34 = vmul.f32 %v9948_v48, %v502_v55  ;;  %v675_v33 = vmul.f32 %v10139_v42, %v502_v55  ;;  %v676_v30 = vmul.f32 %v10143_v45, %v502_v55 }
 0x137   : > { %v1364_v56 = vmax.f32 %v1236_v25, 0.0  ;;  %v1363_v24 = vmax.f32 %v1235_v16, 0.0  ;;  %v673_v25 = vmul.f32 %v9940_v44, %v502_v55  ;;  %v10623_v35 = vmul.f32 %v10136_v41, %v9961_v53 }
 0x138   : > { %v663_v60 = vmul.f32 %v10139_v42, %v10546_v63  ;;  %v664_v55 = vmul.f32 %v10143_v45, %v10546_v63  ;;  %v681_v53 = vmul.f32 %v9940_v44, %v10432_v23  ;;  %v1237_v17 = vadd.f32 %v10596_v26, %v10582_v57 }
 0x139   : > { %v1448_v10 = vpack.c.bf16 %v1364_v56, %v1360_v47  ;;  %v1447_v36 = vpack.c.bf16 %v1363_v24, %v1359_v15  ;;  %v10631_v15 = vmul.f32 %v10143_v45, %v9963_v54 }
 0x13a   : > { %v803_v20 = vpop.permute.xlu1 %802  ;;  %v1084_v24 = vadd.f32 %v956_v11, %v664_v55  ;;  %v1083_v38 = vadd.f32 %v955_v62, %v663_v60  ;;  %v977_v11 = vmul.f32 %v9937_v43, %v10456_v6 }
 0x13b   : > { %v965_v29 = vmul.f32 %v9937_v43, %v803_v20  ;;  %v966_v31 = vmul.f32 %v9951_v49, %v803_v20  ;;  %v967_v7 = vmul.f32 %v10133_v40, %v803_v20  ;;  %v968_v52 = vmul.f32 %v10136_v41, %v803_v20  ;;  %2371 = vmatprep.mubr.bf16.mxu0 %v1448_v10 }
 0x13c   : > { %2757 = vmatprep.mubr.bf16.mxu1 %v1448_v10  ;;  %2372 = vmatmul.mubr.bf16.gmra.mrb[40].mxu0 %v1447_v36  ;;  %v1368_v20 = vmax.f32 %v1240_v28, 0.0 }
 0x13d   : > { %v1093_v16 = vadd.f32 %v965_v29, %v673_v25  ;;  %v1094_v32 = vadd.f32 %v966_v31, %v674_v34  ;;  %v1095_v47 = vadd.f32 %v967_v7, %v675_v33  ;;  %v1096_v56 = vadd.f32 %v968_v52, %v676_v30  ;;  %2758 = vmatmul.mubr.bf16.gmra.mrb[40].mxu1 %v1447_v36 }
 0x13e   : > { %v1367_v25 = vmax.f32 %v1239_v21, 0.0  ;;  %v682_v34 = vmul.f32 %v9948_v48, %v10432_v23  ;;  %v683_v36 = vmul.f32 %v10139_v42, %v10432_v23  ;;  %v978_v33 = vmul.f32 %v9951_v49, %v10456_v6 }
 0x13f   : > { %v507_v37 = vpop.permute.xlu1 %506  ;;  %v1244_v63 = vadd.f32 %v9984_v4, %v1094_v32  ;;  %v1243_v10 = vadd.f32 %v9975_v59, %v1093_v16  ;;  %v685_v30 = vmul.f32 %v9940_v44, %v10481_v9  ;;  %v686_v21 = vmul.f32 %v9948_v48, %v10481_v9 }
 0x140   : > { %v677_v29 = vmul.f32 %v9940_v44, %v507_v37  ;;  %v678_v31 = vmul.f32 %v9948_v48, %v507_v37  ;;  %v1234_v7 = vadd.f32 %v10601_v46, %v1084_v24  ;;  %v1238_v52 = vadd.f32 %v10601_v46, %v10584_v22 }
 0x141   : > { %v1372_v28 = vmax.f32 %v1244_v63, 0.0  ;;  %v1371_v62 = vmax.f32 %v1243_v10, 0.0  ;;  %v679_v60 = vmul.f32 %v10139_v42, %v507_v37  ;;  %v1233_v16 = vadd.f32 %v10596_v26, %v1083_v38 }
 0x142   : > { %v680_v32 = vmul.f32 %v10143_v45, %v507_v37  ;;  %v1362_v10 = vmax.f32 %v1234_v7, 0.0  ;;  %v1366_v9 = vmax.f32 %v1238_v52, 0.0  ;;  %v684_v38 = vmul.f32 %v10143_v45, %v10432_v23 }
 0x143   : > { %v1452_v6 = vpack.c.bf16 %v1372_v28, %v1368_v20  ;;  %v1451_v55 = vpack.c.bf16 %v1371_v62, %v1367_v25  ;;  %v1361_v20 = vmax.f32 %v1233_v16, 0.0  ;;  %v1365_v25 = vmax.f32 %v1237_v17, 0.0 }
 0x144   : > { %v807_v63 = vpop.permute.xlu1 %806  ;;  %v10665_v37 = vpack.c.bf16 %v1366_v9, %v1362_v10  ;;  %v1105_v52 = vadd.f32 %v977_v11, %v685_v30  ;;  %v1246_v8 = vadd.f32 %v10601_v46, %v1096_v56  ;;  %v1241_v17 = vadd.f32 %v10596_v26, %v10434_v12 }
 0x145   : > { %v969_v58 = vmul.f32 %v9937_v43, %v807_v63  ;;  %v970_v24 = vmul.f32 %v9951_v49, %v807_v63  ;;  %v971_v22 = vmul.f32 %v10133_v40, %v807_v63  ;;  %v972_v39 = vmul.f32 %v10136_v41, %v807_v63  ;;  %2381 = vmatprep.mubr.bf16.mxu0 %v1452_v6 }
 0x146   : > { %2767 = vmatprep.mubr.bf16.mxu1 %v1452_v6  ;;  %2382 = vmatmul.mubr.bf16.gmra.mrb[44].mxu0 %v1451_v55  ;;  %v10667_v50 = vpack.c.bf16 %v1365_v25, %v1361_v20  ;;  %v1242_v63 = vadd.f32 %v10601_v46, %v10436_v51  ;;  %v1106_v6 = vadd.f32 %v978_v33, %v686_v21 }
 0x147   : > { %v1097_v28 = vadd.f32 %v969_v58, %v677_v29  ;;  %v1098_v57 = vadd.f32 %v970_v24, %v678_v31  ;;  %v1099_v62 = vadd.f32 %v971_v22, %v679_v60  ;;  %v1100_v7 = vadd.f32 %v972_v39, %v680_v32  ;;  %2768 = vmatmul.mubr.bf16.gmra.mrb[44].mxu1 %v1451_v55 }
 0x148   : > { %v811_v23 = vpop.permute.xlu1 %810  ;;  %v1245_v58 = vadd.f32 %v10596_v26, %v1095_v47  ;;  %v1370_v56 = vmax.f32 %v1242_v63, 0.0  ;;  %v1374_v31 = vmax.f32 %v1246_v8, 0.0  ;;  %v10683_v47 = vadd.f32 %v9984_v4, %v1106_v6 }
 0x149   : > { %v1248_v10 = vadd.f32 %v9984_v4, %v1098_v57  ;;  %v973_v39 = vmul.f32 %v9937_v43, %v811_v23  ;;  %v974_v11 = vmul.f32 %v9951_v49, %v811_v23  ;;  %v975_v30 = vmul.f32 %v10133_v40, %v811_v23 }
 0x14a   : > { %v976_v29 = vmul.f32 %v10136_v41, %v811_v23  ;;  %v1247_v51 = vadd.f32 %v9975_v59, %v1097_v28  ;;  %v1250_v33 = vadd.f32 %v10601_v46, %v1100_v7  ;;  %v10685_v16 = vpack.c.bf16 %v1374_v31, %v1370_v56 }
 0x14b   : > { %v1101_v21 = vadd.f32 %v973_v39, %v681_v53  ;;  %v1102_v60 = vadd.f32 %v974_v11, %v682_v34  ;;  %v1103_v55 = vadd.f32 %v975_v30, %v683_v36  ;;  %v1369_v32 = vmax.f32 %v1241_v17, 0.0 }
 0x14c   : > { %v1104_v12 = vadd.f32 %v976_v29, %v684_v38  ;;  %v1373_v9 = vmax.f32 %v1245_v58, 0.0  ;;  %v10690_v8 = vadd.f32 %v9975_v59, %v1105_v52  ;;  %v1376_v34 = vmax.f32 %v1248_v10, 0.0  ;;  %v10701_v10 = vpop.permute.xlu0 %531 }
 0x14d   : > { %v522_v24 = vpop.permute.xlu1 %521  ;;  %v1252_v22 = vadd.f32 %v9984_v4, %v1102_v60  ;;  %v1251_v20 = vadd.f32 %v9975_v59, %v1101_v21  ;;  %v1375_v36 = vmax.f32 %v1247_v51, 0.0  ;;  %v1378_v38 = vmax.f32 %v1250_v33, 0.0 }
 0x14e   : > { %v1254_v53 = vadd.f32 %v10601_v46, %v1104_v12  ;;  %v1249_v25 = vadd.f32 %v10596_v26, %v1099_v62  ;;  %v10694_v7 = vpack.c.bf16 %v1373_v9, %v1369_v32  ;;  %v689_v23 = vmul.f32 %v9940_v44, %v522_v24 }
 0x14f   : > { %v1380_v28 = vmax.f32 %v1252_v22, 0.0  ;;  %v1379_v57 = vmax.f32 %v1251_v20, 0.0  ;;  %v690_v6 = vmul.f32 %v9948_v48, %v522_v24  ;;  %v691_v17 = vmul.f32 %v10139_v42, %v522_v24 }
 0x150   : > { %v1382_v63 = vmax.f32 %v1254_v53, 0.0  ;;  %v1253_v52 = vadd.f32 %v10596_v26, %v1103_v55  ;;  %v692_v58 = vmul.f32 %v10143_v45, %v522_v24  ;;  %v1377_v29 = vmax.f32 %v1249_v25, 0.0 }
 0x151   : > { %v1456_v39 = vpack.c.bf16 %v1380_v28, %v1376_v34  ;;  %v1455_v11 = vpack.c.bf16 %v1379_v57, %v1375_v36  ;;  %v1258_v56 = vadd.f32 %v10601_v46, %v10491_v1  ;;  %v1257_v31 = vadd.f32 %v10596_v26, %v10489_v19 }
 0x152   : > { %v10703_v62 = vpack.c.bf16 %v1382_v63, %v1378_v38  ;;  %v819_v30 = vpop.permute.xlu1 %818  ;;  %v1381_v51 = vmax.f32 %v1253_v52, 0.0  ;;  %v587_v12 = vmul.f32 %v10139_v42, %v9963_v54  ;;  %v1008_v1 = vadd.f32 %v10623_v35, %v10631_v15  ;;  %v537_v38 = vpop.permute.xlu0 %536  ;;  %v9295_v35 = vld [vmem:[#allocation3 + $0x4] ss:$16 sps:$4 sm:$0xff]  }
 0x153   : > { %v981_v33 = vmul.f32 %v9937_v43, %v819_v30  ;;  %v982_v21 = vmul.f32 %v9951_v49, %v819_v30  ;;  %v983_v60 = vmul.f32 %v10133_v40, %v819_v30  ;;  %v984_v55 = vmul.f32 %v10136_v41, %v819_v30  ;;  %2391 = vmatprep.mubr.bf16.mxu0 %v1456_v39 }
 0x154   : > { %2777 = vmatprep.mubr.bf16.mxu1 %v1456_v39  ;;  %2392 = vmatmul.mubr.bf16.gmra.mrb[48].mxu0 %v1455_v11  ;;  %v10717_v32 = vpack.c.bf16 %v1381_v51, %v1377_v29  ;;  %v1384_v20 = vmax.f32 %v10683_v47, 0.0  ;;  %v1383_v53 = vmax.f32 %v10690_v8, 0.0  ;;  %v1386_v34 = vmax.f32 %v1258_v56, 0.0 }
 0x155   : > { %v1109_v19 = vadd.f32 %v981_v33, %v689_v23  ;;  %v1110_v9 = vadd.f32 %v982_v21, %v690_v6  ;;  %v1111_v24 = vadd.f32 %v983_v60, %v691_v17  ;;  %v1112_v22 = vadd.f32 %v984_v55, %v692_v58  ;;  %2778 = vmatmul.mubr.bf16.gmra.mrb[48].mxu1 %v1455_v11 }
 0x156   : > { %12949 = vst [vmem:[#allocation45_spill] sm:$0xff] %v10717_v32  ;;  %v1385_v36 = vmax.f32 %v1257_v31, 0.0  ;;  %v10726_v63 = vadd.f32 %v10605_v13, %v587_v12  ;;  %v10730_v47 = vmul.f32 %v10143_v45, %v9986_v5  ;;  %v10734_v8 = vmul.f32 %v10143_v45, %v9981_v2  ;;  %4025 = vmatprep.subr.bf16.mxu0 %v9295_v35 }
 0x157   : > { %v527_v54 = vpop.permute.xlu1 %526  ;;  %v1260_v25 = vadd.f32 %v9984_v4, %v1110_v9  ;;  %v1259_v28 = vadd.f32 %v9975_v59, %v1109_v19  ;;  %v1262_v15 = vadd.f32 %v10601_v46, %v1112_v22  ;;  %v1261_v57 = vadd.f32 %v10596_v26, %v1111_v24 }
 0x158   : > { %v10737_v23 = vadd.f32 %v10601_v46, %v1008_v1  ;;  %v10741_v13 = vmul.f32 %v10136_v41, %v10005_v18  ;;  %v10745_v39 = vmul.f32 %v10136_v41, %v10000_v14  ;;  %v697_v11 = vmul.f32 %v9940_v44, %v10701_v10  ;;  %v831_v1 = vpop.permute.xlu0 %830 }
 0x159   : > { %v1388_v6 = vmax.f32 %v1260_v25, 0.0  ;;  %v1387_v17 = vmax.f32 %v1259_v28, 0.0  ;;  %v1390_v52 = vmax.f32 %v1262_v15, 0.0  ;;  %v1389_v58 = vmax.f32 %v1261_v57, 0.0 }
 0x15a   : > { %v698_v30 = vmul.f32 %v9948_v48, %v10701_v10  ;;  %v693_v33 = vmul.f32 %v9940_v44, %v527_v54  ;;  %v694_v21 = vmul.f32 %v9948_v48, %v527_v54  ;;  %v695_v60 = vmul.f32 %v10139_v42, %v527_v54 }
 0x15b   : > { %v1460_v29 = vpack.c.bf16 %v1388_v6, %v1384_v20  ;;  %v1459_v51 = vpack.c.bf16 %v1387_v17, %v1383_v53  ;;  %v10751_v56 = vpack.c.bf16 %v1390_v52, %v1386_v34  ;;  %v10753_v31 = vpack.c.bf16 %v1389_v58, %v1385_v36  ;;  %v9298_v36 = vld [vmem:[#allocation3 + $0xc] ss:$16 sps:$4 sm:$0xff]  }
 0x15c   : > { %v696_v55 = vmul.f32 %v10143_v45, %v527_v54  ;;  %v823_v12 = vpop.permute.xlu1 %822  ;;  %v699_v20 = vmul.f32 %v10139_v42, %v10701_v10  ;;  %v700_v53 = vmul.f32 %v10143_v45, %v10701_v10  ;;  %v701_v34 = vmul.f32 %v9940_v44, %v537_v38  ;;  %4411 = vmatprep.subr.bf16.mxu1 %v9298_v36 }
 0x15d   : > { %12950 = vst [vmem:[#allocation46_spill] sm:$0xff] %v10751_v56  ;;  %12951 = vst [vmem:[#allocation47_spill] sm:$0xff] %v10753_v31  ;;  %v985_v19 = vmul.f32 %v9937_v43, %v823_v12  ;;  %v986_v9 = vmul.f32 %v9951_v49, %v823_v12  ;;  %v987_v24 = vmul.f32 %v10133_v40, %v823_v12  ;;  %2401 = vmatprep.mubr.bf16.mxu0 %v1460_v29 }
 0x15e   : > { %v988_v22 = vmul.f32 %v10136_v41, %v823_v12  ;;  %2787 = vmatprep.mubr.bf16.mxu1 %v1460_v29  ;;  %2402 = vmatmul.mubr.bf16.gmra.mrb[52].mxu0 %v1459_v51  ;;  %v702_v15 = vmul.f32 %v9948_v48, %v537_v38  ;;  %v703_v57 = vmul.f32 %v10139_v42, %v537_v38 }
 0x15f   : > { %v1113_v54 = vadd.f32 %v985_v19, %v693_v33  ;;  %v1114_v25 = vadd.f32 %v986_v9, %v694_v21  ;;  %v1115_v28 = vadd.f32 %v987_v24, %v695_v60  ;;  %2788 = vmatmul.mubr.bf16.gmra.mrb[52].mxu1 %v1459_v51  ;;  %v704_v6 = vmul.f32 %v10143_v45, %v537_v38 }
 0x160   : > { %v1116_v35 = vadd.f32 %v988_v22, %v696_v55  ;;  %v994_v17 = vmul.f32 %v9951_v49, %v831_v1  ;;  %v827_v52 = vpop.permute.xlu1 %826  ;;  %v993_v24 = vmul.f32 %v9937_v43, %v831_v1  ;;  %v995_v22 = vmul.f32 %v10133_v40, %v831_v1 }
 0x161   : > { %v989_v10 = vmul.f32 %v9937_v43, %v827_v52  ;;  %v990_v58 = vmul.f32 %v9951_v49, %v827_v52  ;;  %v991_v29 = vmul.f32 %v10133_v40, %v827_v52  ;;  %v992_v33 = vmul.f32 %v10136_v41, %v827_v52 }
 0x162   : > { %v1264_v51 = vadd.f32 %v9984_v4, %v1114_v25  ;;  %v1263_v21 = vadd.f32 %v9975_v59, %v1113_v54  ;;  %v1266_v60 = vadd.f32 %v10601_v46, %v1116_v35  ;;  %v1265_v38 = vadd.f32 %v10596_v26, %v1115_v28 }
 0x163   : > { %v1117_v55 = vadd.f32 %v989_v10, %v697_v11  ;;  %v1118_v12 = vadd.f32 %v990_v58, %v698_v30  ;;  %v1119_v19 = vadd.f32 %v991_v29, %v699_v20  ;;  %v1120_v9 = vadd.f32 %v992_v33, %v700_v53 }
 0x164   : > { %v996_v36 = vmul.f32 %v10136_v41, %v831_v1  ;;  %v1122_v31 = vadd.f32 %v994_v17, %v702_v15  ;;  %v1392_v11 = vmax.f32 %v1264_v51, 0.0  ;;  %v1391_v30 = vmax.f32 %v1263_v21, 0.0 }
 0x165   : > { %v542_v52 = vpop.permute.xlu1 %541  ;;  %v1268_v25 = vadd.f32 %v9984_v4, %v1118_v12  ;;  %v1267_v54 = vadd.f32 %v9975_v59, %v1117_v55  ;;  %v1270_v35 = vadd.f32 %v10601_v46, %v1120_v9  ;;  %v1269_v28 = vadd.f32 %v10596_v26, %v1119_v19 }
 0x166   : > { %v1394_v20 = vmax.f32 %v1266_v60, 0.0  ;;  %v1393_v53 = vmax.f32 %v1265_v38, 0.0  ;;  %v1121_v56 = vadd.f32 %v993_v24, %v701_v34  ;;  %v1123_v1 = vadd.f32 %v995_v22, %v703_v57 }
 0x167   : > { %v1396_v10 = vmax.f32 %v1268_v25, 0.0  ;;  %v1395_v58 = vmax.f32 %v1267_v54, 0.0  ;;  %v1398_v29 = vmax.f32 %v1270_v35, 0.0  ;;  %v1397_v33 = vmax.f32 %v1269_v28, 0.0 }
 0x168   : > { %v1124_v15 = vadd.f32 %v996_v36, %v704_v6  ;;  %v1272_v17 = vadd.f32 %v9984_v4, %v1122_v31  ;;  %v705_v51 = vmul.f32 %v9940_v44, %v542_v52  ;;  %v706_v21 = vmul.f32 %v9948_v48, %v542_v52 }
 0x169   : > { %v1464_v12 = vpack.c.bf16 %v1396_v10, %v1392_v11  ;;  %v1463_v32 = vpack.c.bf16 %v1395_v58, %v1391_v30  ;;  %v10788_v55 = vpack.c.bf16 %v1398_v29, %v1394_v20  ;;  %v10790_v9 = vpack.c.bf16 %v1397_v33, %v1393_v53 }
 0x16a   : > { %v707_v60 = vmul.f32 %v10139_v42, %v542_v52  ;;  %v708_v38 = vmul.f32 %v10143_v45, %v542_v52  ;;  %v835_v19 = vpop.permute.xlu1 %834  ;;  %v1271_v44 = vadd.f32 %v9975_v59, %v1121_v56  ;;  %v1274_v48 = vadd.f32 %v10601_v46, %v1124_v15 }
 0x16b   : > { %v997_v34 = vmul.f32 %v9937_v43, %v835_v19  ;;  %v998_v57 = vmul.f32 %v9951_v49, %v835_v19  ;;  %v999_v31 = vmul.f32 %v10133_v40, %v835_v19  ;;  %v1000_v6 = vmul.f32 %v10136_v41, %v835_v19  ;;  %2411 = vmatprep.mubr.bf16.mxu0 %v1464_v12 }
 0x16c   : > { %2797 = vmatprep.mubr.bf16.mxu1 %v1464_v12  ;;  %2412 = vmatmul.mubr.bf16.gmra.mrb[56].mxu0 %v1463_v32  ;;  %v1273_v24 = vadd.f32 %v10596_v26, %v1123_v1  ;;  %v1154_v43 = vadd.f32 %v10601_v46, %v10609_v61  ;;  %v1286_v49 = vmax.f32 %v10737_v23, 0.0  ;;  %v1012_v54 = vadd.f32 %v10745_v39, %v10734_v8 }
 0x16d   : > { %v1125_v22 = vadd.f32 %v997_v34, %v705_v51  ;;  %v1126_v36 = vadd.f32 %v998_v57, %v706_v21  ;;  %v1127_v52 = vadd.f32 %v999_v31, %v707_v60  ;;  %v1128_v25 = vadd.f32 %v1000_v6, %v708_v38  ;;  %2798 = vmatmul.mubr.bf16.gmra.mrb[56].mxu1 %v1463_v32  ;;  %v12953_v57 = vld [vmem:[#allocation12_spill] sm:$0xff] }
 0x16e   : > { %v1016_v56 = vadd.f32 %v10741_v13, %v10730_v47  ;;  %v1400_v32 = vmax.f32 %v1272_v17, 0.0  ;;  %v1399_v20 = vmax.f32 %v1271_v44, 0.0  ;;  %v1402_v53 = vmax.f32 %v1274_v48, 0.0 }
 0x16f   : > { %v1276_v35 = vadd.f32 %v9984_v4, %v1126_v36  ;;  %v1275_v28 = vadd.f32 %v9975_v59, %v1125_v22  ;;  %v1278_v11 = vadd.f32 %v10601_v46, %v1128_v25  ;;  %v1277_v30 = vadd.f32 %v10596_v26, %v1127_v52 }
 0x170   : > { %v1401_v61 = vmax.f32 %v1273_v24, 0.0  ;;  %v1153_v8 = vadd.f32 %v10596_v26, %v10598_v0  ;;  %v1157_v4 = vadd.f32 %v10596_v26, %v10726_v63  ;;  %v591_v59 = vmul.f32 %v10139_v42, %v9981_v2  ;;  %v12954_v24 = vld [vmem:[#allocation11_spill] sm:$0xff] }
 0x171   : > { %v1404_v10 = vmax.f32 %v1276_v35, 0.0  ;;  %v1403_v23 = vmax.f32 %v1275_v28, 0.0  ;;  %v1406_v58 = vmax.f32 %v1278_v11, 0.0  ;;  %v1405_v29 = vmax.f32 %v1277_v30, 0.0  ;;  %v12955_v35 = vld [vmem:[#allocation21_spill] sm:$0xff]  ;;  %v12956_v11 = vld [vmem:[#allocation14_spill] sm:$0xff] }
 0x172   : > { %v1282_v47 = vmax.f32 %v1154_v43, 0.0  ;;  %v887_v15 = vmul.f32 %v10133_v40, %v10005_v18  ;;  %v883_v17 = vmul.f32 %v10133_v40, %v10000_v14  ;;  %v604_v0 = vmul.f32 %v10143_v45, %v10039_v3  ;;  %v12952_v14 = vld [vmem:[#allocation13_spill] sm:$0xff] }
 0x173   : > { %v1468_v13 = vpack.c.bf16 %v1404_v10, %v1400_v32  ;;  %v1467_v39 = vpack.c.bf16 %v1403_v23, %v1399_v20  ;;  %v10820_v33 = vpack.c.bf16 %v1406_v58, %v1402_v53  ;;  %v10822_v1 = vpack.c.bf16 %v1405_v29, %v1401_v61  ;;  %v9301_v53 = vld [vmem:[#allocation3 + $0x24] ss:$16 sps:$4 sm:$0xff]  }
 0x174   : > { %v1410_v63 = vpack.c.bf16 %v1286_v49, %v1282_v47  ;;  %v896_v2 = vmul.f32 %v10136_v41, %v10079_v27  ;;  %v1162_v12 = vadd.f32 %v10601_v46, %v1012_v54  ;;  %v1166_v51 = vadd.f32 %v10601_v46, %v1016_v56  ;;  %v9293_v54 = vld [vmem:[#allocation3] ss:$16 sps:$4 sm:$0xff]   ;;  %v9296_v56 = vld [vmem:[#allocation3 + $0x8] ss:$16 sps:$4 sm:$0xff]  }
 0x175   : > { %2421 = vmatprep.mubr.bf16.mxu0 %v1468_v13  ;;  %2807 = vmatprep.mubr.bf16.mxu1 %v1468_v13  ;;  %v595_v21 = vmul.f32 %v10139_v42, %v9986_v5  ;;  %v1285_v18 = vmax.f32 %v1157_v4, 0.0  ;;  %v892_v60 = vmul.f32 %v10136_v41, %v12952_v14  ;;  %v1281_v38 = vmax.f32 %v1153_v8, 0.0  ;;  %v12957_v61 = vld [vmem:[#allocation20_spill] sm:$0xff]  ;;  %v9302_v47 = vld [vmem:[#allocation3 + $0x28] ss:$16 sps:$4 sm:$0xff]  }
 0x176   : > { %2422 = vmatmul.mubr.bf16.gmra.mrb[60].mxu0 %v1467_v39  ;;  %2808 = vmatmul.mubr.bf16.gmra.mrb[60].mxu1 %v1467_v39  ;;  %v1011_v19 = vadd.f32 %v883_v17, %v591_v59  ;;  %v600_v31 = vmul.f32 %v10143_v45, %v12953_v57  ;;  %v1024_v6 = vadd.f32 %v896_v2, %v604_v0  ;;  %v1290_v44 = vmax.f32 %v1162_v12, 0.0  ;;  %v9299_v59 = vld [vmem:[#allocation3 + $0x20] ss:$16 sps:$4 sm:$0xff]   ;;  %v9307_v17 = vld [vmem:[#allocation3 + $0x44] ss:$16 sps:$4 sm:$0xff]  }
 0x177   : > { %2464 = vmatprep.mubr.bf16.mxu0 %v1410_v63  ;;  %2850 = vmatprep.mubr.bf16.mxu1 %v1410_v63  ;;  %v1015_v34 = vadd.f32 %v887_v15, %v595_v21  ;;  %v1294_v48 = vmax.f32 %v1166_v51, 0.0  ;;  %v900_v5 = vmul.f32 %v10136_v41, %v12954_v24  ;;  %v1409_v22 = vpack.c.bf16 %v1285_v18, %v1281_v38  ;;  %v9310_v0 = vld [vmem:[#allocation3 + $0x4c] ss:$16 sps:$4 sm:$0xff]  }
 0x178   : > { %v1020_v36 = vadd.f32 %v892_v60, %v600_v31  ;;  %v895_v52 = vmul.f32 %v10133_v40, %v10079_v27  ;;  %v603_v25 = vmul.f32 %v10139_v42, %v10039_v3  ;;  %v1161_v43 = vadd.f32 %v10596_v26, %v1011_v19  ;;  %v9304_v27 = vld [vmem:[#allocation3 + $0x2c] ss:$16 sps:$4 sm:$0xff]   ;;  %v9308_v31 = vld [vmem:[#allocation3 + $0x48] ss:$16 sps:$4 sm:$0xff]  }
 0x179   : > { %v1165_v49 = vadd.f32 %v10596_v26, %v1015_v34  ;;  %v904_v28 = vmul.f32 %v10136_v41, %v12955_v35  ;;  %v608_v30 = vmul.f32 %v10143_v45, %v12956_v11  ;;  %v1414_v32 = vpack.c.bf16 %v1294_v48, %v1290_v44  ;;  %v12958_v21 = vld [vmem:[#allocation19_spill] sm:$0xff] }
 0x17a   : > { %v1174_v20 = vadd.f32 %v10601_v46, %v1024_v6  ;;  %v891_v3 = vmul.f32 %v10133_v40, %v12952_v14  ;;  %v612_v10 = vmul.f32 %v10143_v45, %v12957_v61  ;;  %v1170_v23 = vadd.f32 %v10601_v46, %v1020_v36  ;;  %v12959_v60 = vld [vmem:[#allocation27_spill] sm:$0xff] }
 0x17b   : > { %v599_v58 = vmul.f32 %v10139_v42, %v12953_v57  ;;  %v1023_v29 = vadd.f32 %v895_v52, %v603_v25  ;;  %v1289_v8 = vmax.f32 %v1161_v43, 0.0  ;;  %v1293_v4 = vmax.f32 %v1165_v49, 0.0  ;;  %v9305_v57 = vld [vmem:[#allocation3 + $0x40] ss:$16 sps:$4 sm:$0xff]   ;;  %v12960_v52 = vld [vmem:[#allocation25_spill] sm:$0xff] }
 0x17c   : > { %v1028_v13 = vadd.f32 %v900_v5, %v608_v30  ;;  %v1302_v39 = vmax.f32 %v1174_v20, 0.0  ;;  %v1032_v15 = vadd.f32 %v904_v28, %v612_v10  ;;  %v899_v63 = vmul.f32 %v10133_v40, %v12954_v24  ;;  %v9313_v24 = vld [vmem:[#allocation3 + $0x64] ss:$16 sps:$4 sm:$0xff]   ;;  %v9316_v5 = vld [vmem:[#allocation3 + $0x6c] ss:$16 sps:$4 sm:$0xff]  }
 0x17d   : > { %v1019_v2 = vadd.f32 %v891_v3, %v599_v58  ;;  %v903_v12 = vmul.f32 %v10133_v40, %v12955_v35  ;;  %v607_v51 = vmul.f32 %v10139_v42, %v12956_v11  ;;  %v620_v18 = vmul.f32 %v10143_v45, %v12958_v21  ;;  %v9314_v35 = vld [vmem:[#allocation3 + $0x68] ss:$16 sps:$4 sm:$0xff]  }
 0x17e   : > { %2465 = vmatmul.mubr.bf16.vlgmr.msra.gmra.mrb[0].mxu0 %v1409_v22  ;;  %2851 = vmatmul.mubr.bf16.vlgmr.msra.gmra.mrb[0].mxu1 %v1409_v22  ;;  %v1298_v14 = vmax.f32 %v1170_v23, 0.0  ;;  %v912_v38 = vmul.f32 %v10136_v41, %v12959_v60  ;;  %v1413_v19 = vpack.c.bf16 %v1293_v4, %v1289_v8  ;;  %v1173_v34 = vadd.f32 %v10596_v26, %v1023_v29  ;;  %v12961_v28 = vld [vmem:[#allocation23_spill] sm:$0xff]  ;;  %v9317_v4 = vld [vmem:[#allocation3 + $0x80] ss:$16 sps:$4 sm:$0xff]  }
 0x17f   : > { %2474 = vmatprep.mubr.bf16.mxu0 %v1414_v32  ;;  %2860 = vmatprep.mubr.bf16.mxu1 %v1414_v32  ;;  %v1178_v44 = vadd.f32 %v10601_v46, %v1028_v13  ;;  %v1182_v48 = vadd.f32 %v10601_v46, %v1032_v15  ;;  %v611_v22 = vmul.f32 %v10139_v42, %v12957_v61 }
 0x180   : > { %4026 = vmatpush1.bf16.msra.mxu0 %v9293_v54  ;;  %4412 = vmatpush1.bf16.msra.mxu1 %v9296_v56  ;;  %v1418_v6 = vpack.c.bf16 %v1302_v39, %v1298_v14  ;;  %v1169_v36 = vadd.f32 %v10596_v26, %v1019_v2  ;;  %v908_v25 = vmul.f32 %v10136_v41, %v12960_v52  ;;  %v1301_v49 = vmax.f32 %v1173_v34, 0.0  ;;  %v9311_v56 = vld [vmem:[#allocation3 + $0x60] ss:$16 sps:$4 sm:$0xff]   ;;  %v12963_v2 = vld [vmem:[#allocation29_spill] sm:$0xff] }
 0x181   : > { %4027 = vmatprep.subr.bf16.mxu0 %v9301_v53  ;;  %4413 = vmatprep.subr.bf16.mxu1 %v9304_v27  ;;  %v1027_v43 = vadd.f32 %v899_v63, %v607_v51  ;;  %v1031_v54 = vadd.f32 %v903_v12, %v611_v22  ;;  %v616_v11 = vmul.f32 %v10143_v45, %v12961_v28  ;;  %v1306_v32 = vmax.f32 %v1178_v44, 0.0  ;;  %v9319_v53 = vld [vmem:[#allocation3 + $0x84] ss:$16 sps:$4 sm:$0xff]   ;;  %v9322_v27 = vld [vmem:[#allocation3 + $0x8c] ss:$16 sps:$4 sm:$0xff]  }
 0x182   : > { %v1040_v30 = vadd.f32 %v912_v38, %v620_v18  ;;  %v1310_v20 = vmax.f32 %v1182_v48, 0.0  ;;  %v1297_v3 = vmax.f32 %v1169_v36, 0.0  ;;  %v911_v61 = vmul.f32 %v10133_v40, %v12959_v60  ;;  %v9323_v38 = vld [vmem:[#allocation3 + $0xa0] ss:$16 sps:$4 sm:$0xff]   ;;  %v12965_v36 = vld [vmem:[#allocation37_spill] sm:$0xff] }
 0x183   : > { %v619_v10 = vmul.f32 %v10139_v42, %v12958_v21  ;;  %v1036_v23 = vadd.f32 %v908_v25, %v616_v11  ;;  %v1177_v29 = vadd.f32 %v10596_v26, %v1027_v43  ;;  %v1181_v8 = vadd.f32 %v10596_v26, %v1031_v54  ;;  %v9332_v54 = vld [vmem:[#allocation3 + $0xc8] ss:$16 sps:$4 sm:$0xff]  }
 0x184   : > { %4028 = vmatpush1.bf16.msra.mxu0 %v9299_v59  ;;  %4414 = vmatpush1.bf16.msra.mxu1 %v9302_v47  ;;  %v1417_v58 = vpack.c.bf16 %v1301_v49, %v1297_v3  ;;  %v9320_v59 = vld [vmem:[#allocation3 + $0x88] ss:$16 sps:$4 sm:$0xff]   ;;  %v12962_v47 = vld [vmem:[#allocation32_spill] sm:$0xff]  ;;  %v1422_v39 = vpack.c.bf16 %v1310_v20, %v1306_v32  ;;  %v1190_v15 = vadd.f32 %v10601_v46, %v1040_v30  ;;  %v9340_v32 = vld [vmem:[#allocation3 + $0xec] ss:$16 sps:$4 sm:$0xff]  }
 0x185   : > { %4029 = vmatprep.subr.bf16.mxu0 %v9307_v17  ;;  %4415 = vmatprep.subr.bf16.mxu1 %v9310_v0  ;;  %v920_v13 = vmul.f32 %v10136_v41, %v12962_v47  ;;  %v9325_v17 = vld [vmem:[#allocation3 + $0xa4] ss:$16 sps:$4 sm:$0xff]   ;;  %v9328_v0 = vld [vmem:[#allocation3 + $0xac] ss:$16 sps:$4 sm:$0xff]   ;;  %v907_v63 = vmul.f32 %v10133_v40, %v12960_v52  ;;  %v628_v12 = vmul.f32 %v10143_v45, %v12963_v2  ;;  %v1305_v14 = vmax.f32 %v1177_v29, 0.0 }
 0x186   : > { %2475 = vmatmul.mubr.bf16.gmra.mrb[4].mxu0 %v1413_v19  ;;  %2861 = vmatmul.mubr.bf16.gmra.mrb[4].mxu1 %v1413_v19  ;;  %v1186_v51 = vadd.f32 %v10601_v46, %v1036_v23  ;;  %v615_v21 = vmul.f32 %v10139_v42, %v12961_v28  ;;  %v1039_v18 = vadd.f32 %v911_v61, %v619_v10  ;;  %v1309_v60 = vmax.f32 %v1181_v8, 0.0  ;;  %v9326_v19 = vld [vmem:[#allocation3 + $0xa8] ss:$16 sps:$4 sm:$0xff]   ;;  %v9329_v49 = vld [vmem:[#allocation3 + $0xc0] ss:$16 sps:$4 sm:$0xff]  }
 0x187   : > { %2484 = vmatprep.mubr.bf16.mxu0 %v1418_v6  ;;  %2870 = vmatprep.mubr.bf16.mxu1 %v1418_v6  ;;  %v1318_v34 = vmax.f32 %v1190_v15, 0.0  ;;  %v9334_v6 = vld [vmem:[#allocation3 + $0xcc] ss:$16 sps:$4 sm:$0xff]   ;;  %v919_v48 = vmul.f32 %v10133_v40, %v12962_v47  ;;  %v928_v52 = vmul.f32 %v10136_v41, %v12965_v36  ;;  %v9337_v30 = vld [vmem:[#allocation3 + $0xe4] ss:$16 sps:$4 sm:$0xff]   ;;  %v627_v20 = vmul.f32 %v10139_v42, %v12963_v2 }
 0x188   : > { %4030 = vmatpush1.bf16.msra.mxu0 %v9305_v57  ;;  %4416 = vmatpush1.bf16.msra.mxu1 %v9308_v31  ;;  %v1048_v57 = vadd.f32 %v920_v13, %v628_v12  ;;  %v9331_v31 = vld [vmem:[#allocation3 + $0xc4] ss:$16 sps:$4 sm:$0xff]   ;;  %v1035_v44 = vadd.f32 %v907_v63, %v615_v21  ;;  %v1314_v22 = vmax.f32 %v1186_v51, 0.0  ;;  %v1421_v25 = vpack.c.bf16 %v1309_v60, %v1305_v14  ;;  %v9335_v23 = vld [vmem:[#allocation3 + $0xe0] ss:$16 sps:$4 sm:$0xff]   ;;  %v12968_v29 = vld [vmem:[#allocation33_spill] sm:$0xff] }
 0x189   : > { %4031 = vmatprep.subr.bf16.mxu0 %v9313_v24  ;;  %4417 = vmatprep.subr.bf16.mxu1 %v9316_v5  ;;  %v12964_v24 = vld [vmem:[#allocation26_spill] sm:$0xff]  ;;  %v1189_v43 = vadd.f32 %v10596_v26, %v1039_v18  ;;  %v1047_v10 = vadd.f32 %v919_v48, %v627_v20  ;;  %v632_v8 = vmul.f32 %v10143_v45, %v12968_v29  ;;  %v9344_v14 = vld [vmem:[#allocation3 + $0x108] ss:$16 sps:$4 sm:$0xff]  }
 0x18a   : > { %v636_v5 = vmul.f32 %v10143_v45, %v12964_v24  ;;  %v1198_v11 = vadd.f32 %v10601_v46, %v1048_v57  ;;  %v9343_v13 = vld [vmem:[#allocation3 + $0x104] ss:$16 sps:$4 sm:$0xff]   ;;  %v9341_v18 = vld [vmem:[#allocation3 + $0x100] ss:$16 sps:$4 sm:$0xff]   ;;  %v12970_v60 = vld [vmem:[#allocation39_spill] sm:$0xff] }
 0x18b   : > { %v1317_v61 = vmax.f32 %v1189_v43, 0.0  ;;  %v12969_v12 = vld [vmem:[#allocation22_spill] sm:$0xff]  ;;  %v1197_v21 = vadd.f32 %v10596_v26, %v1047_v10  ;;  %v9350_v43 = vld [vmem:[#allocation3 + $0x128] ss:$16 sps:$4 sm:$0xff]  }
 0x18c   : > { %4032 = vmatpush1.bf16.msra.mxu0 %v9311_v56  ;;  %4418 = vmatpush1.bf16.msra.mxu1 %v9314_v35  ;;  %v1426_v56 = vpack.c.bf16 %v1318_v34, %v1314_v22  ;;  %v12966_v35 = vld [vmem:[#allocation24_spill] sm:$0xff]  ;;  %v1326_v47 = vmax.f32 %v1198_v11, 0.0  ;;  %v1193_v51 = vadd.f32 %v10596_v26, %v12969_v12  ;;  %v935_v11 = vmul.f32 %v10133_v40, %v12970_v60  ;;  %v9362_v12 = vld [vmem:[#allocation3 + $0x168] ss:$16 sps:$4 sm:$0xff]  }
 0x18d   : > { %4033 = vmatprep.subr.bf16.mxu0 %v9319_v53  ;;  %4419 = vmatprep.subr.bf16.mxu1 %v9322_v27  ;;  %v1194_v28 = vadd.f32 %v10601_v46, %v12966_v35  ;;  %v1185_v53 = vadd.f32 %v10596_v26, %v1035_v44  ;;  %v12967_v27 = vld [vmem:[#allocation36_spill] sm:$0xff]  ;;  %v12971_v44 = vld [vmem:[#allocation38_spill] sm:$0xff]  ;;  %v9358_v35 = vld [vmem:[#allocation3 + $0x14c] ss:$16 sps:$4 sm:$0xff]  }
 0x18e   : > { %2485 = vmatmul.mubr.bf16.gmra.mrb[8].mxu0 %v1417_v58  ;;  %2871 = vmatmul.mubr.bf16.gmra.mrb[8].mxu1 %v1417_v58  ;;  %v924_v3 = vmul.f32 %v10136_v41, %v12967_v27  ;;  %v9338_v58 = vld [vmem:[#allocation3 + $0xe8] ss:$16 sps:$4 sm:$0xff]   ;;  %v9349_v57 = vld [vmem:[#allocation3 + $0x124] ss:$16 sps:$4 sm:$0xff]   ;;  %v644_v48 = vmul.f32 %v10143_v45, %v12971_v44  ;;  %v9353_v10 = vld [vmem:[#allocation3 + $0x140] ss:$16 sps:$4 sm:$0xff]  }
 0x18f   : > { %2494 = vmatprep.mubr.bf16.mxu0 %v1422_v39  ;;  %2880 = vmatprep.mubr.bf16.mxu1 %v1422_v39  ;;  %v9346_v39 = vld [vmem:[#allocation3 + $0x10c] ss:$16 sps:$4 sm:$0xff]   ;;  %v1313_v15 = vmax.f32 %v1185_v53, 0.0  ;;  %v12973_v53 = vld [vmem:[#allocation42_spill] sm:$0xff] }
 0x190   : > { %4034 = vmatpush1.bf16.msra.mxu0 %v9317_v4  ;;  %4420 = vmatpush1.bf16.msra.mxu1 %v9320_v59  ;;  %v1056_v4 = vadd.f32 %v928_v52, %v636_v5  ;;  %v1322_v59 = vmax.f32 %v1194_v28, 0.0  ;;  %v1052_v63 = vadd.f32 %v924_v3, %v632_v8  ;;  %v631_v5 = vmul.f32 %v10139_v42, %v12968_v29  ;;  %v12974_v29 = vld [vmem:[#allocation31_spill] sm:$0xff] }
 0x191   : > { %4035 = vmatprep.subr.bf16.mxu0 %v9325_v17  ;;  %4421 = vmatprep.subr.bf16.mxu1 %v9328_v0  ;;  %v927_v17 = vmul.f32 %v10133_v40, %v12965_v36  ;;  %v635_v0 = vmul.f32 %v10139_v42, %v12964_v24  ;;  %v1425_v2 = vpack.c.bf16 %v1317_v61, %v1313_v15  ;;  %v1321_v36 = vmax.f32 %v1193_v51, 0.0  ;;  %v12975_v15 = vld [vmem:[#allocation41_spill] sm:$0xff]  ;;  %v12976_v51 = vld [vmem:[#allocation40_spill] sm:$0xff] }
 0x192   : > { %v1206_v34 = vadd.f32 %v10601_v46, %v1056_v4  ;;  %v1202_v24 = vadd.f32 %v10601_v46, %v1052_v63  ;;  %v1325_v52 = vmax.f32 %v1197_v21, 0.0  ;;  %v1210_v8 = vadd.f32 %v10601_v46, %v12974_v29 }
 0x193   : > { %v1055_v22 = vadd.f32 %v927_v17, %v635_v0  ;;  %v940_v17 = vmul.f32 %v10136_v41, %v12975_v15  ;;  %v648_v21 = vmul.f32 %v10143_v45, %v12976_v51 }
 0x194   : > { %4036 = vmatpush1.bf16.msra.mxu0 %v9323_v38  ;;  %4422 = vmatpush1.bf16.msra.mxu1 %v9326_v19  ;;  %v936_v38 = vmul.f32 %v10136_v41, %v12970_v60  ;;  %v1430_v19 = vpack.c.bf16 %v1326_v47, %v1322_v59  ;;  %v1330_v20 = vmax.f32 %v1202_v24, 0.0  ;;  %v1429_v3 = vpack.c.bf16 %v1325_v52, %v1321_v36  ;;  %v9361_v59 = vld [vmem:[#allocation3 + $0x164] ss:$16 sps:$4 sm:$0xff]   ;;  %v9364_v47 = vld [vmem:[#allocation3 + $0x16c] ss:$16 sps:$4 sm:$0xff]  }
 0x195   : > { %4037 = vmatprep.subr.bf16.mxu0 %v9331_v31  ;;  %4423 = vmatprep.subr.bf16.mxu1 %v9334_v6  ;;  %v9352_v31 = vld [vmem:[#allocation3 + $0x12c] ss:$16 sps:$4 sm:$0xff]   ;;  %v923_v6 = vmul.f32 %v10133_v40, %v12967_v27  ;;  %v944_v27 = vmul.f32 %v10136_v41, %v12973_v53  ;;  %v1205_v61 = vadd.f32 %v10596_v26, %v1055_v22  ;;  %v9365_v22 = vld [vmem:[#allocation3 + $0x180] ss:$16 sps:$4 sm:$0xff]   ;;  %v9368_v36 = vld [vmem:[#allocation3 + $0x188] ss:$16 sps:$4 sm:$0xff]  }
 0x196   : > { %2495 = vmatmul.mubr.bf16.gmra.mrb[12].mxu0 %v1421_v25  ;;  %2881 = vmatmul.mubr.bf16.gmra.mrb[12].mxu1 %v1421_v25  ;;  %v9347_v25 = vld [vmem:[#allocation3 + $0x120] ss:$16 sps:$4 sm:$0xff]  }
 0x197   : > { %2504 = vmatprep.mubr.bf16.mxu0 %v1426_v56  ;;  %2890 = vmatprep.mubr.bf16.mxu1 %v1426_v56  ;;  %v9355_v56 = vld [vmem:[#allocation3 + $0x144] ss:$16 sps:$4 sm:$0xff]   ;;  %v1051_v28 = vadd.f32 %v923_v6, %v631_v5  ;;  %v1333_v0 = vmax.f32 %v1205_v61, 0.0  ;;  %v1068_v6 = vadd.f32 %v940_v17, %v648_v21 }
 0x198   : > { %4038 = vmatpush1.bf16.msra.mxu0 %v9329_v49  ;;  %4424 = vmatpush1.bf16.msra.mxu1 %v9332_v54  ;;  %v1334_v49 = vmax.f32 %v1206_v34, 0.0  ;;  %v1064_v54 = vadd.f32 %v936_v38, %v644_v48  ;;  %v9367_v38 = vld [vmem:[#allocation3 + $0x184] ss:$16 sps:$4 sm:$0xff]  }
 0x199   : > { %4039 = vmatprep.subr.bf16.mxu0 %v9337_v30  ;;  %4425 = vmatprep.subr.bf16.mxu1 %v9340_v32  ;;  %v12972_v30 = vld [vmem:[#allocation28_spill] sm:$0xff]  ;;  %v12977_v48 = vld [vmem:[#allocation30_spill] sm:$0xff] }
 0x19a   : > { %v652_v32 = vmul.f32 %v10143_v45, %v12972_v30  ;;  %v1214_v4 = vadd.f32 %v10601_v46, %v1064_v54  ;;  %v1209_v24 = vadd.f32 %v10596_v26, %v12977_v48  ;;  %v12978_v52 = vld [vmem:[#allocation44_spill] sm:$0xff]  ;;  %v9531_v48 = vmov 1966171168  }
 0x19b   : > { %v9373_v54 = vld [vmem:[#allocation3 + $0x1a4] ss:$16 sps:$4 sm:$0xff]  }
 0x19c   : > { %4040 = vmatpush1.bf16.msra.mxu0 %v9335_v23  ;;  %4426 = vmatpush1.bf16.msra.mxu1 %v9338_v58  ;;  %v9356_v23 = vld [vmem:[#allocation3 + $0x148] ss:$16 sps:$4 sm:$0xff]   ;;  %v1434_v58 = vpack.c.bf16 %v1334_v49, %v1330_v20  ;;  %v1342_v60 = vmax.f32 %v1214_v4, 0.0  ;;  %v1337_v20 = vmax.f32 %v1209_v24, 0.0  ;;  %v3086_v24 = vunpack.c.l.s4 %v9531_v48 }
 0x19d   : > { %4041 = vmatprep.subr.bf16.mxu0 %v9343_v13  ;;  %4427 = vmatprep.subr.bf16.mxu1 %v9346_v39  ;;  %v643_v13 = vmul.f32 %v10139_v42, %v12971_v44  ;;  %v1201_v39 = vadd.f32 %v10596_v26, %v1051_v28  ;;  %v12979_v28 = vld [vmem:[#allocation43_spill] sm:$0xff] }
 0x19e   : > { %2505 = vmatmul.mubr.bf16.gmra.mrb[16].mxu0 %v1425_v2  ;;  %2891 = vmatmul.mubr.bf16.gmra.mrb[16].mxu1 %v1425_v2  ;;  %v9359_v2 = vld [vmem:[#allocation3 + $0x160] ss:$16 sps:$4 sm:$0xff]  }
 0x19f   : > { %2514 = vmatprep.mubr.bf16.mxu0 %v1430_v19  ;;  %2900 = vmatprep.mubr.bf16.mxu1 %v1430_v19  ;;  %v1063_v63 = vadd.f32 %v935_v11, %v643_v13  ;;  %v9370_v19 = vld [vmem:[#allocation3 + $0x18c] ss:$16 sps:$4 sm:$0xff]   ;;  %v1329_v34 = vmax.f32 %v1201_v39, 0.0  ;;  %v660_v11 = vmul.f32 %v10143_v45, %v12979_v28  ;;  %v9380_v13 = vld [vmem:[#allocation3 + $0x1c8] ss:$16 sps:$4 sm:$0xff]  }
 0x1a0   : > { %4042 = vmatpush1.bf16.msra.mxu0 %v9341_v18  ;;  %4428 = vmatpush1.bf16.msra.mxu1 %v9344_v14  ;;  %v1072_v18 = vadd.f32 %v944_v27, %v652_v32  ;;  %v1338_v14 = vmax.f32 %v1210_v8, 0.0  ;;  %v9371_v27 = vld [vmem:[#allocation3 + $0x1a0] ss:$16 sps:$4 sm:$0xff]   ;;  %v9382_v45 = vld [vmem:[#allocation3 + $0x1cc] ss:$16 sps:$4 sm:$0xff]   ;;  %v951_v8 = vmul.f32 %v10133_v40, %v12978_v52 }
 0x1a1   : > { %4043 = vmatprep.subr.bf16.mxu0 %v9349_v57  ;;  %4429 = vmatprep.subr.bf16.mxu1 %v9352_v31  ;;  %v943_v57 = vmul.f32 %v10133_v40, %v12973_v53  ;;  %v651_v31 = vmul.f32 %v10139_v42, %v12972_v30  ;;  %v1433_v44 = vpack.c.bf16 %v1333_v0, %v1329_v34 }
 0x1a2   : > { %v1213_v5 = vadd.f32 %v10596_v26, %v1063_v63  ;;  %v1222_v49 = vadd.f32 %v10601_v46, %v1072_v18  ;;  %v1218_v30 = vadd.f32 %v10601_v46, %v1068_v6  ;;  %v659_v63 = vmul.f32 %v10139_v42, %v12979_v28  ;;  %v9386_v6 = vld [vmem:[#allocation3 + $0x1e8] ss:$16 sps:$4 sm:$0xff]  }
 0x1a3   : > { %v1071_v32 = vadd.f32 %v943_v57, %v651_v31  ;;  %v9385_v31 = vld [vmem:[#allocation3 + $0x1e4] ss:$16 sps:$4 sm:$0xff]  }
 0x1a4   : > { %4044 = vmatpush1.bf16.msra.mxu0 %v9347_v25  ;;  %4430 = vmatpush1.bf16.msra.mxu1 %v9350_v43  ;;  %v952_v25 = vmul.f32 %v10136_v41, %v12978_v52  ;;  %v1438_v43 = vpack.c.bf16 %v1342_v60, %v1338_v14  ;;  %v647_v41 = vmul.f32 %v10139_v42, %v12976_v51  ;;  %v1341_v53 = vmax.f32 %v1213_v5, 0.0 }
 0x1a5   : > { %4045 = vmatprep.subr.bf16.mxu0 %v9355_v56  ;;  %4431 = vmatprep.subr.bf16.mxu1 %v9358_v35  ;;  %v9376_v56 = vld [vmem:[#allocation3 + $0x1ac] ss:$16 sps:$4 sm:$0xff]   ;;  %v939_v35 = vmul.f32 %v10133_v40, %v12975_v15  ;;  %v1350_v61 = vmax.f32 %v1222_v49, 0.0  ;;  %v1346_v29 = vmax.f32 %v1218_v30, 0.0  ;;  %v3087_v5 = vunpack.c.0.s8 %v3086_v24 }
 0x1a6   : > { %2515 = vmatmul.mubr.bf16.gmra.mrb[20].mxu0 %v1429_v3  ;;  %2901 = vmatmul.mubr.bf16.gmra.mrb[20].mxu1 %v1429_v3  ;;  %v9374_v3 = vld [vmem:[#allocation3 + $0x1a8] ss:$16 sps:$4 sm:$0xff]   ;;  %v1437_v4 = vpack.c.bf16 %v1341_v53, %v1337_v20 }
 0x1a7   : > { %2524 = vmatprep.mubr.bf16.mxu0 %v1434_v58  ;;  %2910 = vmatprep.mubr.bf16.mxu1 %v1434_v58  ;;  %v1067_v58 = vadd.f32 %v939_v35, %v647_v41  ;;  %v1442_v39 = vpack.c.bf16 %v1350_v61, %v1346_v29  ;;  %v12980_v15 = vld [vmem:[#allocation35_spill] sm:$0xff]  ;;  %v12987_v35 = vld [vmem:[#allocation8_spill] sm:$0xff]  ;;  %v12988_v29 = vmov 0  }
 0x1a8   : > { %4046 = vmatpush1.bf16.msra.mxu0 %v9353_v10  ;;  %4432 = vmatpush1.bf16.msra.mxu1 %v9356_v23  ;;  %v1080_v10 = vadd.f32 %v952_v25, %v660_v11  ;;  %v9379_v23 = vld [vmem:[#allocation3 + $0x1c4] ss:$16 sps:$4 sm:$0xff]   ;;  %v1226_v17 = vadd.f32 %v10601_v46, %v12980_v15 }
 0x1a9   : > { %4047 = vmatprep.subr.bf16.mxu0 %v9361_v59  ;;  %4433 = vmatprep.subr.bf16.mxu1 %v9364_v47  ;;  %v1221_v59 = vadd.f32 %v10596_v26, %v1071_v32  ;;  %v9377_v47 = vld [vmem:[#allocation3 + $0x1c0] ss:$16 sps:$4 sm:$0xff]   ;;  %v1217_v40 = vadd.f32 %v10596_v26, %v1067_v58  ;;  %v9397_v15 = vld [vmem:[#allocation3 + $0x224] ss:$16 sps:$4 sm:$0xff]  }
 0x1aa   : > { %v1230_v0 = vadd.f32 %v10601_v46, %v1080_v10  ;;  %v1354_v51 = vmax.f32 %v1226_v17, 0.0  ;;  %v12981_v46 = vld [vmem:[#allocation34_spill] sm:$0xff]  ;;  %v9400_v17 = vld [vmem:[#allocation3 + $0x22c] ss:$16 sps:$4 sm:$0xff]  }
 0x1ab   : > { %v1345_v18 = vmax.f32 %v1217_v40, 0.0  ;;  %v1225_v60 = vadd.f32 %v10596_v26, %v12981_v46  ;;  %v9398_v46 = vld [vmem:[#allocation3 + $0x228] ss:$16 sps:$4 sm:$0xff]  }
 0x1ac   : > { %4048 = vmatpush1.bf16.msra.mxu0 %v9359_v2  ;;  %4434 = vmatpush1.bf16.msra.mxu1 %v9362_v12  ;;  %v1349_v2 = vmax.f32 %v1221_v59, 0.0  ;;  %v1079_v12 = vadd.f32 %v951_v8, %v659_v63  ;;  %v1358_v21 = vmax.f32 %v1230_v0, 0.0  ;;  %v9392_v59 = vld [vmem:[#allocation3 + $0x208] ss:$16 sps:$4 sm:$0xff]  }
 0x1ad   : > { %4049 = vmatprep.subr.bf16.mxu0 %v9367_v38  ;;  %4435 = vmatprep.subr.bf16.mxu1 %v9370_v19  ;;  %v1353_v19 = vmax.f32 %v1225_v60, 0.0 }
 0x1ae   : > { %2525 = vmatmul.mubr.bf16.gmra.mrb[24].mxu0 %v1433_v44  ;;  %2911 = vmatmul.mubr.bf16.gmra.mrb[24].mxu1 %v1433_v44  ;;  %v1441_v14 = vpack.c.bf16 %v1349_v2, %v1345_v18  ;;  %v1229_v38 = vadd.f32 %v10596_v26, %v1079_v12  ;;  %v1446_v42 = vpack.c.bf16 %v1358_v21, %v1354_v51  ;;  %v9383_v26 = vld [vmem:[#allocation3 + $0x1e0] ss:$16 sps:$4 sm:$0xff]  }
 0x1af   : > { %2534 = vmatprep.mubr.bf16.mxu0 %v1438_v43  ;;  %2920 = vmatprep.mubr.bf16.mxu1 %v1438_v43  ;;  %v12983_v44 = vld [vmem:[#allocation46_spill] sm:$0xff] }
 0x1b0   : > { %4050 = vmatpush1.bf16.msra.mxu0 %v9365_v22  ;;  %4436 = vmatpush1.bf16.msra.mxu1 %v9368_v36  ;;  %v1357_v34 = vmax.f32 %v1229_v38, 0.0  ;;  %v8646_v22 = vld.sshfl [vmem:[%s12800_s4] sm:$0x33 pattern:$0x75316420] }
 0x1b1   : > { %4051 = vmatprep.subr.bf16.mxu0 %v9373_v54  ;;  %4437 = vmatprep.subr.bf16.mxu1 %v9376_v56  ;;  %v3084_v52 = vcombine.high %v8646_v22, %v8646_v22  ;;  %v9403_v38 = vld [vmem:[#allocation3 + $0x244] ss:$16 sps:$4 sm:$0xff]  }
 0x1b2   : > { %v1445_v57 = vpack.c.bf16 %v1357_v34, %v1353_v19 }
 0x1b4   : > { %4052 = vmatpush1.bf16.msra.mxu0 %v9371_v27  ;;  %4438 = vmatpush1.bf16.msra.mxu1 %v9374_v3 }
 0x1b5   : > { %4053 = vmatprep.subr.bf16.mxu0 %v9379_v23  ;;  %4439 = vmatprep.subr.bf16.mxu1 %v9382_v45 }
 0x1b6   : > { %2535 = vmatmul.mubr.bf16.gmra.mrb[28].mxu0 %v1437_v4  ;;  %2921 = vmatmul.mubr.bf16.gmra.mrb[28].mxu1 %v1437_v4  ;;  %v9389_v4 = vld [vmem:[#allocation3 + $0x200] ss:$16 sps:$4 sm:$0xff]  }
 0x1b7   : > { %2544 = vmatprep.mubr.bf16.mxu0 %v1442_v39  ;;  %2930 = vmatprep.mubr.bf16.mxu1 %v1442_v39 }
 0x1b8   : > { %4054 = vmatpush1.bf16.msra.mxu0 %v9377_v47  ;;  %4440 = vmatpush1.bf16.msra.mxu1 %v9380_v13 }
 0x1b9   : > { %4055 = vmatprep.subr.bf16.mxu0 %v9385_v31  ;;  %v9401_v31 = vld [vmem:[#allocation3 + $0x240] ss:$16 sps:$4 sm:$0xff]  }
 0x1bc   : > { %4056 = vmatpush1.bf16.msra.mxu0 %v9383_v26 }
 0x1be   : > { %2545 = vmatmul.mubr.bf16.gmra.mrb[32].mxu0 %v1441_v14  ;;  %2931 = vmatmul.mubr.bf16.gmra.mrb[32].mxu1 %v1441_v14  ;;  %v9395_v14 = vld [vmem:[#allocation3 + $0x220] ss:$16 sps:$4 sm:$0xff]  }
 0x1bf   : > { %2554 = vmatprep.mubr.bf16.mxu0 %v1446_v42  ;;  %2940 = vmatprep.mubr.bf16.mxu1 %v1446_v42  ;;  %v9406_v42 = vld [vmem:[#allocation3 + $0x24c] ss:$16 sps:$4 sm:$0xff]  }
 0x1c6   : > { %2555 = vmatmul.mubr.bf16.gmra.mrb[36].mxu0 %v1445_v57  ;;  %2941 = vmatmul.mubr.bf16.gmra.mrb[36].mxu1 %v1445_v57 }
 0x1c7   : > { %2564 = vmatprep.mubr.bf16.mxu0 %v10665_v37  ;;  %2950 = vmatprep.mubr.bf16.mxu1 %v10665_v37  ;;  %v9388_v37 = vld [vmem:[#allocation3 + $0x1ec] ss:$16 sps:$4 sm:$0xff]  }
 0x1c8   : > { %4441 = vmatprep.subr.bf16.mxu1 %v9388_v37 }
 0x1c9   : > { %4442 = vmatpush1.bf16.msra.mxu1 %v9386_v6  ;;  %v9404_v6 = vld [vmem:[#allocation3 + $0x248] ss:$16 sps:$4 sm:$0xff]  }
 0x1ce   : > { %2565 = vmatmul.mubr.bf16.gmra.mrb[40].mxu0 %v10667_v50  ;;  %2951 = vmatmul.mubr.bf16.gmra.mrb[40].mxu1 %v10667_v50  ;;  %v12982_v50 = vld [vmem:[#allocation45_spill] sm:$0xff] }
 0x1cf   : > { %2574 = vmatprep.mubr.bf16.mxu0 %v10685_v16  ;;  %2960 = vmatprep.mubr.bf16.mxu1 %v10685_v16  ;;  %v9391_v16 = vld [vmem:[#allocation3 + $0x204] ss:$16 sps:$4 sm:$0xff]  }
 0x1d0   : > { %4218 = vmatprep.subr.bf16.mxu0 %v9391_v16 }
 0x1d6   : > { %2575 = vmatmul.mubr.bf16.gmra.mrb[44].mxu0 %v10694_v7  ;;  %2961 = vmatmul.mubr.bf16.gmra.mrb[44].mxu1 %v10694_v7  ;;  %v9394_v7 = vld [vmem:[#allocation3 + $0x20c] ss:$16 sps:$4 sm:$0xff]  }
 0x1d7   : > { %2584 = vmatprep.mubr.bf16.mxu0 %v10703_v62  ;;  %2970 = vmatprep.mubr.bf16.mxu1 %v10703_v62  ;;  %v12984_v62 = vld [vmem:[#allocation47_spill] sm:$0xff] }
 0x1d8   : > { %4604 = vmatprep.subr.bf16.mxu1 %v9394_v7  ;;  %v9412_v7 = vld [vmem:[#allocation3 + $0x26c] ss:$16 sps:$4 sm:$0xff]  }
 0x1de   : > { %2585 = vmatmul.mubr.bf16.gmra.mrb[48].mxu0 %v12982_v50  ;;  %2971 = vmatmul.mubr.bf16.gmra.mrb[48].mxu1 %v12982_v50 }
 0x1df   : > { %2594 = vmatprep.mubr.bf16.mxu0 %v12983_v44  ;;  %2980 = vmatprep.mubr.bf16.mxu1 %v12983_v44  ;;  %v9409_v44 = vld [vmem:[#allocation3 + $0x264] ss:$16 sps:$4 sm:$0xff]  }
 0x1e6   : > { %2595 = vmatmul.mubr.bf16.gmra.mrb[52].mxu0 %v12984_v62  ;;  %2981 = vmatmul.mubr.bf16.gmra.mrb[52].mxu1 %v12984_v62 }
 0x1e7   : > { %2604 = vmatprep.mubr.bf16.mxu0 %v10788_v55  ;;  %2990 = vmatprep.mubr.bf16.mxu1 %v10788_v55  ;;  %v12985_v55 = vld [vmem:[#allocation6_spill] sm:$0xff] }
 0x1e8   : > { %v11004_v36 = vsub.s32 %v3087_v5, %v12985_v55 }
 0x1ea   : > { %12986 = vst [vmem:[#allocation13_spill] sm:$0xff] %v11004_v36 }
 0x1ee   : > { %2605 = vmatmul.mubr.bf16.gmra.mrb[56].mxu0 %v10790_v9  ;;  %2991 = vmatmul.mubr.bf16.gmra.mrb[56].mxu1 %v10790_v9  ;;  %v11007_v9 = vrot.slane %v8646_v22, %v11004_v36 }
 0x1ef   : > { %2614 = vmatprep.mubr.bf16.mxu0 %v10820_v33  ;;  %3000 = vmatprep.mubr.bf16.mxu1 %v10820_v33  ;;  %v11010_v33 = vrot.slane %v3084_v52, %v11004_v36 }
 0x1f1   : > { %v3109_v25 = vpack.i.b16 %v11010_v33, %v11010_v33 }
 0x1f3   : > { %v11026_v41 = vrot.slane %v3109_v25, %v12987_v35 }
 0x1f6   : > { %2615 = vmatmul.mubr.bf16.gmra.mrb[60].mxu0 %v10822_v1  ;;  %3001 = vmatmul.mubr.bf16.gmra.mrb[60].mxu1 %v10822_v1  ;;  %v3102_v1 = vpack.i.b16 %v11007_v9, %v11007_v9 }
 0x1f8   : > { %v11021_v28 = vrot.slane %v3102_v1, %v12987_v35 }
 0x251   : > { %v2466_v43 = vpop.f32.mrb[0].mxu0  ;;  %v11016_v49 = vpop.f32.mrb[0].mxu1 }
 0x252   : > { %v2468_v54 = vpop.f32.mrb[1].mxu0  ;;  %v11018_v56 = vpop.f32.mrb[1].mxu1 }
 0x253   : > { %v2470_v11 = vpop.f32.mrb[2].mxu0  ;;  %v11023_v30 = vpop.f32.mrb[2].mxu1 }
 0x254   : > { %v3011_v32 = vpack.c.bf16 %v2470_v11, %v2466_v43  ;;  %v2472_v53 = vpop.f32.mrb[3].mxu0  ;;  %v11030_v27 = vpop.f32.mrb[3].mxu1  ;;  %v9407_v43 = vld [vmem:[#allocation3 + $0x260] ss:$16 sps:$4 sm:$0xff]  }
 0x255   : > { %v3012_v3 = vpack.c.bf16 %v2472_v53, %v2468_v54  ;;  %v9410_v54 = vld [vmem:[#allocation3 + $0x268] ss:$16 sps:$4 sm:$0xff]   ;;  %v9418_v53 = vld [vmem:[#allocation3 + $0x28c] ss:$16 sps:$4 sm:$0xff]  }
 0x256   : > { %v3129_v10 = vadd.bf16 %v11021_v28, %v3011_v32  ;;  %v9415_v32 = vld [vmem:[#allocation3 + $0x284] ss:$16 sps:$4 sm:$0xff]  }
 0x257   : > { %v3130_v23 = vadd.bf16 %v11026_v41, %v3012_v3 }
 0x258   : > { %v3193_v47 = vmax.bf16 %v12988_v29, %v3129_v10 }
 0x259   : > { %v2476_v45 = vpop.f32.mrb[4].mxu0  ;;  %v11036_v58 = vpop.f32.mrb[4].mxu1  ;;  %v3194_v8 = vmax.bf16 %v12988_v29, %v3130_v23 }
 0x25a   : > { %v2478_v13 = vpop.f32.mrb[5].mxu0  ;;  %v11040_v39 = vpop.f32.mrb[5].mxu1 }
 0x25b   : > { %v2480_v0 = vpop.f32.mrb[6].mxu0  ;;  %v11042_v63 = vpop.f32.mrb[6].mxu1  ;;  %4057 = vmatprep.mubr.bf16.mxu0 %v3194_v8  ;;  %4443 = vmatprep.mubr.bf16.mxu1 %v3194_v8  ;;  %v9413_v8 = vld [vmem:[#allocation3 + $0x280] ss:$16 sps:$4 sm:$0xff]  }
 0x25c   : > { %v3015_v40 = vpack.c.bf16 %v2480_v0, %v2476_v45  ;;  %v2482_v12 = vpop.f32.mrb[7].mxu0  ;;  %v11046_v51 = vpop.f32.mrb[7].mxu1  ;;  %4058 = vmatmul.mubr.bf16.vlgmr.msra.gmra.mrb[64].mxu0 %v3193_v47  ;;  %4444 = vmatmul.mubr.bf16.vlgmr.msra.gmra.mrb[64].mxu1 %v3193_v47 }
 0x25d   : > { %v3016_v21 = vpack.c.bf16 %v2482_v12, %v2478_v13  ;;  %4219 = vmatpush1.bf16.msra.mxu0 %v9389_v4  ;;  %4605 = vmatpush1.bf16.msra.mxu1 %v9392_v59  ;;  %v9416_v4 = vld [vmem:[#allocation3 + $0x288] ss:$16 sps:$4 sm:$0xff]  }
 0x25e   : > { %v3133_v60 = vadd.bf16 %v11021_v28, %v3015_v40  ;;  %4220 = vmatprep.subr.bf16.mxu0 %v9397_v15  ;;  %4606 = vmatprep.subr.bf16.mxu1 %v9400_v17  ;;  %v9421_v15 = vld [vmem:[#allocation3 + $0x2a4] ss:$16 sps:$4 sm:$0xff]   ;;  %v9424_v17 = vld [vmem:[#allocation3 + $0x2ac] ss:$16 sps:$4 sm:$0xff]  }
 0x25f   : > { %v3134_v19 = vadd.bf16 %v11026_v41, %v3016_v21 }
 0x260   : > { %v3197_v16 = vmax.bf16 %v12988_v29, %v3133_v60 }
 0x261   : > { %v2486_v34 = vpop.f32.mrb[8].mxu0  ;;  %v11052_v57 = vpop.f32.mrb[8].mxu1  ;;  %v3198_v26 = vmax.bf16 %v12988_v29, %v3134_v19  ;;  %4221 = vmatpush1.bf16.msra.mxu0 %v9395_v14  ;;  %4607 = vmatpush1.bf16.msra.mxu1 %v9398_v46  ;;  %v9422_v19 = vld [vmem:[#allocation3 + $0x2a8] ss:$16 sps:$4 sm:$0xff]  }
 0x262   : > { %v2488_v37 = vpop.f32.mrb[9].mxu0  ;;  %v11055_v50 = vpop.f32.mrb[9].mxu1  ;;  %4222 = vmatprep.subr.bf16.mxu0 %v9403_v38  ;;  %4608 = vmatprep.subr.bf16.mxu1 %v9406_v42  ;;  %v9419_v42 = vld [vmem:[#allocation3 + $0x2a0] ss:$16 sps:$4 sm:$0xff]  }
 0x263   : > { %v2490_v62 = vpop.f32.mrb[10].mxu0  ;;  %v11058_v48 = vpop.f32.mrb[10].mxu1  ;;  %4067 = vmatprep.mubr.bf16.mxu0 %v3198_v26  ;;  %4453 = vmatprep.mubr.bf16.mxu1 %v3198_v26  ;;  %v9427_v26 = vld [vmem:[#allocation3 + $0x2c4] ss:$16 sps:$4 sm:$0xff]  }
 0x264   : > { %v3019_v24 = vpack.c.bf16 %v2490_v62, %v2486_v34  ;;  %v2492_v22 = vpop.f32.mrb[11].mxu0  ;;  %v11062_v52 = vpop.f32.mrb[11].mxu1  ;;  %4068 = vmatmul.mubr.bf16.gmra.mrb[68].mxu0 %v3197_v16  ;;  %4454 = vmatmul.mubr.bf16.gmra.mrb[68].mxu1 %v3197_v16  ;;  %v9428_v62 = vld [vmem:[#allocation3 + $0x2c8] ss:$16 sps:$4 sm:$0xff]  }
 0x265   : > { %v3020_v1 = vpack.c.bf16 %v2492_v22, %v2488_v37  ;;  %4223 = vmatpush1.bf16.msra.mxu0 %v9401_v31  ;;  %4609 = vmatpush1.bf16.msra.mxu1 %v9404_v6  ;;  %v9430_v31 = vld [vmem:[#allocation3 + $0x2cc] ss:$16 sps:$4 sm:$0xff]  }
 0x266   : > { %v3137_v11 = vadd.bf16 %v11021_v28, %v3019_v24  ;;  %4224 = vmatprep.subr.bf16.mxu0 %v9409_v44  ;;  %4610 = vmatprep.subr.bf16.mxu1 %v9412_v7  ;;  %v9425_v7 = vld [vmem:[#allocation3 + $0x2c0] ss:$16 sps:$4 sm:$0xff]  }
 0x267   : > { %v3138_v3 = vadd.bf16 %v11026_v41, %v3020_v1 }
 0x268   : > { %v3201_v13 = vmax.bf16 %v12988_v29, %v3137_v11 }
 0x269   : > { %v2496_v10 = vpop.f32.mrb[12].mxu0  ;;  %v11068_v23 = vpop.f32.mrb[12].mxu1  ;;  %v3202_v45 = vmax.bf16 %v12988_v29, %v3138_v3  ;;  %4225 = vmatpush1.bf16.msra.mxu0 %v9407_v43  ;;  %4611 = vmatpush1.bf16.msra.mxu1 %v9410_v54  ;;  %v9433_v43 = vld [vmem:[#allocation3 + $0x2e4] ss:$16 sps:$4 sm:$0xff]   ;;  %v9436_v54 = vld [vmem:[#allocation3 + $0x2ec] ss:$16 sps:$4 sm:$0xff]  }
 0x26a   : > { %v2498_v59 = vpop.f32.mrb[13].mxu0  ;;  %v11071_v47 = vpop.f32.mrb[13].mxu1  ;;  %4226 = vmatprep.subr.bf16.mxu0 %v9415_v32  ;;  %4612 = vmatprep.subr.bf16.mxu1 %v9418_v53 }
 0x26b   : > { %v2500_v0 = vpop.f32.mrb[14].mxu0  ;;  %v11074_v40 = vpop.f32.mrb[14].mxu1  ;;  %4077 = vmatprep.mubr.bf16.mxu0 %v3202_v45  ;;  %4463 = vmatprep.mubr.bf16.mxu1 %v3202_v45 }
 0x26c   : > { %v3023_v12 = vpack.c.bf16 %v2500_v0, %v2496_v10  ;;  %v2502_v14 = vpop.f32.mrb[15].mxu0  ;;  %v11078_v46 = vpop.f32.mrb[15].mxu1  ;;  %4078 = vmatmul.mubr.bf16.gmra.mrb[72].mxu0 %v3201_v13  ;;  %4464 = vmatmul.mubr.bf16.gmra.mrb[72].mxu1 %v3201_v13  ;;  %v9434_v13 = vld [vmem:[#allocation3 + $0x2e8] ss:$16 sps:$4 sm:$0xff]   ;;  %v9442_v0 = vld [vmem:[#allocation3 + $0x30c] ss:$16 sps:$4 sm:$0xff]  }
 0x26d   : > { %v3024_v60 = vpack.c.bf16 %v2502_v14, %v2498_v59  ;;  %4227 = vmatpush1.bf16.msra.mxu0 %v9413_v8  ;;  %4613 = vmatpush1.bf16.msra.mxu1 %v9416_v4  ;;  %v9431_v59 = vld [vmem:[#allocation3 + $0x2e0] ss:$16 sps:$4 sm:$0xff]  }
 0x26e   : > { %v3141_v34 = vadd.bf16 %v11021_v28, %v3023_v12  ;;  %4228 = vmatprep.subr.bf16.mxu0 %v9421_v15  ;;  %4614 = vmatprep.subr.bf16.mxu1 %v9424_v17  ;;  %v9439_v17 = vld [vmem:[#allocation3 + $0x304] ss:$16 sps:$4 sm:$0xff]  }
 0x26f   : > { %v3142_v6 = vadd.bf16 %v11026_v41, %v3024_v60 }
 0x270   : > { %v3205_v1 = vmax.bf16 %v12988_v29, %v3141_v34  ;;  %v9440_v34 = vld [vmem:[#allocation3 + $0x308] ss:$16 sps:$4 sm:$0xff]  }
 0x271   : > { %v2506_v37 = vpop.f32.mrb[16].mxu0  ;;  %v11084_v16 = vpop.f32.mrb[16].mxu1  ;;  %v3206_v44 = vmax.bf16 %v12988_v29, %v3142_v6  ;;  %4229 = vmatpush1.bf16.msra.mxu0 %v9419_v42  ;;  %4615 = vmatpush1.bf16.msra.mxu1 %v9422_v19  ;;  %v9437_v19 = vld [vmem:[#allocation3 + $0x300] ss:$16 sps:$4 sm:$0xff]  }
 0x272   : > { %v2508_v24 = vpop.f32.mrb[17].mxu0  ;;  %v11087_v22 = vpop.f32.mrb[17].mxu1  ;;  %4230 = vmatprep.subr.bf16.mxu0 %v9427_v26  ;;  %4616 = vmatprep.subr.bf16.mxu1 %v9430_v31 }
 0x273   : > { %v2510_v11 = vpop.f32.mrb[18].mxu0  ;;  %v11090_v32 = vpop.f32.mrb[18].mxu1  ;;  %4087 = vmatprep.mubr.bf16.mxu0 %v3206_v44  ;;  %4473 = vmatprep.mubr.bf16.mxu1 %v3206_v44  ;;  %v9448_v44 = vld [vmem:[#allocation3 + $0x32c] ss:$16 sps:$4 sm:$0xff]  }
 0x274   : > { %v3027_v53 = vpack.c.bf16 %v2510_v11, %v2506_v37  ;;  %v2512_v10 = vpop.f32.mrb[19].mxu0  ;;  %v11094_v45 = vpop.f32.mrb[19].mxu1  ;;  %4088 = vmatmul.mubr.bf16.gmra.mrb[76].mxu0 %v3205_v1  ;;  %4474 = vmatmul.mubr.bf16.gmra.mrb[76].mxu1 %v3205_v1  ;;  %v9445_v37 = vld [vmem:[#allocation3 + $0x324] ss:$16 sps:$4 sm:$0xff]  }
 0x275   : > { %v3028_v8 = vpack.c.bf16 %v2512_v10, %v2508_v24  ;;  %4231 = vmatpush1.bf16.msra.mxu0 %v9425_v7  ;;  %4617 = vmatpush1.bf16.msra.mxu1 %v9428_v62  ;;  %v9443_v10 = vld [vmem:[#allocation3 + $0x320] ss:$16 sps:$4 sm:$0xff]  }
 0x276   : > { %v3145_v15 = vadd.bf16 %v11021_v28, %v3027_v53  ;;  %4232 = vmatprep.subr.bf16.mxu0 %v9433_v43  ;;  %4618 = vmatprep.subr.bf16.mxu1 %v9436_v54 }
 0x277   : > { %v3146_v12 = vadd.bf16 %v11026_v41, %v3028_v8  ;;  %v9446_v8 = vld [vmem:[#allocation3 + $0x328] ss:$16 sps:$4 sm:$0xff]  }
 0x278   : > { %v3209_v6 = vmax.bf16 %v12988_v29, %v3145_v15  ;;  %v9454_v15 = vld [vmem:[#allocation3 + $0x34c] ss:$16 sps:$4 sm:$0xff]  }
 0x279   : > { %v2516_v14 = vpop.f32.mrb[20].mxu0  ;;  %v11100_v60 = vpop.f32.mrb[20].mxu1  ;;  %v3210_v42 = vmax.bf16 %v12988_v29, %v3146_v12  ;;  %4233 = vmatpush1.bf16.msra.mxu0 %v9431_v59  ;;  %4619 = vmatpush1.bf16.msra.mxu1 %v9434_v13  ;;  %v9451_v13 = vld [vmem:[#allocation3 + $0x344] ss:$16 sps:$4 sm:$0xff]  }
 0x27a   : > { %v2518_v26 = vpop.f32.mrb[21].mxu0  ;;  %v11103_v31 = vpop.f32.mrb[21].mxu1  ;;  %4234 = vmatprep.subr.bf16.mxu0 %v9439_v17  ;;  %4620 = vmatprep.subr.bf16.mxu1 %v9442_v0 }
 0x27b   : > { %v2520_v7 = vpop.f32.mrb[22].mxu0  ;;  %v11106_v62 = vpop.f32.mrb[22].mxu1  ;;  %4097 = vmatprep.mubr.bf16.mxu0 %v3210_v42  ;;  %4483 = vmatprep.mubr.bf16.mxu1 %v3210_v42  ;;  %v9449_v42 = vld [vmem:[#allocation3 + $0x340] ss:$16 sps:$4 sm:$0xff]  }
 0x27c   : > { %v3031_v24 = vpack.c.bf16 %v2520_v7, %v2516_v14  ;;  %v2522_v43 = vpop.f32.mrb[23].mxu0  ;;  %v11110_v54 = vpop.f32.mrb[23].mxu1  ;;  %4098 = vmatmul.mubr.bf16.gmra.mrb[80].mxu0 %v3209_v6  ;;  %4484 = vmatmul.mubr.bf16.gmra.mrb[80].mxu1 %v3209_v6 }
 0x27d   : > { %v3032_v11 = vpack.c.bf16 %v2522_v43, %v2518_v26  ;;  %4235 = vmatpush1.bf16.msra.mxu0 %v9437_v19  ;;  %4621 = vmatpush1.bf16.msra.mxu1 %v9440_v34  ;;  %v9452_v19 = vld [vmem:[#allocation3 + $0x348] ss:$16 sps:$4 sm:$0xff]  }
 0x27e   : > { %v3149_v59 = vadd.bf16 %v11021_v28, %v3031_v24  ;;  %4236 = vmatprep.subr.bf16.mxu0 %v9445_v37  ;;  %4622 = vmatprep.subr.bf16.mxu1 %v9448_v44  ;;  %v9457_v37 = vld [vmem:[#allocation3 + $0x364] ss:$16 sps:$4 sm:$0xff]   ;;  %v9460_v44 = vld [vmem:[#allocation3 + $0x36c] ss:$16 sps:$4 sm:$0xff]  }
 0x27f   : > { %v3150_v17 = vadd.bf16 %v11026_v41, %v3032_v11 }
 0x280   : > { %v3213_v6 = vmax.bf16 %v12988_v29, %v3149_v59 }
 0x281   : > { %v2526_v0 = vpop.f32.mrb[24].mxu0  ;;  %v11116_v12 = vpop.f32.mrb[24].mxu1  ;;  %v3214_v14 = vmax.bf16 %v12988_v29, %v3150_v17  ;;  %4237 = vmatpush1.bf16.msra.mxu0 %v9443_v10  ;;  %4623 = vmatpush1.bf16.msra.mxu1 %v9446_v8 }
 0x282   : > { %v2528_v34 = vpop.f32.mrb[25].mxu0  ;;  %v11119_v26 = vpop.f32.mrb[25].mxu1  ;;  %4238 = vmatprep.subr.bf16.mxu0 %v9451_v13  ;;  %4624 = vmatprep.subr.bf16.mxu1 %v9454_v15  ;;  %v9455_v13 = vld [vmem:[#allocation3 + $0x360] ss:$16 sps:$4 sm:$0xff]   ;;  %v9458_v15 = vld [vmem:[#allocation3 + $0x368] ss:$16 sps:$4 sm:$0xff]  }
 0x283   : > { %v2530_v7 = vpop.f32.mrb[26].mxu0  ;;  %v11122_v24 = vpop.f32.mrb[26].mxu1  ;;  %4107 = vmatprep.mubr.bf16.mxu0 %v3214_v14  ;;  %4493 = vmatprep.mubr.bf16.mxu1 %v3214_v14  ;;  %v9466_v14 = vld [vmem:[#allocation3 + $0x38c] ss:$16 sps:$4 sm:$0xff]  }
 0x284   : > { %v3035_v43 = vpack.c.bf16 %v2530_v7, %v2526_v0  ;;  %v2532_v10 = vpop.f32.mrb[27].mxu0  ;;  %v11126_v8 = vpop.f32.mrb[27].mxu1  ;;  %4108 = vmatmul.mubr.bf16.gmra.mrb[84].mxu0 %v3213_v6  ;;  %4494 = vmatmul.mubr.bf16.gmra.mrb[84].mxu1 %v3213_v6  ;;  %v9463_v0 = vld [vmem:[#allocation3 + $0x384] ss:$16 sps:$4 sm:$0xff]   ;;  %v9461_v6 = vld [vmem:[#allocation3 + $0x380] ss:$16 sps:$4 sm:$0xff]  }
 0x285   : > { %v3036_v17 = vpack.c.bf16 %v2532_v10, %v2528_v34  ;;  %4239 = vmatpush1.bf16.msra.mxu0 %v9449_v42  ;;  %4625 = vmatpush1.bf16.msra.mxu1 %v9452_v19  ;;  %v9464_v42 = vld [vmem:[#allocation3 + $0x388] ss:$16 sps:$4 sm:$0xff]  }
 0x286   : > { %v3153_v1 = vadd.bf16 %v11021_v28, %v3035_v43  ;;  %4240 = vmatprep.subr.bf16.mxu0 %v9457_v37  ;;  %4626 = vmatprep.subr.bf16.mxu1 %v9460_v44  ;;  %v9469_v37 = vld [vmem:[#allocation3 + $0x3a4] ss:$16 sps:$4 sm:$0xff]   ;;  %v9472_v44 = vld [vmem:[#allocation3 + $0x3ac] ss:$16 sps:$4 sm:$0xff]  }
 0x287   : > { %v3154_v7 = vadd.bf16 %v11026_v41, %v3036_v17 }
 0x288   : > { %v3217_v43 = vmax.bf16 %v12988_v29, %v3153_v1 }
 0x289   : > { %v2536_v11 = vpop.f32.mrb[28].mxu0  ;;  %v11132_v53 = vpop.f32.mrb[28].mxu1  ;;  %v3218_v34 = vmax.bf16 %v12988_v29, %v3154_v7  ;;  %4241 = vmatpush1.bf16.msra.mxu0 %v9455_v13  ;;  %4627 = vmatpush1.bf16.msra.mxu1 %v9458_v15 }
 0x28a   : > { %v2538_v19 = vpop.f32.mrb[29].mxu0  ;;  %v11135_v10 = vpop.f32.mrb[29].mxu1  ;;  %4242 = vmatprep.subr.bf16.mxu0 %v9463_v0  ;;  %4628 = vmatprep.subr.bf16.mxu1 %v9466_v14  ;;  %v9467_v0 = vld [vmem:[#allocation3 + $0x3a0] ss:$16 sps:$4 sm:$0xff]   ;;  %v9470_v14 = vld [vmem:[#allocation3 + $0x3a8] ss:$16 sps:$4 sm:$0xff]  }
 0x28b   : > { %v2540_v59 = vpop.f32.mrb[30].mxu0  ;;  %v11138_v17 = vpop.f32.mrb[30].mxu1  ;;  %4117 = vmatprep.mubr.bf16.mxu0 %v3218_v34  ;;  %4503 = vmatprep.mubr.bf16.mxu1 %v3218_v34 }
 0x28c   : > { %v3039_v3 = vpack.c.bf16 %v2540_v59, %v2536_v11  ;;  %v2542_v15 = vpop.f32.mrb[31].mxu0  ;;  %v11142_v7 = vpop.f32.mrb[31].mxu1  ;;  %4118 = vmatmul.mubr.bf16.gmra.mrb[88].mxu0 %v3217_v43  ;;  %4504 = vmatmul.mubr.bf16.gmra.mrb[88].mxu1 %v3217_v43  ;;  %v9475_v11 = vld [vmem:[#allocation3 + $0x3c4] ss:$16 sps:$4 sm:$0xff]   ;;  %v9478_v59 = vld [vmem:[#allocation3 + $0x3cc] ss:$16 sps:$4 sm:$0xff]  }
 0x28d   : > { %v3040_v4 = vpack.c.bf16 %v2542_v15, %v2538_v19  ;;  %4243 = vmatpush1.bf16.msra.mxu0 %v9461_v6  ;;  %4629 = vmatpush1.bf16.msra.mxu1 %v9464_v42  ;;  %v9473_v43 = vld [vmem:[#allocation3 + $0x3c0] ss:$16 sps:$4 sm:$0xff]   ;;  %v9476_v6 = vld [vmem:[#allocation3 + $0x3c8] ss:$16 sps:$4 sm:$0xff]  }
 0x28e   : > { %v3157_v21 = vadd.bf16 %v11021_v28, %v3039_v3  ;;  %4244 = vmatprep.subr.bf16.mxu0 %v9469_v37  ;;  %4630 = vmatprep.subr.bf16.mxu1 %v9472_v44  ;;  %v9481_v37 = vld [vmem:[#allocation3 + $0x3e4] ss:$16 sps:$4 sm:$0xff]   ;;  %v9484_v44 = vld [vmem:[#allocation3 + $0x3ec] ss:$16 sps:$4 sm:$0xff]  }
 0x28f   : > { %v3158_v34 = vadd.bf16 %v11026_v41, %v3040_v4 }
 0x290   : > { %v3221_v3 = vmax.bf16 %v12988_v29, %v3157_v21 }
 0x291   : > { %v2546_v13 = vpop.f32.mrb[32].mxu0  ;;  %v11148_v38 = vpop.f32.mrb[32].mxu1  ;;  %v3222_v19 = vmax.bf16 %v12988_v29, %v3158_v34  ;;  %4245 = vmatpush1.bf16.msra.mxu0 %v9467_v0  ;;  %4631 = vmatpush1.bf16.msra.mxu1 %v9470_v14 }
 0x292   : > { %v2548_v42 = vpop.f32.mrb[33].mxu0  ;;  %v11151_v15 = vpop.f32.mrb[33].mxu1  ;;  %4246 = vmatprep.subr.bf16.mxu0 %v9475_v11  ;;  %4632 = vmatprep.subr.bf16.mxu1 %v9478_v59  ;;  %v9479_v11 = vld [vmem:[#allocation3 + $0x3e0] ss:$16 sps:$4 sm:$0xff]   ;;  %v9482_v59 = vld [vmem:[#allocation3 + $0x3e8] ss:$16 sps:$4 sm:$0xff]  }
 0x293   : > { %v2550_v1 = vpop.f32.mrb[34].mxu0  ;;  %v11154_v4 = vpop.f32.mrb[34].mxu1  ;;  %4127 = vmatprep.mubr.bf16.mxu0 %v3222_v19  ;;  %4513 = vmatprep.mubr.bf16.mxu1 %v3222_v19 }
 0x294   : > { %v3043_v5 = vpack.c.bf16 %v2550_v1, %v2546_v13  ;;  %v2552_v14 = vpop.f32.mrb[35].mxu0  ;;  %v11158_v34 = vpop.f32.mrb[35].mxu1  ;;  %4128 = vmatmul.mubr.bf16.gmra.mrb[92].mxu0 %v3221_v3  ;;  %4514 = vmatmul.mubr.bf16.gmra.mrb[92].mxu1 %v3221_v3 }
 0x295   : > { %v3044_v25 = vpack.c.bf16 %v2552_v14, %v2548_v42  ;;  %4247 = vmatpush1.bf16.msra.mxu0 %v9473_v43  ;;  %4633 = vmatpush1.bf16.msra.mxu1 %v9476_v6 }
 0x296   : > { %v3161_v2 = vadd.bf16 %v11021_v28, %v3043_v5  ;;  %4248 = vmatprep.subr.bf16.mxu0 %v9481_v37  ;;  %4634 = vmatprep.subr.bf16.mxu1 %v9484_v44 }
 0x297   : > { %v3162_v13 = vadd.bf16 %v11026_v41, %v3044_v25 }
 0x298   : > { %v3225_v43 = vmax.bf16 %v12988_v29, %v3161_v2 }
 0x299   : > { %v2556_v1 = vpop.f32.mrb[36].mxu0  ;;  %v11164_v19 = vpop.f32.mrb[36].mxu1  ;;  %v3226_v0 = vmax.bf16 %v12988_v29, %v3162_v13  ;;  %4249 = vmatpush1.bf16.msra.mxu0 %v9479_v11  ;;  %4635 = vmatpush1.bf16.msra.mxu1 %v9482_v59 }
 0x29a   : > { %v2558_v42 = vpop.f32.mrb[37].mxu0  ;;  %v11167_v3 = vpop.f32.mrb[37].mxu1 }
 0x29b   : > { %v2560_v6 = vpop.f32.mrb[38].mxu0  ;;  %v11170_v14 = vpop.f32.mrb[38].mxu1  ;;  %4137 = vmatprep.mubr.bf16.mxu0 %v3226_v0  ;;  %4523 = vmatprep.mubr.bf16.mxu1 %v3226_v0 }
 0x29c   : > { %v3047_v5 = vpack.c.bf16 %v2560_v6, %v2556_v1  ;;  %v2562_v37 = vpop.f32.mrb[39].mxu0  ;;  %v11174_v44 = vpop.f32.mrb[39].mxu1  ;;  %4138 = vmatmul.mubr.bf16.gmra.mrb[96].mxu0 %v3225_v43  ;;  %4524 = vmatmul.mubr.bf16.gmra.mrb[96].mxu1 %v3225_v43 }
 0x29d   : > { %v3048_v11 = vpack.c.bf16 %v2562_v37, %v2558_v42 }
 0x29e   : > { %v3165_v2 = vadd.bf16 %v11021_v28, %v3047_v5 }
 0x29f   : > { %v3166_v13 = vadd.bf16 %v11026_v41, %v3048_v11 }
 0x2a0   : > { %v3229_v25 = vmax.bf16 %v12988_v29, %v3165_v2 }
 0x2a1   : > { %v2566_v21 = vpop.f32.mrb[40].mxu0  ;;  %v11180_v18 = vpop.f32.mrb[40].mxu1  ;;  %v3230_v0 = vmax.bf16 %v12988_v29, %v3166_v13 }
 0x2a2   : > { %12989 = vst [vmem:[#allocation12_spill] sm:$0xff] %v11180_v18  ;;  %v2568_v1 = vpop.f32.mrb[41].mxu0  ;;  %v11183_v6 = vpop.f32.mrb[41].mxu1 }
 0x2a3   : > { %12990 = vst [vmem:[#allocation11_spill] sm:$0xff] %v11183_v6  ;;  %v2570_v20 = vpop.f32.mrb[42].mxu0  ;;  %v11186_v43 = vpop.f32.mrb[42].mxu1  ;;  %4147 = vmatprep.mubr.bf16.mxu0 %v3230_v0  ;;  %4533 = vmatprep.mubr.bf16.mxu1 %v3230_v0 }
 0x2a4   : > { %12991 = vst [vmem:[#allocation21_spill] sm:$0xff] %v11186_v43  ;;  %v3051_v42 = vpack.c.bf16 %v2570_v20, %v2566_v21  ;;  %v2572_v37 = vpop.f32.mrb[43].mxu0  ;;  %v11190_v11 = vpop.f32.mrb[43].mxu1  ;;  %4148 = vmatmul.mubr.bf16.gmra.mrb[100].mxu0 %v3229_v25  ;;  %4534 = vmatmul.mubr.bf16.gmra.mrb[100].mxu1 %v3229_v25 }
 0x2a5   : > { %12992 = vst [vmem:[#allocation14_spill] sm:$0xff] %v11190_v11  ;;  %v3052_v13 = vpack.c.bf16 %v2572_v37, %v2568_v1 }
 0x2a6   : > { %v3169_v2 = vadd.bf16 %v11021_v28, %v3051_v42 }
 0x2a7   : > { %v3170_v61 = vadd.bf16 %v11026_v41, %v3052_v13 }
 0x2a8   : > { %v3233_v5 = vmax.bf16 %v12988_v29, %v3169_v2 }
 0x2a9   : > { %v2576_v55 = vpop.f32.mrb[44].mxu0  ;;  %v11196_v36 = vpop.f32.mrb[44].mxu1  ;;  %v3234_v20 = vmax.bf16 %v12988_v29, %v3170_v61 }
 0x2aa   : > { %12993 = vst [vmem:[#allocation20_spill] sm:$0xff] %v11196_v36  ;;  %v2578_v21 = vpop.f32.mrb[45].mxu0  ;;  %v11199_v0 = vpop.f32.mrb[45].mxu1 }
 0x2ab   : > { %12994 = vst [vmem:[#allocation19_spill] sm:$0xff] %v11199_v0  ;;  %v2580_v18 = vpop.f32.mrb[46].mxu0  ;;  %v11202_v25 = vpop.f32.mrb[46].mxu1  ;;  %4157 = vmatprep.mubr.bf16.mxu0 %v3234_v20  ;;  %4543 = vmatprep.mubr.bf16.mxu1 %v3234_v20 }
 0x2ac   : > { %12995 = vst [vmem:[#allocation27_spill] sm:$0xff] %v11202_v25  ;;  %v3055_v1 = vpack.c.bf16 %v2580_v18, %v2576_v55  ;;  %v2582_v37 = vpop.f32.mrb[47].mxu0  ;;  %v11206_v13 = vpop.f32.mrb[47].mxu1  ;;  %4158 = vmatmul.mubr.bf16.gmra.mrb[104].mxu0 %v3233_v5  ;;  %4544 = vmatmul.mubr.bf16.gmra.mrb[104].mxu1 %v3233_v5 }
 0x2ad   : > { %12996 = vst [vmem:[#allocation25_spill] sm:$0xff] %v11206_v13  ;;  %v3056_v61 = vpack.c.bf16 %v2582_v37, %v2578_v21 }
 0x2ae   : > { %v3173_v2 = vadd.bf16 %v11021_v28, %v3055_v1 }
 0x2af   : > { %v3174_v43 = vadd.bf16 %v11026_v41, %v3056_v61 }
 0x2b0   : > { %v3237_v42 = vmax.bf16 %v12988_v29, %v3173_v2 }
 0x2b1   : > { %v2586_v6 = vpop.f32.mrb[48].mxu0  ;;  %v11212_v11 = vpop.f32.mrb[48].mxu1  ;;  %v3238_v55 = vmax.bf16 %v12988_v29, %v3174_v43 }
 0x2b2   : > { %12997 = vst [vmem:[#allocation23_spill] sm:$0xff] %v11212_v11  ;;  %v2588_v18 = vpop.f32.mrb[49].mxu0  ;;  %v11215_v20 = vpop.f32.mrb[49].mxu1 }
 0x2b3   : > { %12998 = vst [vmem:[#allocation32_spill] sm:$0xff] %v11215_v20  ;;  %v2590_v36 = vpop.f32.mrb[50].mxu0  ;;  %v11218_v5 = vpop.f32.mrb[50].mxu1  ;;  %4167 = vmatprep.mubr.bf16.mxu0 %v3238_v55  ;;  %4553 = vmatprep.mubr.bf16.mxu1 %v3238_v55 }
 0x2b4   : > { %12999 = vst [vmem:[#allocation29_spill] sm:$0xff] %v11218_v5  ;;  %v3059_v21 = vpack.c.bf16 %v2590_v36, %v2586_v6  ;;  %v2592_v37 = vpop.f32.mrb[51].mxu0  ;;  %v11222_v61 = vpop.f32.mrb[51].mxu1  ;;  %4168 = vmatmul.mubr.bf16.gmra.mrb[108].mxu0 %v3237_v42  ;;  %4554 = vmatmul.mubr.bf16.gmra.mrb[108].mxu1 %v3237_v42 }
 0x2b5   : > { %13000 = vst [vmem:[#allocation26_spill] sm:$0xff] %v11222_v61  ;;  %v3060_v43 = vpack.c.bf16 %v2592_v37, %v2588_v18 }
 0x2b6   : > { %v3177_v2 = vadd.bf16 %v11021_v28, %v3059_v21 }
 0x2b7   : > { %v3178_v25 = vadd.bf16 %v11026_v41, %v3060_v43 }
 0x2b8   : > { %v3241_v1 = vmax.bf16 %v12988_v29, %v3177_v2 }
 0x2b9   : > { %v2596_v0 = vpop.f32.mrb[52].mxu0  ;;  %v11228_v13 = vpop.f32.mrb[52].mxu1  ;;  %v3242_v36 = vmax.bf16 %v12988_v29, %v3178_v25 }
 0x2ba   : > { %13001 = vst [vmem:[#allocation37_spill] sm:$0xff] %v11228_v13  ;;  %v2598_v6 = vpop.f32.mrb[53].mxu0  ;;  %v11231_v55 = vpop.f32.mrb[53].mxu1 }
 0x2bb   : > { %13002 = vst [vmem:[#allocation24_spill] sm:$0xff] %v11231_v55  ;;  %v2600_v11 = vpop.f32.mrb[54].mxu0  ;;  %v11234_v42 = vpop.f32.mrb[54].mxu1  ;;  %4177 = vmatprep.mubr.bf16.mxu0 %v3242_v36  ;;  %4563 = vmatprep.mubr.bf16.mxu1 %v3242_v36 }
 0x2bc   : > { %13003 = vst [vmem:[#allocation36_spill] sm:$0xff] %v11234_v42  ;;  %v3063_v18 = vpack.c.bf16 %v2600_v11, %v2596_v0  ;;  %v2602_v37 = vpop.f32.mrb[55].mxu0  ;;  %v11238_v43 = vpop.f32.mrb[55].mxu1  ;;  %4178 = vmatmul.mubr.bf16.gmra.mrb[112].mxu0 %v3241_v1  ;;  %4564 = vmatmul.mubr.bf16.gmra.mrb[112].mxu1 %v3241_v1  ;;  %v3100_v1 = vcombine.high %v11010_v33, %v11010_v33 }
 0x2bd   : > { %13004 = vst [vmem:[#allocation33_spill] sm:$0xff] %v11238_v43  ;;  %v3064_v25 = vpack.c.bf16 %v2602_v37, %v2598_v6 }
 0x2be   : > { %v3181_v2 = vadd.bf16 %v11021_v28, %v3063_v18  ;;  %v3123_v42 = vpack.i.b16 %v3100_v1, %v3100_v1 }
 0x2bf   : > { %v3182_v5 = vadd.bf16 %v11026_v41, %v3064_v25 }
 0x2c0   : > { %v3245_v21 = vmax.bf16 %v12988_v29, %v3181_v2 }
 0x2c1   : > { %v2606_v20 = vpop.f32.mrb[56].mxu0  ;;  %v11244_v61 = vpop.f32.mrb[56].mxu1  ;;  %v3246_v11 = vmax.bf16 %v12988_v29, %v3182_v5 }
 0x2c2   : > { %13005 = vst [vmem:[#allocation22_spill] sm:$0xff] %v11244_v61  ;;  %v2608_v0 = vpop.f32.mrb[57].mxu0  ;;  %v11247_v36 = vpop.f32.mrb[57].mxu1 }
 0x2c3   : > { %13006 = vst [vmem:[#allocation39_spill] sm:$0xff] %v11247_v36  ;;  %v2610_v6 = vpop.f32.mrb[58].mxu0  ;;  %v11252_v37 = vpop.f32.mrb[58].mxu1  ;;  %4187 = vmatprep.mubr.bf16.mxu0 %v3246_v11  ;;  %4573 = vmatprep.mubr.bf16.mxu1 %v3246_v11  ;;  %v13008_v36 = vpack.c.bf16 %v11030_v27, %v11018_v56  ;;  %v13009_v56 = vpack.c.bf16 %v11023_v30, %v11016_v49 }
 0x2c4   : > { %13007 = vst [vmem:[#allocation38_spill] sm:$0xff] %v11252_v37  ;;  %v3067_v18 = vpack.c.bf16 %v2610_v6, %v2606_v20  ;;  %v2612_v59 = vpop.f32.mrb[59].mxu0  ;;  %v11256_v13 = vpop.f32.mrb[59].mxu1  ;;  %4188 = vmatmul.mubr.bf16.gmra.mrb[116].mxu0 %v3245_v21  ;;  %4574 = vmatmul.mubr.bf16.gmra.mrb[116].mxu1 %v3245_v21  ;;  %v3099_v6 = vcombine.high %v11007_v9, %v11007_v9 }
 0x2c5   : > { %v3068_v5 = vpack.c.bf16 %v2612_v59, %v2608_v0  ;;  %v11271_v21 = vrot.slane %v3123_v42, %v12987_v35  ;;  %v13012_v30 = vpack.c.bf16 %v11062_v52, %v11055_v50 }
 0x2c6   : > { %v3185_v33 = vadd.bf16 %v11021_v28, %v3067_v18  ;;  %v3116_v42 = vpack.i.b16 %v3099_v6, %v3099_v6 }
 0x2c7   : > { %v3186_v55 = vadd.bf16 %v11026_v41, %v3068_v5 }
 0x2c8   : > { %v3249_v59 = vmax.bf16 %v12988_v29, %v3185_v33 }
 0x2c9   : > { %v2616_v43 = vpop.f32.mrb[60].mxu0  ;;  %v11262_v11 = vpop.f32.mrb[60].mxu1  ;;  %v3250_v20 = vmax.bf16 %v12988_v29, %v3186_v55  ;;  %v11289_v55 = vrot.slane %v3116_v42, %v12987_v35  ;;  %v13015_v42 = vpack.c.bf16 %v11074_v40, %v11068_v23  ;;  %v13018_v40 = vpack.c.bf16 %v11110_v54, %v11103_v31 }
 0x2ca   : > { %v2618_v25 = vpop.f32.mrb[61].mxu0  ;;  %v11267_v61 = vpop.f32.mrb[61].mxu1 }
 0x2cb   : > { %v2620_v0 = vpop.f32.mrb[62].mxu0  ;;  %v11273_v1 = vpop.f32.mrb[62].mxu1  ;;  %4197 = vmatprep.mubr.bf16.mxu0 %v3250_v20  ;;  %4583 = vmatprep.mubr.bf16.mxu1 %v3250_v20 }
 0x2cc   : > { %v3071_v18 = vpack.c.bf16 %v2620_v0, %v2616_v43  ;;  %v2622_v5 = vpop.f32.mrb[63].mxu0  ;;  %v11277_v2 = vpop.f32.mrb[63].mxu1  ;;  %4198 = vmatmul.mubr.bf16.gmra.mrb[120].mxu0 %v3249_v59  ;;  %4584 = vmatmul.mubr.bf16.gmra.mrb[120].mxu1 %v3249_v59  ;;  %v3132_v43 = vadd.bf16 %v11271_v21, %v13008_v36  ;;  %v13011_v59 = vpack.c.bf16 %v11042_v63, %v11036_v58 }
 0x2cd   : > { %v3072_v9 = vpack.c.bf16 %v2622_v5, %v2618_v25  ;;  %v3074_v33 = vpack.c.bf16 %v11277_v2, %v11267_v61  ;;  %v13013_v5 = vpack.c.bf16 %v11058_v48, %v11052_v57  ;;  %v13014_v63 = vpack.c.bf16 %v11078_v46, %v11071_v47  ;;  %v8775_v61 = vld.sshfl [vmem:[%s12802_s6] sm:$0x33 pattern:$0x75316420] }
 0x2ce   : > { %v3189_v37 = vadd.bf16 %v11021_v28, %v3071_v18  ;;  %v3196_v6 = vmax.bf16 %v12988_v29, %v3132_v43  ;;  %v3131_v28 = vadd.bf16 %v11289_v55, %v13009_v56  ;;  %v3135_v49 = vadd.bf16 %v11289_v55, %v13011_v59 }
 0x2cf   : > { %v3190_v20 = vadd.bf16 %v11026_v41, %v3072_v9  ;;  %v13010_v41 = vpack.c.bf16 %v11046_v51, %v11040_v39  ;;  %v3140_v39 = vadd.bf16 %v11271_v21, %v13012_v30  ;;  %v3139_v58 = vadd.bf16 %v11289_v55, %v13013_v5 }
 0x2d0   : > { %v3253_v25 = vmax.bf16 %v12988_v29, %v3189_v37  ;;  %v3195_v36 = vmax.bf16 %v12988_v29, %v3131_v28  ;;  %v3199_v51 = vmax.bf16 %v12988_v29, %v3135_v49  ;;  %v3144_v50 = vadd.bf16 %v11271_v21, %v13014_v63  ;;  %v13029_v49 = vld [vmem:[#allocation11_spill] sm:$0xff] }
 0x2d1   : > { %v3254_v0 = vmax.bf16 %v12988_v29, %v3190_v20  ;;  %v3136_v27 = vadd.bf16 %v11271_v21, %v13010_v41  ;;  %v3204_v18 = vmax.bf16 %v12988_v29, %v3140_v39  ;;  %v3203_v52 = vmax.bf16 %v12988_v29, %v3139_v58  ;;  %v13035_v58 = vld [vmem:[#allocation19_spill] sm:$0xff] }
 0x2d2   : > { %v3208_v9 = vmax.bf16 %v12988_v29, %v3144_v50  ;;  %v3143_v57 = vadd.bf16 %v11289_v55, %v13015_v42  ;;  %v13016_v48 = vpack.c.bf16 %v11094_v45, %v11087_v22  ;;  %v13017_v20 = vpack.c.bf16 %v11090_v32, %v11084_v16  ;;  %v13037_v42 = vld [vmem:[#allocation27_spill] sm:$0xff] }
 0x2d3   : > { %4207 = vmatprep.mubr.bf16.mxu0 %v3254_v0  ;;  %4593 = vmatprep.mubr.bf16.mxu1 %v3254_v0  ;;  %v3200_v37 = vmax.bf16 %v12988_v29, %v3136_v27  ;;  %v3152_v22 = vadd.bf16 %v11271_v21, %v13018_v40  ;;  %v13020_v32 = vpack.c.bf16 %v11126_v8, %v11119_v26 }
 0x2d4   : > { %4208 = vmatmul.mubr.bf16.gmra.mrb[124].mxu0 %v3253_v25  ;;  %4594 = vmatmul.mubr.bf16.gmra.mrb[124].mxu1 %v3253_v25  ;;  %v3148_v47 = vadd.bf16 %v11271_v21, %v13016_v48  ;;  %v3207_v46 = vmax.bf16 %v12988_v29, %v3143_v57  ;;  %v3147_v23 = vadd.bf16 %v11289_v55, %v13017_v20  ;;  %v13038_v57 = vld [vmem:[#allocation20_spill] sm:$0xff] }
 0x2d5   : > { %4250 = vmatprep.mubr.bf16.mxu0 %v3196_v6  ;;  %4636 = vmatprep.mubr.bf16.mxu1 %v3196_v6  ;;  %v3216_v0 = vmax.bf16 %v12988_v29, %v3152_v22  ;;  %v13019_v25 = vpack.c.bf16 %v11106_v62, %v11100_v60  ;;  %v3156_v31 = vadd.bf16 %v11271_v21, %v13020_v32  ;;  %v13046_v32 = vld [vmem:[#allocation33_spill] sm:$0xff] }
 0x2d6   : > { %v3212_v43 = vmax.bf16 %v12988_v29, %v3148_v47  ;;  %v3211_v45 = vmax.bf16 %v12988_v29, %v3147_v23  ;;  %v13021_v56 = vpack.c.bf16 %v11122_v24, %v11116_v12  ;;  %v13022_v62 = vpack.c.bf16 %v11142_v7, %v11135_v10 }
 0x2d7   : > { %v3151_v16 = vadd.bf16 %v11289_v55, %v13019_v25  ;;  %v3220_v6 = vmax.bf16 %v12988_v29, %v3156_v31  ;;  %v13023_v41 = vpack.c.bf16 %v11138_v17, %v11132_v53  ;;  %v13024_v24 = vpack.c.bf16 %v11158_v34, %v11151_v15  ;;  %v13047_v31 = vld [vmem:[#allocation24_spill] sm:$0xff] }
 0x2d8   : > { %v3155_v60 = vadd.bf16 %v11289_v55, %v13021_v56  ;;  %v3160_v26 = vadd.bf16 %v11271_v21, %v13022_v62  ;;  %v13026_v17 = vpack.c.bf16 %v11174_v44, %v11167_v3  ;;  %v13027_v59 = vpack.c.bf16 %v11170_v14, %v11164_v19  ;;  %v13034_v14 = vld [vmem:[#allocation25_spill] sm:$0xff]  ;;  %v13049_v62 = vld [vmem:[#allocation36_spill] sm:$0xff] }
 0x2d9   : > { %v3215_v54 = vmax.bf16 %v12988_v29, %v3151_v16  ;;  %v3159_v12 = vadd.bf16 %v11289_v55, %v13023_v41  ;;  %v3164_v10 = vadd.bf16 %v11271_v21, %v13024_v24  ;;  %v13036_v63 = vpack.c.bf16 %v13034_v14, %v13035_v58  ;;  %v13052_v41 = vld [vmem:[#allocation39_spill] sm:$0xff] }
 0x2da   : > { %v3219_v8 = vmax.bf16 %v12988_v29, %v3155_v60  ;;  %v3224_v28 = vmax.bf16 %v12988_v29, %v3160_v26  ;;  %v3168_v15 = vadd.bf16 %v11271_v21, %v13026_v17  ;;  %v13039_v48 = vpack.c.bf16 %v13037_v42, %v13038_v57  ;;  %v13050_v26 = vld [vmem:[#allocation37_spill] sm:$0xff] }
 0x2db   : > { %v3223_v7 = vmax.bf16 %v12988_v29, %v3159_v12  ;;  %v3228_v27 = vmax.bf16 %v12988_v29, %v3164_v10  ;;  %v3176_v50 = vadd.bf16 %v11271_v21, %v13036_v63  ;;  %v13053_v12 = vpack.c.bf16 %v11256_v13, %v13052_v41  ;;  %v13061_v41 = vld [vmem:[#allocation10_spill] sm:$0xff] }
 0x2dc   : > { %4251 = vmatmul.mubr.bf16.vlgmr.msra.gmra.mrb[64].mxu0 %v3195_v36  ;;  %4637 = vmatmul.mubr.bf16.vlgmr.msra.gmra.mrb[64].mxu1 %v3195_v36  ;;  %v13025_v36 = vpack.c.bf16 %v11154_v4, %v11148_v38  ;;  %v3167_v38 = vadd.bf16 %v11289_v55, %v13027_v59  ;;  %v13028_v4 = vld [vmem:[#allocation14_spill] sm:$0xff]  ;;  %v3175_v47 = vadd.bf16 %v11289_v55, %v13039_v48 }
 0x2dd   : > { %4260 = vmatprep.mubr.bf16.mxu0 %v3200_v37  ;;  %4646 = vmatprep.mubr.bf16.mxu1 %v3200_v37  ;;  %v3232_v37 = vmax.bf16 %v12988_v29, %v3168_v15  ;;  %v13030_v30 = vpack.c.bf16 %v13028_v4, %v13029_v49  ;;  %v3188_v24 = vadd.bf16 %v11271_v21, %v13053_v12 }
 0x2de   : > { %v3163_v53 = vadd.bf16 %v11289_v55, %v13025_v36  ;;  %v3231_v44 = vmax.bf16 %v12988_v29, %v3167_v38  ;;  %v3239_v40 = vmax.bf16 %v12988_v29, %v3175_v47  ;;  %v13055_v36 = vld [vmem:[#allocation22_spill] sm:$0xff]  ;;  %v3192_v13 = vadd.bf16 %v11271_v21, %v3074_v33 }
 0x2df   : > { %v3172_v3 = vadd.bf16 %v11271_v21, %v13030_v30  ;;  %v4870_v2 = vcombine.high %v8775_v61, %v8775_v61 }
 0x2e0   : > { %v3227_v34 = vmax.bf16 %v12988_v29, %v3163_v53 }
 0x2e1   : > { %v3236_v39 = vmax.bf16 %v12988_v29, %v3172_v3 }
 0x2e4   : > { %4261 = vmatmul.mubr.bf16.gmra.mrb[68].mxu0 %v3199_v51  ;;  %4647 = vmatmul.mubr.bf16.gmra.mrb[68].mxu1 %v3199_v51  ;;  %v13031_v51 = vld [vmem:[#allocation21_spill] sm:$0xff] }
 0x2e5   : > { %4270 = vmatprep.mubr.bf16.mxu0 %v3204_v18  ;;  %4656 = vmatprep.mubr.bf16.mxu1 %v3204_v18  ;;  %v13032_v18 = vld [vmem:[#allocation12_spill] sm:$0xff] }
 0x2e6   : > { %v13033_v5 = vpack.c.bf16 %v13031_v51, %v13032_v18 }
 0x2e8   : > { %v3171_v19 = vadd.bf16 %v11289_v55, %v13033_v5 }
 0x2ec   : > { %4271 = vmatmul.mubr.bf16.gmra.mrb[72].mxu0 %v3203_v52  ;;  %4657 = vmatmul.mubr.bf16.gmra.mrb[72].mxu1 %v3203_v52  ;;  %v3235_v52 = vmax.bf16 %v12988_v29, %v3171_v19 }
 0x2ed   : > { %4280 = vmatprep.mubr.bf16.mxu0 %v3208_v9  ;;  %4666 = vmatprep.mubr.bf16.mxu1 %v3208_v9  ;;  %v3240_v9 = vmax.bf16 %v12988_v29, %v3176_v50 }
 0x2f4   : > { %4281 = vmatmul.mubr.bf16.gmra.mrb[76].mxu0 %v3207_v46  ;;  %4667 = vmatmul.mubr.bf16.gmra.mrb[76].mxu1 %v3207_v46  ;;  %v13040_v46 = vld [vmem:[#allocation26_spill] sm:$0xff] }
 0x2f5   : > { %4290 = vmatprep.mubr.bf16.mxu0 %v3212_v43  ;;  %4676 = vmatprep.mubr.bf16.mxu1 %v3212_v43  ;;  %v13041_v43 = vld [vmem:[#allocation32_spill] sm:$0xff] }
 0x2f6   : > { %v13042_v20 = vpack.c.bf16 %v13040_v46, %v13041_v43  ;;  %v5171_v46 = vld [vmem:[%s12803_s7] sm:$0xf] }
 0x2f7   : > { %v11486_v12 = vrot.slane %v5171_v46, %v13061_v41 }
 0x2f8   : > { %v3180_v23 = vadd.bf16 %v11271_v21, %v13042_v20 }
 0x2fa   : > { %v3244_v22 = vmax.bf16 %v12988_v29, %v3180_v23 }
 0x2fc   : > { %4291 = vmatmul.mubr.bf16.gmra.mrb[80].mxu0 %v3211_v45  ;;  %4677 = vmatmul.mubr.bf16.gmra.mrb[80].mxu1 %v3211_v45  ;;  %v13043_v45 = vld [vmem:[#allocation29_spill] sm:$0xff] }
 0x2fd   : > { %4300 = vmatprep.mubr.bf16.mxu0 %v3216_v0  ;;  %4686 = vmatprep.mubr.bf16.mxu1 %v3216_v0  ;;  %v13044_v0 = vld [vmem:[#allocation23_spill] sm:$0xff] }
 0x2fe   : > { %v13045_v25 = vpack.c.bf16 %v13043_v45, %v13044_v0  ;;  %v11475_v0 = vrot.slane %v5171_v46, %v12987_v35 }
 0x300   : > { %v3179_v16 = vadd.bf16 %v11289_v55, %v13045_v25 }
 0x302   : > { %v3243_v56 = vmax.bf16 %v12988_v29, %v3179_v16 }
 0x304   : > { %4301 = vmatmul.mubr.bf16.gmra.mrb[84].mxu0 %v3215_v54  ;;  %4687 = vmatmul.mubr.bf16.gmra.mrb[84].mxu1 %v3215_v54  ;;  %v13048_v54 = vpack.c.bf16 %v13046_v32, %v13047_v31 }
 0x305   : > { %4310 = vmatprep.mubr.bf16.mxu0 %v3220_v6  ;;  %4696 = vmatprep.mubr.bf16.mxu1 %v3220_v6 }
 0x306   : > { %v3184_v6 = vadd.bf16 %v11271_v21, %v13048_v54  ;;  %v13058_v21 = vld [vmem:[#allocation13_spill] sm:$0xff]  ;;  %v13059_v54 = vld [vmem:[#allocation7_spill] sm:$0xff] }
 0x307   : > { %v4877_v33 = vrot.slane %v8775_v61, %v13058_v21  ;;  %v4884_v4 = vrot.slane %v4870_v2, %v13058_v21 }
 0x308   : > { %v3248_v60 = vmax.bf16 %v12988_v29, %v3184_v6  ;;  %v11480_v6 = vrot.slane %v5171_v46, %v13059_v54 }
 0x309   : > { %v4885_v49 = vcombine.high %v4877_v33, %v4877_v33  ;;  %v4886_v30 = vcombine.high %v4884_v4, %v4884_v4  ;;  %v4888_v3 = vpack.i.b16 %v4877_v33, %v4877_v33 }
 0x30b   : > { %v11454_v5 = vrot.slane %v4888_v3, %v12987_v35 }
 0x30c   : > { %4311 = vmatmul.mubr.bf16.gmra.mrb[88].mxu0 %v3219_v8  ;;  %4697 = vmatmul.mubr.bf16.gmra.mrb[88].mxu1 %v3219_v8  ;;  %v13051_v8 = vpack.c.bf16 %v13049_v62, %v13050_v26 }
 0x30d   : > { %4320 = vmatprep.mubr.bf16.mxu0 %v3224_v28  ;;  %4706 = vmatprep.mubr.bf16.mxu1 %v3224_v28 }
 0x30e   : > { %v3183_v28 = vadd.bf16 %v11289_v55, %v13051_v8  ;;  %v13060_v8 = vld [vmem:[#allocation9_spill] sm:$0xff] }
 0x310   : > { %v3247_v10 = vmax.bf16 %v12988_v29, %v3183_v28  ;;  %v11483_v28 = vrot.slane %v5171_v46, %v13060_v8 }
 0x314   : > { %4321 = vmatmul.mubr.bf16.gmra.mrb[92].mxu0 %v3223_v7  ;;  %4707 = vmatmul.mubr.bf16.gmra.mrb[92].mxu1 %v3223_v7  ;;  %v3252_v7 = vmax.bf16 %v12988_v29, %v3188_v24 }
 0x315   : > { %4330 = vmatprep.mubr.bf16.mxu0 %v3228_v27  ;;  %4716 = vmatprep.mubr.bf16.mxu1 %v3228_v27  ;;  %v13054_v27 = vld [vmem:[#allocation38_spill] sm:$0xff] }
 0x316   : > { %v13056_v53 = vpack.c.bf16 %v13054_v27, %v13055_v36 }
 0x318   : > { %v3187_v17 = vadd.bf16 %v11289_v55, %v13056_v53 }
 0x31a   : > { %v3251_v15 = vmax.bf16 %v12988_v29, %v3187_v17 }
 0x31c   : > { %4331 = vmatmul.mubr.bf16.gmra.mrb[96].mxu0 %v3227_v34  ;;  %4717 = vmatmul.mubr.bf16.gmra.mrb[96].mxu1 %v3227_v34  ;;  %v3256_v34 = vmax.bf16 %v12988_v29, %v3192_v13 }
 0x31d   : > { %4340 = vmatprep.mubr.bf16.mxu0 %v3232_v37  ;;  %4726 = vmatprep.mubr.bf16.mxu1 %v3232_v37  ;;  %v13057_v37 = vpack.c.bf16 %v11273_v1, %v11262_v11  ;;  %v4895_v11 = vpack.i.b16 %v4884_v4, %v4884_v4  ;;  %v4909_v1 = vpack.i.b16 %v4886_v30, %v4886_v30 }
 0x31f   : > { %v3191_v59 = vadd.bf16 %v11289_v55, %v13057_v37  ;;  %v11460_v63 = vrot.slane %v4895_v11, %v12987_v35  ;;  %v11463_v50 = vrot.slane %v4909_v1, %v12987_v35 }
 0x321   : > { %v3255_v38 = vmax.bf16 %v12988_v29, %v3191_v59 }
 0x324   : > { %4341 = vmatmul.mubr.bf16.gmra.mrb[100].mxu0 %v3231_v44  ;;  %4727 = vmatmul.mubr.bf16.gmra.mrb[100].mxu1 %v3231_v44  ;;  %v4902_v44 = vpack.i.b16 %v4885_v49, %v4885_v49 }
 0x325   : > { %4350 = vmatprep.mubr.bf16.mxu0 %v3236_v39  ;;  %4736 = vmatprep.mubr.bf16.mxu1 %v3236_v39 }
 0x326   : > { %v11457_v19 = vrot.slane %v4902_v44, %v12987_v35 }
 0x32c   : > { %4351 = vmatmul.mubr.bf16.gmra.mrb[104].mxu0 %v3235_v52  ;;  %4737 = vmatmul.mubr.bf16.gmra.mrb[104].mxu1 %v3235_v52 }
 0x32d   : > { %4360 = vmatprep.mubr.bf16.mxu0 %v3240_v9  ;;  %4746 = vmatprep.mubr.bf16.mxu1 %v3240_v9 }
 0x334   : > { %4361 = vmatmul.mubr.bf16.gmra.mrb[108].mxu0 %v3239_v40  ;;  %4747 = vmatmul.mubr.bf16.gmra.mrb[108].mxu1 %v3239_v40 }
 0x335   : > { %4370 = vmatprep.mubr.bf16.mxu0 %v3244_v22  ;;  %4756 = vmatprep.mubr.bf16.mxu1 %v3244_v22 }
 0x33c   : > { %4371 = vmatmul.mubr.bf16.gmra.mrb[112].mxu0 %v3243_v56  ;;  %4757 = vmatmul.mubr.bf16.gmra.mrb[112].mxu1 %v3243_v56 }
 0x33d   : > { %4380 = vmatprep.mubr.bf16.mxu0 %v3248_v60  ;;  %4766 = vmatprep.mubr.bf16.mxu1 %v3248_v60 }
 0x344   : > { %4381 = vmatmul.mubr.bf16.gmra.mrb[116].mxu0 %v3247_v10  ;;  %4767 = vmatmul.mubr.bf16.gmra.mrb[116].mxu1 %v3247_v10 }
 0x345   : > { %4390 = vmatprep.mubr.bf16.mxu0 %v3252_v7  ;;  %4776 = vmatprep.mubr.bf16.mxu1 %v3252_v7 }
 0x34c   : > { %4391 = vmatmul.mubr.bf16.gmra.mrb[120].mxu0 %v3251_v15  ;;  %4777 = vmatmul.mubr.bf16.gmra.mrb[120].mxu1 %v3251_v15 }
 0x34d   : > { %4400 = vmatprep.mubr.bf16.mxu0 %v3256_v34  ;;  %4786 = vmatprep.mubr.bf16.mxu1 %v3256_v34 }
 0x354   : > { %4401 = vmatmul.mubr.bf16.gmra.mrb[124].mxu0 %v3255_v38  ;;  %4787 = vmatmul.mubr.bf16.gmra.mrb[124].mxu1 %v3255_v38 }
 0x3af   : > { %v4252_v55 = vpop.f32.mrb[64].mxu0  ;;  %v4638_v39 = vpop.f32.mrb[64].mxu1 }
 0x3b0   : > { %v4254_v51 = vpop.f32.mrb[65].mxu0  ;;  %v4640_v18 = vpop.f32.mrb[65].mxu1 }
 0x3b1   : > { %v4256_v14 = vpop.f32.mrb[66].mxu0  ;;  %v4642_v58 = vpop.f32.mrb[66].mxu1 }
 0x3b2   : > { %v4797_v52 = vpack.c.bf16 %v4256_v14, %v4252_v55  ;;  %v4799_v9 = vpack.c.bf16 %v4642_v58, %v4638_v39  ;;  %v4258_v42 = vpop.f32.mrb[67].mxu0  ;;  %v4644_v57 = vpop.f32.mrb[67].mxu1 }
 0x3b3   : > { %v4798_v48 = vpack.c.bf16 %v4258_v42, %v4254_v51  ;;  %v4800_v47 = vpack.c.bf16 %v4644_v57, %v4640_v18 }
 0x3b4   : > { %v4915_v43 = vadd.bf16 %v11454_v5, %v4797_v52  ;;  %v4917_v20 = vadd.bf16 %v11457_v19, %v4799_v9 }
 0x3b5   : > { %v4916_v23 = vadd.bf16 %v11460_v63, %v4798_v48  ;;  %v4918_v40 = vadd.bf16 %v11463_v50, %v4800_v47 }
 0x3b6   : > { %v4979_v22 = vmax.bf16 %v12988_v29, %v4915_v43  ;;  %v4981_v45 = vmax.bf16 %v12988_v29, %v4917_v20 }
 0x3b7   : > { %v4980_v25 = vmax.bf16 %v12988_v29, %v4916_v23  ;;  %v4982_v16 = vmax.bf16 %v12988_v29, %v4918_v40  ;;  %v4262_v32 = vpop.f32.mrb[68].mxu0  ;;  %v4648_v31 = vpop.f32.mrb[68].mxu1 }
 0x3b8   : > { %v5043_v56 = vunpack.c.l.bf16 %v4979_v22  ;;  %v5047_v60 = vunpack.c.h.bf16 %v4979_v22  ;;  %v4264_v62 = vpop.f32.mrb[69].mxu0  ;;  %v4650_v26 = vpop.f32.mrb[69].mxu1  ;;  %v5045_v24 = vunpack.c.l.bf16 %v4981_v45  ;;  %v5049_v10 = vunpack.c.h.bf16 %v4981_v45 }
 0x3b9   : > { %v5044_v7 = vunpack.c.l.bf16 %v4980_v25  ;;  %v5048_v27 = vunpack.c.h.bf16 %v4980_v25  ;;  %v4266_v36 = vpop.f32.mrb[70].mxu0  ;;  %v4652_v53 = vpop.f32.mrb[70].mxu1  ;;  %v5050_v37 = vunpack.c.h.bf16 %v4982_v16  ;;  %v5046_v33 = vunpack.c.l.bf16 %v4982_v16 }
 0x3ba   : > { %v4801_v17 = vpack.c.bf16 %v4266_v36, %v4262_v32  ;;  %v4803_v13 = vpack.c.bf16 %v4652_v53, %v4648_v31  ;;  %v4268_v15 = vpop.f32.mrb[71].mxu0  ;;  %v4654_v34 = vpop.f32.mrb[71].mxu1  ;;  %v5197_v59 = vmul.f32 %v11475_v0, %v5047_v60  ;;  %v5193_v30 = vmul.f32 %v11475_v0, %v5043_v56 }
 0x3bb   : > { %v4802_v38 = vpack.c.bf16 %v4268_v15, %v4264_v62  ;;  %v4804_v61 = vpack.c.bf16 %v4654_v34, %v4650_v26  ;;  %v5198_v2 = vmul.f32 %v11480_v6, %v5048_v27  ;;  %v5194_v3 = vmul.f32 %v11480_v6, %v5044_v7 }
 0x3bc   : > { %v4919_v4 = vadd.bf16 %v11454_v5, %v4801_v17  ;;  %v4921_v49 = vadd.bf16 %v11457_v19, %v4803_v13  ;;  %v5199_v1 = vmul.f32 %v11483_v28, %v5049_v10  ;;  %v5200_v18 = vmul.f32 %v11486_v12, %v5050_v37 }
 0x3bd   : > { %v4920_v44 = vadd.bf16 %v11460_v63, %v4802_v38  ;;  %v4922_v11 = vadd.bf16 %v11463_v50, %v4804_v61  ;;  %v5326_v55 = vadd.f32 %v5198_v2, %v5197_v59  ;;  %v5321_v14 = vadd.f32 %v5194_v3, %v5193_v30 }
 0x3be   : > { %v4983_v39 = vmax.bf16 %v12988_v29, %v4919_v4  ;;  %v4985_v51 = vmax.bf16 %v12988_v29, %v4921_v49  ;;  %v5195_v48 = vmul.f32 %v11483_v28, %v5045_v24  ;;  %v5196_v40 = vmul.f32 %v11486_v12, %v5046_v33 }
 0x3bf   : > { %v4984_v58 = vmax.bf16 %v12988_v29, %v4920_v44  ;;  %v11502_v52 = vmax.bf16 %v12988_v29, %v4922_v11  ;;  %v4272_v9 = vpop.f32.mrb[72].mxu0  ;;  %v4658_v42 = vpop.f32.mrb[72].mxu1  ;;  %v5327_v57 = vadd.f32 %v5326_v55, %v5199_v1 }
 0x3c0   : > { %v5051_v47 = vunpack.c.l.bf16 %v4983_v39  ;;  %v5055_v46 = vunpack.c.h.bf16 %v4983_v39  ;;  %v5057_v43 = vunpack.c.h.bf16 %v4985_v51  ;;  %v4274_v20 = vpop.f32.mrb[73].mxu0  ;;  %v4660_v23 = vpop.f32.mrb[73].mxu1  ;;  %v5322_v31 = vadd.f32 %v5321_v14, %v5195_v48 }
 0x3c1   : > { %v5052_v22 = vunpack.c.l.bf16 %v4984_v58  ;;  %v5056_v45 = vunpack.c.h.bf16 %v4984_v58  ;;  %v4276_v25 = vpop.f32.mrb[74].mxu0  ;;  %v4662_v16 = vpop.f32.mrb[74].mxu1  ;;  %v5328_v32 = vadd.f32 %v5327_v57, %v5200_v18  ;;  %v5058_v10 = vunpack.c.h.bf16 %v11502_v52 }
 0x3c2   : > { %v4805_v56 = vpack.c.bf16 %v4276_v25, %v4272_v9  ;;  %v4807_v60 = vpack.c.bf16 %v4662_v16, %v4658_v42  ;;  %v4278_v62 = vpop.f32.mrb[75].mxu0  ;;  %v4664_v26 = vpop.f32.mrb[75].mxu1  ;;  %v5205_v24 = vmul.f32 %v11475_v0, %v5055_v46  ;;  %v5323_v36 = vadd.f32 %v5322_v31, %v5196_v40 }
 0x3c3   : > { %v4806_v7 = vpack.c.bf16 %v4278_v62, %v4274_v20  ;;  %v4808_v27 = vpack.c.bf16 %v4664_v26, %v4660_v23  ;;  %5329 = vadd.xlane.f32.xlu0 %v5328_v32  ;;  %v5206_v53 = vmul.f32 %v11480_v6, %v5056_v45  ;;  %v5053_v17 = vunpack.c.l.bf16 %v4985_v51 }
 0x3c4   : > { %v4923_v13 = vadd.bf16 %v11454_v5, %v4805_v56  ;;  %v4925_v15 = vadd.bf16 %v11457_v19, %v4807_v60  ;;  %v5207_v34 = vmul.f32 %v11483_v28, %v5057_v43  ;;  %5324 = vadd.xlane.f32.xlu1 %v5323_v36  ;;  %v5208_v38 = vmul.f32 %v11486_v12, %v5058_v10 }
 0x3c5   : > { %v4924_v37 = vadd.bf16 %v11460_v63, %v4806_v7  ;;  %v4926_v59 = vadd.bf16 %v11463_v50, %v4808_v27  ;;  %v5336_v61 = vadd.f32 %v5206_v53, %v5205_v24  ;;  %v5201_v4 = vmul.f32 %v11475_v0, %v5051_v47 }
 0x3c6   : > { %v4987_v2 = vmax.bf16 %v12988_v29, %v4923_v13  ;;  %v11517_v33 = vmax.bf16 %v12988_v29, %v4925_v15  ;;  %v5202_v49 = vmul.f32 %v11480_v6, %v5052_v22  ;;  %v5054_v55 = vunpack.c.l.bf16 %v11502_v52 }
 0x3c7   : > { %v4988_v30 = vmax.bf16 %v12988_v29, %v4924_v37  ;;  %v11523_v3 = vmax.bf16 %v12988_v29, %v4926_v59  ;;  %v4282_v44 = vpop.f32.mrb[76].mxu0  ;;  %v4668_v11 = vpop.f32.mrb[76].mxu1  ;;  %v5337_v1 = vadd.f32 %v5336_v61, %v5207_v34  ;;  %v5203_v9 = vmul.f32 %v11483_v28, %v5053_v17 }
 0x3c8   : > { %v5059_v39 = vunpack.c.l.bf16 %v4987_v2  ;;  %v5063_v51 = vunpack.c.h.bf16 %v4987_v2  ;;  %v5061_v18 = vunpack.c.l.bf16 %v11517_v33  ;;  %v4284_v14 = vpop.f32.mrb[77].mxu0  ;;  %v4670_v58 = vpop.f32.mrb[77].mxu1  ;;  %v5065_v42 = vunpack.c.h.bf16 %v11517_v33 }
 0x3c9   : > { %v5060_v57 = vunpack.c.l.bf16 %v4988_v30  ;;  %v5064_v48 = vunpack.c.h.bf16 %v4988_v30  ;;  %v4286_v47 = vpop.f32.mrb[78].mxu0  ;;  %v4672_v46 = vpop.f32.mrb[78].mxu1  ;;  %v5338_v43 = vadd.f32 %v5337_v1, %v5208_v38  ;;  %v5331_v52 = vadd.f32 %v5202_v49, %v5201_v4 }
 0x3ca   : > { %v4809_v20 = vpack.c.bf16 %v4286_v47, %v4282_v44  ;;  %v4811_v23 = vpack.c.bf16 %v4672_v46, %v4668_v11  ;;  %v4288_v40 = vpop.f32.mrb[79].mxu0  ;;  %v4674_v22 = vpop.f32.mrb[79].mxu1  ;;  %v5066_v45 = vunpack.c.h.bf16 %v11523_v3  ;;  %v5213_v32 = vmul.f32 %v11475_v0, %v5063_v51 }
 0x3cb   : > { %v4810_v25 = vpack.c.bf16 %v4288_v40, %v4284_v14  ;;  %v4812_v16 = vpack.c.bf16 %v4674_v22, %v4670_v58  ;;  %5339 = vadd.xlane.f32.xlu1 %v5338_v43  ;;  %v5214_v31 = vmul.f32 %v11480_v6, %v5064_v48  ;;  %v5204_v62 = vmul.f32 %v11486_v12, %v5054_v55 }
 0x3cc   : > { %v4927_v56 = vadd.bf16 %v11454_v5, %v4809_v20  ;;  %v4929_v60 = vadd.bf16 %v11457_v19, %v4811_v23  ;;  %v5332_v26 = vadd.f32 %v5331_v52, %v5203_v9  ;;  %v5215_v7 = vmul.f32 %v11483_v28, %v5065_v42 }
 0x3cd   : > { %v4928_v10 = vadd.bf16 %v11460_v63, %v4810_v25  ;;  %v4930_v24 = vadd.bf16 %v11463_v50, %v4812_v16  ;;  %v5346_v27 = vadd.f32 %v5214_v31, %v5213_v32  ;;  %v5216_v13 = vmul.f32 %v11486_v12, %v5066_v45 }
 0x3ce   : > { %v11539_v36 = vmax.bf16 %v12988_v29, %v4927_v56  ;;  %v11542_v53 = vmax.bf16 %v12988_v29, %v4929_v60  ;;  %v5333_v17 = vadd.f32 %v5332_v26, %v5204_v62  ;;  %v5209_v61 = vmul.f32 %v11475_v0, %v5059_v39 }
 0x3cf   : > { %v11546_v15 = vmax.bf16 %v12988_v29, %v4928_v10  ;;  %v11549_v34 = vmax.bf16 %v12988_v29, %v4930_v24  ;;  %v4292_v37 = vpop.f32.mrb[80].mxu0  ;;  %v4678_v59 = vpop.f32.mrb[80].mxu1  ;;  %v5347_v38 = vadd.f32 %v5346_v27, %v5215_v7  ;;  %v5062_v30 = vunpack.c.l.bf16 %v11523_v3 }
 0x3d0   : > { %v5067_v2 = vunpack.c.l.bf16 %v11539_v36  ;;  %v5071_v33 = vunpack.c.h.bf16 %v11539_v36  ;;  %5334 = vadd.xlane.f32.xlu0 %v5333_v17  ;;  %v4294_v4 = vpop.f32.mrb[81].mxu0  ;;  %v4680_v49 = vpop.f32.mrb[81].mxu1  ;;  %v5069_v44 = vunpack.c.l.bf16 %v11542_v53  ;;  %v5210_v14 = vmul.f32 %v11480_v6, %v5060_v57 }
 0x3d1   : > { %v5072_v11 = vunpack.c.h.bf16 %v11546_v15  ;;  %v4296_v1 = vpop.f32.mrb[82].mxu0  ;;  %v4682_v55 = vpop.f32.mrb[82].mxu1  ;;  %v5348_v51 = vadd.f32 %v5347_v38, %v5216_v13  ;;  %v5073_v39 = vunpack.c.h.bf16 %v11542_v53  ;;  %v5211_v47 = vmul.f32 %v11483_v28, %v5061_v18 }
 0x3d2   : > { %v4813_v58 = vpack.c.bf16 %v4296_v1, %v4292_v37  ;;  %v4815_v9 = vpack.c.bf16 %v4682_v55, %v4678_v59  ;;  %v4298_v42 = vpop.f32.mrb[83].mxu0  ;;  %v4684_v48 = vpop.f32.mrb[83].mxu1  ;;  %v5341_v3 = vadd.f32 %v5210_v14, %v5209_v61  ;;  %v5074_v20 = vunpack.c.h.bf16 %v11549_v34 }
 0x3d3   : > { %v4814_v46 = vpack.c.bf16 %v4298_v42, %v4294_v4  ;;  %v4816_v43 = vpack.c.bf16 %v4684_v48, %v4680_v49  ;;  %5349 = vadd.xlane.f32.xlu1 %v5348_v51  ;;  %v5221_v57 = vmul.f32 %v11475_v0, %v5071_v33  ;;  %v5222_v22 = vmul.f32 %v11480_v6, %v5072_v11 }
 0x3d4   : > { %v4931_v23 = vadd.bf16 %v11454_v5, %v4813_v58  ;;  %v4933_v40 = vadd.bf16 %v11457_v19, %v4815_v9  ;;  %v5212_v18 = vmul.f32 %v11486_v12, %v5062_v30  ;;  %v5342_v25 = vadd.f32 %v5341_v3, %v5211_v47 }
 0x3d5   : > { %v4932_v52 = vadd.bf16 %v11460_v63, %v4814_v46  ;;  %v4934_v45 = vadd.bf16 %v11463_v50, %v4816_v43  ;;  %v5068_v16 = vunpack.c.l.bf16 %v11546_v15  ;;  %v5356_v56 = vadd.f32 %v5222_v22, %v5221_v57 }
 0x3d6   : > { %v11570_v32 = vmax.bf16 %v12988_v29, %v4931_v23  ;;  %v11573_v31 = vmax.bf16 %v12988_v29, %v4933_v40  ;;  %v5343_v62 = vadd.f32 %v5342_v25, %v5212_v18  ;;  %v5223_v24 = vmul.f32 %v11483_v28, %v5073_v39 }
 0x3d7   : > { %v11576_v60 = vmax.bf16 %v12988_v29, %v4932_v52  ;;  %v4302_v26 = vpop.f32.mrb[84].mxu0  ;;  %v4688_v10 = vpop.f32.mrb[84].mxu1  ;;  %v5224_v7 = vmul.f32 %v11486_v12, %v5074_v20  ;;  %v11583_v53 = vmax.bf16 %v12988_v29, %v4934_v45  ;;  %v5070_v15 = vunpack.c.l.bf16 %v11549_v34 }
 0x3d8   : > { %v5075_v27 = vunpack.c.l.bf16 %v11570_v32  ;;  %v5079_v36 = vunpack.c.h.bf16 %v11570_v32  ;;  %v4304_v17 = vpop.f32.mrb[85].mxu0  ;;  %v4690_v13 = vpop.f32.mrb[85].mxu1  ;;  %v5077_v37 = vunpack.c.l.bf16 %v11573_v31  ;;  %5344 = vadd.xlane.f32.xlu0 %v5343_v62  ;;  %v5357_v33 = vadd.f32 %v5356_v56, %v5223_v24 }
 0x3d9   : > { %v5080_v59 = vunpack.c.h.bf16 %v11576_v60  ;;  %v4306_v38 = vpop.f32.mrb[86].mxu0  ;;  %v4692_v61 = vpop.f32.mrb[86].mxu1  ;;  %v5217_v4 = vmul.f32 %v11475_v0, %v5067_v2  ;;  %v5081_v49 = vunpack.c.h.bf16 %v11573_v31  ;;  %v5218_v51 = vmul.f32 %v11480_v6, %v5068_v16 }
 0x3da   : > { %v4817_v30 = vpack.c.bf16 %v4306_v38, %v4302_v26  ;;  %v4819_v11 = vpack.c.bf16 %v4692_v61, %v4688_v10  ;;  %v4308_v1 = vpop.f32.mrb[87].mxu0  ;;  %v4694_v55 = vpop.f32.mrb[87].mxu1  ;;  %v5358_v39 = vadd.f32 %v5357_v33, %v5224_v7  ;;  %v5219_v58 = vmul.f32 %v11483_v28, %v5069_v44 }
 0x3db   : > { %v4818_v14 = vpack.c.bf16 %v4308_v1, %v4304_v17  ;;  %v4820_v34 = vpack.c.bf16 %v4694_v55, %v4690_v13  ;;  %v5351_v48 = vadd.f32 %v5218_v51, %v5217_v4  ;;  %v5082_v2 = vunpack.c.h.bf16 %v11583_v53 }
 0x3dc   : > { %v4935_v9 = vadd.bf16 %v11454_v5, %v4817_v30  ;;  %v4937_v42 = vadd.bf16 %v11457_v19, %v4819_v11  ;;  %5359 = vadd.xlane.f32.xlu1 %v5358_v39  ;;  %v5229_v43 = vmul.f32 %v11475_v0, %v5079_v36  ;;  %v5230_v3 = vmul.f32 %v11480_v6, %v5080_v59 }
 0x3dd   : > { %v4936_v47 = vadd.bf16 %v11460_v63, %v4818_v14  ;;  %v4938_v46 = vadd.bf16 %v11463_v50, %v4820_v34  ;;  %v5076_v20 = vunpack.c.l.bf16 %v11576_v60  ;;  %v5352_v40 = vadd.f32 %v5351_v48, %v5219_v58 }
 0x3de   : > { %v11601_v44 = vmax.bf16 %v12988_v29, %v4935_v9  ;;  %v11604_v23 = vmax.bf16 %v12988_v29, %v4937_v42  ;;  %v5220_v22 = vmul.f32 %v11486_v12, %v5070_v15  ;;  %v5231_v18 = vmul.f32 %v11483_v28, %v5081_v49 }
 0x3df   : > { %v11607_v57 = vmax.bf16 %v12988_v29, %v4936_v47  ;;  %v4312_v52 = vpop.f32.mrb[88].mxu0  ;;  %v4698_v45 = vpop.f32.mrb[88].mxu1  ;;  %v5366_v25 = vadd.f32 %v5230_v3, %v5229_v43  ;;  %v11614_v56 = vmax.bf16 %v12988_v29, %v4938_v46  ;;  %v5232_v26 = vmul.f32 %v11486_v12, %v5082_v2 }
 0x3e0   : > { %v5083_v16 = vunpack.c.l.bf16 %v11601_v44  ;;  %v5087_v32 = vunpack.c.h.bf16 %v11601_v44  ;;  %v4314_v60 = vpop.f32.mrb[89].mxu0  ;;  %v4700_v62 = vpop.f32.mrb[89].mxu1  ;;  %v5085_v10 = vunpack.c.l.bf16 %v11604_v23  ;;  %v5353_v7 = vadd.f32 %v5352_v40, %v5220_v22 }
 0x3e1   : > { %v5088_v24 = vunpack.c.h.bf16 %v11607_v57  ;;  %v4316_v36 = vpop.f32.mrb[90].mxu0  ;;  %v4702_v17 = vpop.f32.mrb[90].mxu1  ;;  %v5367_v13 = vadd.f32 %v5366_v25, %v5231_v18  ;;  %v5078_v33 = vunpack.c.l.bf16 %v11583_v53  ;;  %v5225_v4 = vmul.f32 %v11475_v0, %v5075_v27 }
 0x3e2   : > { %v4821_v15 = vpack.c.bf16 %v4316_v36, %v4312_v52  ;;  %v4823_v59 = vpack.c.bf16 %v4702_v17, %v4698_v45  ;;  %v4318_v38 = vpop.f32.mrb[91].mxu0  ;;  %v4704_v61 = vpop.f32.mrb[91].mxu1  ;;  %5354 = vadd.xlane.f32.xlu0 %v5353_v7  ;;  %v5226_v1 = vmul.f32 %v11480_v6, %v5076_v20  ;;  %v5089_v55 = vunpack.c.h.bf16 %v11604_v23 }
 0x3e3   : > { %v4822_v49 = vpack.c.bf16 %v4318_v38, %v4314_v60  ;;  %v4824_v30 = vpack.c.bf16 %v4704_v61, %v4700_v62  ;;  %v5368_v11 = vadd.f32 %v5367_v13, %v5232_v26  ;;  %v5084_v51 = vunpack.c.l.bf16 %v11607_v57 }
 0x3e4   : > { %v4939_v14 = vadd.bf16 %v11454_v5, %v4821_v15  ;;  %v4941_v34 = vadd.bf16 %v11457_v19, %v4823_v59  ;;  %v5227_v27 = vmul.f32 %v11483_v28, %v5077_v37  ;;  %v5361_v58 = vadd.f32 %v5226_v1, %v5225_v4 }
 0x3e5   : > { %v4940_v39 = vadd.bf16 %v11460_v63, %v4822_v49  ;;  %v4942_v53 = vadd.bf16 %v11463_v50, %v4824_v30  ;;  %5369 = vadd.xlane.f32.xlu1 %v5368_v11  ;;  %v5237_v48 = vmul.f32 %v11475_v0, %v5087_v32  ;;  %v5238_v2 = vmul.f32 %v11480_v6, %v5088_v24 }
 0x3e6   : > { %v11632_v9 = vmax.bf16 %v12988_v29, %v4939_v14  ;;  %v11635_v42 = vmax.bf16 %v12988_v29, %v4941_v34  ;;  %v5228_v46 = vmul.f32 %v11486_v12, %v5078_v33  ;;  %v5362_v43 = vadd.f32 %v5361_v58, %v5227_v27 }
 0x3e7   : > { %v11640_v47 = vmax.bf16 %v12988_v29, %v4940_v39  ;;  %v4322_v31 = vpop.f32.mrb[92].mxu0  ;;  %v4708_v3 = vpop.f32.mrb[92].mxu1  ;;  %v5090_v37 = vunpack.c.h.bf16 %v11614_v56  ;;  %v11647_v57 = vmax.bf16 %v12988_v29, %v4942_v53  ;;  %v5239_v45 = vmul.f32 %v11483_v28, %v5089_v55 }
 0x3e8   : > { %v5091_v20 = vunpack.c.l.bf16 %v11632_v9  ;;  %v5095_v40 = vunpack.c.h.bf16 %v11632_v9  ;;  %v4324_v22 = vpop.f32.mrb[93].mxu0  ;;  %v4710_v52 = vpop.f32.mrb[93].mxu1  ;;  %v5093_v18 = vunpack.c.l.bf16 %v11635_v42  ;;  %v5097_v25 = vunpack.c.h.bf16 %v11635_v42 }
 0x3e9   : > { %v5096_v32 = vunpack.c.h.bf16 %v11640_v47  ;;  %v5363_v60 = vadd.f32 %v5362_v43, %v5228_v46  ;;  %v4326_v62 = vpop.f32.mrb[94].mxu0  ;;  %v4712_v26 = vpop.f32.mrb[94].mxu1  ;;  %v5376_v13 = vadd.f32 %v5238_v2, %v5237_v48  ;;  %v5086_v15 = vunpack.c.l.bf16 %v11614_v56 }
 0x3ea   : > { %v4825_v24 = vpack.c.bf16 %v4326_v62, %v4322_v31  ;;  %v4827_v7 = vpack.c.bf16 %v4712_v26, %v4708_v3  ;;  %v4328_v36 = vpop.f32.mrb[95].mxu0  ;;  %v4714_v17 = vpop.f32.mrb[95].mxu1  ;;  %v5233_v61 = vmul.f32 %v11475_v0, %v5083_v16  ;;  %v5234_v33 = vmul.f32 %v11480_v6, %v5084_v51 }
 0x3eb   : > { %5364 = vadd.xlane.f32.xlu0 %v5363_v60  ;;  %v4826_v59 = vpack.c.bf16 %v4328_v36, %v4324_v22  ;;  %v4828_v38 = vpack.c.bf16 %v4714_v17, %v4710_v52  ;;  %v5240_v30 = vmul.f32 %v11486_v12, %v5090_v37  ;;  %v5377_v11 = vadd.f32 %v5376_v13, %v5239_v45 }
 0x3ec   : > { %v4943_v4 = vadd.bf16 %v11454_v5, %v4825_v24  ;;  %v4945_v49 = vadd.bf16 %v11457_v19, %v4827_v7  ;;  %v5235_v55 = vmul.f32 %v11483_v28, %v5085_v10  ;;  %v5371_v44 = vadd.f32 %v5234_v33, %v5233_v61 }
 0x3ed   : > { %v4944_v1 = vadd.bf16 %v11460_v63, %v4826_v59  ;;  %v4946_v56 = vadd.bf16 %v11463_v50, %v4828_v38  ;;  %v5092_v16 = vunpack.c.l.bf16 %v11640_v47  ;;  %v5378_v34 = vadd.f32 %v5377_v11, %v5240_v30 }
 0x3ee   : > { %v11668_v51 = vmax.bf16 %v12988_v29, %v4943_v4  ;;  %v11671_v14 = vmax.bf16 %v12988_v29, %v4945_v49  ;;  %v5236_v53 = vmul.f32 %v11486_v12, %v5086_v15  ;;  %v5372_v27 = vadd.f32 %v5371_v44, %v5235_v55 }
 0x3ef   : > { %v11674_v39 = vmax.bf16 %v12988_v29, %v4944_v1  ;;  %v4332_v58 = vpop.f32.mrb[96].mxu0  ;;  %v4718_v23 = vpop.f32.mrb[96].mxu1  ;;  %v5245_v10 = vmul.f32 %v11475_v0, %v5095_v40  ;;  %v11681_v47 = vmax.bf16 %v12988_v29, %v4946_v56  ;;  %5379 = vadd.xlane.f32.xlu1 %v5378_v34  ;;  %v5098_v31 = vunpack.c.h.bf16 %v11647_v57 }
 0x3f0   : > { %v5099_v48 = vunpack.c.l.bf16 %v11668_v51  ;;  %v5103_v2 = vunpack.c.h.bf16 %v11668_v51  ;;  %v4334_v46 = vpop.f32.mrb[97].mxu0  ;;  %v4720_v43 = vpop.f32.mrb[97].mxu1  ;;  %v5101_v3 = vunpack.c.l.bf16 %v11671_v14  ;;  %v5105_v37 = vunpack.c.h.bf16 %v11671_v14 }
 0x3f1   : > { %v5373_v22 = vadd.f32 %v5372_v27, %v5236_v53  ;;  %v4336_v52 = vpop.f32.mrb[98].mxu0  ;;  %v4722_v45 = vpop.f32.mrb[98].mxu1  ;;  %v5246_v40 = vmul.f32 %v11480_v6, %v5096_v32  ;;  %v5100_v60 = vunpack.c.l.bf16 %v11674_v39  ;;  %v5247_v36 = vmul.f32 %v11483_v28, %v5097_v25 }
 0x3f2   : > { %v4829_v62 = vpack.c.bf16 %v4336_v52, %v4332_v58  ;;  %v4831_v26 = vpack.c.bf16 %v4722_v45, %v4718_v23  ;;  %v4338_v24 = vpop.f32.mrb[99].mxu0  ;;  %v4724_v7 = vpop.f32.mrb[99].mxu1  ;;  %v5094_v59 = vunpack.c.l.bf16 %v11647_v57  ;;  %v5241_v32 = vmul.f32 %v11475_v0, %v5091_v20 }
 0x3f3   : > { %5374 = vadd.xlane.f32.xlu0 %v5373_v22  ;;  %v4830_v17 = vpack.c.bf16 %v4338_v24, %v4334_v46  ;;  %v4832_v13 = vpack.c.bf16 %v4724_v7, %v4720_v43  ;;  %v5386_v15 = vadd.f32 %v5246_v40, %v5245_v10  ;;  %v5242_v33 = vmul.f32 %v11480_v6, %v5092_v16 }
 0x3f4   : > { %v4947_v38 = vadd.bf16 %v11454_v5, %v4829_v62  ;;  %v4949_v61 = vadd.bf16 %v11457_v19, %v4831_v26  ;;  %v5248_v49 = vmul.f32 %v11486_v12, %v5098_v31  ;;  %v5104_v11 = vunpack.c.h.bf16 %v11674_v39 }
 0x3f5   : > { %v4948_v4 = vadd.bf16 %v11460_v63, %v4830_v17  ;;  %v4950_v25 = vadd.bf16 %v11463_v50, %v4832_v13  ;;  %v5387_v30 = vadd.f32 %v5386_v15, %v5247_v36  ;;  %v5381_v9 = vadd.f32 %v5242_v33, %v5241_v32 }
 0x3f6   : > { %v11701_v57 = vmax.bf16 %v12988_v29, %v4947_v38  ;;  %v11704_v1 = vmax.bf16 %v12988_v29, %v4949_v61  ;;  %v5243_v55 = vmul.f32 %v11483_v28, %v5093_v18  ;;  %v5244_v44 = vmul.f32 %v11486_v12, %v5094_v59 }
 0x3f7   : > { %v11707_v20 = vmax.bf16 %v12988_v29, %v4948_v4  ;;  %v5388_v56 = vadd.f32 %v5387_v30, %v5248_v49  ;;  %v4342_v16 = vpop.f32.mrb[100].mxu0  ;;  %v4728_v34 = vpop.f32.mrb[100].mxu1  ;;  %v11716_v27 = vmax.bf16 %v12988_v29, %v4950_v25  ;;  %v5106_v10 = vunpack.c.h.bf16 %v11681_v47 }
 0x3f8   : > { %v5107_v39 = vunpack.c.l.bf16 %v11701_v57  ;;  %v5111_v53 = vunpack.c.h.bf16 %v11701_v57  ;;  %v4344_v58 = vpop.f32.mrb[101].mxu0  ;;  %v4730_v23 = vpop.f32.mrb[101].mxu1  ;;  %v5109_v46 = vunpack.c.l.bf16 %v11704_v1  ;;  %v5113_v42 = vunpack.c.h.bf16 %v11704_v1 }
 0x3f9   : > { %5389 = vadd.xlane.f32.xlu1 %v5388_v56  ;;  %v5382_v18 = vadd.f32 %v5381_v9, %v5243_v55  ;;  %v4346_v43 = vpop.f32.mrb[102].mxu0  ;;  %v4732_v31 = vpop.f32.mrb[102].mxu1  ;;  %v5253_v22 = vmul.f32 %v11475_v0, %v5103_v2  ;;  %v5108_v52 = vunpack.c.l.bf16 %v11707_v20  ;;  %v5254_v24 = vmul.f32 %v11480_v6, %v5104_v11 }
 0x3fa   : > { %v4833_v45 = vpack.c.bf16 %v4346_v43, %v4342_v16  ;;  %v4835_v40 = vpack.c.bf16 %v4732_v31, %v4728_v34  ;;  %v4348_v62 = vpop.f32.mrb[103].mxu0  ;;  %v4734_v26 = vpop.f32.mrb[103].mxu1  ;;  %v5255_v13 = vmul.f32 %v11483_v28, %v5105_v37  ;;  %v5102_v2 = vunpack.c.l.bf16 %v11681_v47 }
 0x3fb   : > { %v5383_v7 = vadd.f32 %v5382_v18, %v5244_v44  ;;  %v4834_v36 = vpack.c.bf16 %v4348_v62, %v4344_v58  ;;  %v4836_v17 = vpack.c.bf16 %v4734_v26, %v4730_v23  ;;  %v5396_v38 = vadd.f32 %v5254_v24, %v5253_v22 }
 0x3fc   : > { %v4951_v15 = vadd.bf16 %v11454_v5, %v4833_v45  ;;  %v4953_v59 = vadd.bf16 %v11457_v19, %v4835_v40  ;;  %v5249_v33 = vmul.f32 %v11475_v0, %v5099_v48  ;;  %v5250_v4 = vmul.f32 %v11480_v6, %v5100_v60 }
 0x3fd   : > { %5384 = vadd.xlane.f32.xlu0 %v5383_v7  ;;  %v4952_v61 = vadd.bf16 %v11460_v63, %v4834_v36  ;;  %v4954_v32 = vadd.bf16 %v11463_v50, %v4836_v17  ;;  %v5112_v37 = vunpack.c.h.bf16 %v11707_v20  ;;  %v5397_v47 = vadd.f32 %v5396_v38, %v5255_v13 }
 0x3fe   : > { %v11736_v25 = vmax.bf16 %v12988_v29, %v4951_v15  ;;  %v11739_v49 = vmax.bf16 %v12988_v29, %v4953_v59  ;;  %v5256_v11 = vmul.f32 %v11486_v12, %v5106_v10  ;;  %v5251_v51 = vmul.f32 %v11483_v28, %v5101_v3 }
 0x3ff   : > { %v11742_v30 = vmax.bf16 %v12988_v29, %v4952_v61  ;;  %v5391_v48 = vadd.f32 %v5250_v4, %v5249_v33  ;;  %v4352_v60 = vpop.f32.mrb[104].mxu0  ;;  %v4738_v9 = vpop.f32.mrb[104].mxu1  ;;  %v11751_v44 = vmax.bf16 %v12988_v29, %v4954_v32  ;;  %v5252_v16 = vmul.f32 %v11486_v12, %v5102_v2 }
 0x400   : > { %v5115_v56 = vunpack.c.l.bf16 %v11736_v25  ;;  %v5119_v55 = vunpack.c.h.bf16 %v11736_v25  ;;  %v4354_v34 = vpop.f32.mrb[105].mxu0  ;;  %v4740_v58 = vpop.f32.mrb[105].mxu1  ;;  %v5117_v23 = vunpack.c.l.bf16 %v11739_v49  ;;  %v5121_v14 = vunpack.c.h.bf16 %v11739_v49 }
 0x401   : > { %v5398_v10 = vadd.f32 %v5397_v47, %v5256_v11  ;;  %v5392_v3 = vadd.f32 %v5391_v48, %v5251_v51  ;;  %v4356_v18 = vpop.f32.mrb[106].mxu0  ;;  %v4742_v43 = vpop.f32.mrb[106].mxu1  ;;  %v5114_v62 = vunpack.c.h.bf16 %v11716_v27  ;;  %v5261_v26 = vmul.f32 %v11475_v0, %v5111_v53 }
 0x402   : > { %v4837_v31 = vpack.c.bf16 %v4356_v18, %v4352_v60  ;;  %v4839_v22 = vpack.c.bf16 %v4742_v43, %v4738_v9  ;;  %v4358_v45 = vpop.f32.mrb[107].mxu0  ;;  %v4744_v40 = vpop.f32.mrb[107].mxu1  ;;  %v5262_v17 = vmul.f32 %v11480_v6, %v5112_v37  ;;  %v5116_v13 = vunpack.c.l.bf16 %v11742_v30 }
 0x403   : > { %5399 = vadd.xlane.f32.xlu1 %v5398_v10  ;;  %v5393_v24 = vadd.f32 %v5392_v3, %v5252_v16  ;;  %v4838_v7 = vpack.c.bf16 %v4358_v45, %v4354_v34  ;;  %v4840_v36 = vpack.c.bf16 %v4744_v40, %v4740_v58  ;;  %v5263_v38 = vmul.f32 %v11483_v28, %v5113_v42 }
 0x404   : > { %v4955_v15 = vadd.bf16 %v11454_v5, %v4837_v31  ;;  %v4957_v59 = vadd.bf16 %v11457_v19, %v4839_v22  ;;  %v5264_v53 = vmul.f32 %v11486_v12, %v5114_v62  ;;  %v5406_v32 = vadd.f32 %v5262_v17, %v5261_v26 }
 0x405   : > { %5394 = vadd.xlane.f32.xlu0 %v5393_v24  ;;  %v4956_v2 = vadd.bf16 %v11460_v63, %v4838_v7  ;;  %v4958_v61 = vadd.bf16 %v11463_v50, %v4840_v36  ;;  %v5257_v37 = vmul.f32 %v11475_v0, %v5107_v39  ;;  %v5258_v42 = vmul.f32 %v11480_v6, %v5108_v52 }
 0x406   : > { %v11767_v33 = vmax.bf16 %v12988_v29, %v4955_v15  ;;  %v11770_v4 = vmax.bf16 %v12988_v29, %v4957_v59  ;;  %v5407_v51 = vadd.f32 %v5406_v32, %v5263_v38  ;;  %v5110_v48 = vunpack.c.l.bf16 %v11716_v27 }
 0x407   : > { %v11779_v47 = vmax.bf16 %v12988_v29, %v4956_v2  ;;  %v11782_v11 = vmax.bf16 %v12988_v29, %v4958_v61  ;;  %v4362_v60 = vpop.f32.mrb[108].mxu0  ;;  %v4748_v9 = vpop.f32.mrb[108].mxu1  ;;  %v5120_v16 = vunpack.c.h.bf16 %v11742_v30  ;;  %v5259_v20 = vmul.f32 %v11483_v28, %v5109_v46 }
 0x408   : > { %v5123_v57 = vunpack.c.l.bf16 %v11767_v33  ;;  %v5127_v39 = vunpack.c.h.bf16 %v11767_v33  ;;  %v4364_v52 = vpop.f32.mrb[109].mxu0  ;;  %v4750_v34 = vpop.f32.mrb[109].mxu1  ;;  %v5125_v58 = vunpack.c.l.bf16 %v11770_v4  ;;  %v5129_v10 = vunpack.c.h.bf16 %v11770_v4 }
 0x409   : > { %v5124_v27 = vunpack.c.l.bf16 %v11779_v47  ;;  %v5408_v3 = vadd.f32 %v5407_v51, %v5264_v53  ;;  %v4366_v18 = vpop.f32.mrb[110].mxu0  ;;  %v4752_v43 = vpop.f32.mrb[110].mxu1  ;;  %v5128_v31 = vunpack.c.h.bf16 %v11779_v47  ;;  %v5130_v22 = vunpack.c.h.bf16 %v11782_v11 }
 0x40a   : > { %v5401_v45 = vadd.f32 %v5258_v42, %v5257_v37  ;;  %v4841_v40 = vpack.c.bf16 %v4366_v18, %v4362_v60  ;;  %v4368_v1 = vpop.f32.mrb[111].mxu0  ;;  %v4754_v62 = vpop.f32.mrb[111].mxu1  ;;  %v5260_v46 = vmul.f32 %v11486_v12, %v5110_v48  ;;  %v4843_v26 = vpack.c.bf16 %v4752_v43, %v4748_v9 }
 0x40b   : > { %5409 = vadd.xlane.f32.xlu1 %v5408_v3  ;;  %v4842_v24 = vpack.c.bf16 %v4368_v1, %v4364_v52  ;;  %v4844_v7 = vpack.c.bf16 %v4754_v62, %v4750_v34  ;;  %v5122_v15 = vunpack.c.h.bf16 %v11751_v44  ;;  %v5269_v59 = vmul.f32 %v11475_v0, %v5119_v55 }
 0x40c   : > { %v5402_v36 = vadd.f32 %v5401_v45, %v5259_v20  ;;  %v4959_v17 = vadd.bf16 %v11454_v5, %v4841_v40  ;;  %v4961_v38 = vadd.bf16 %v11457_v19, %v4843_v26  ;;  %v5270_v53 = vmul.f32 %v11480_v6, %v5120_v16 }
 0x40d   : > { %v4960_v2 = vadd.bf16 %v11460_v63, %v4842_v24  ;;  %v4962_v61 = vadd.bf16 %v11463_v50, %v4844_v7  ;;  %v5277_v32 = vmul.f32 %v11475_v0, %v5127_v39  ;;  %v5278_v37 = vmul.f32 %v11480_v6, %v5128_v31 }
 0x40e   : > { %v5403_v42 = vadd.f32 %v5402_v36, %v5260_v46  ;;  %v11809_v51 = vmax.bf16 %v12988_v29, %v4959_v17  ;;  %v11812_v48 = vmax.bf16 %v12988_v29, %v4961_v38  ;;  %v5416_v9 = vadd.f32 %v5270_v53, %v5269_v59 }
 0x40f   : > { %v11815_v55 = vmax.bf16 %v12988_v29, %v4960_v2  ;;  %v11818_v60 = vmax.bf16 %v12988_v29, %v4962_v61  ;;  %v4372_v20 = vpop.f32.mrb[112].mxu0  ;;  %v4758_v16 = vpop.f32.mrb[112].mxu1  ;;  %v5271_v52 = vmul.f32 %v11483_v28, %v5121_v14  ;;  %v5272_v34 = vmul.f32 %v11486_v12, %v5122_v15 }
 0x410   : > { %5404 = vadd.xlane.f32.xlu0 %v5403_v42  ;;  %v5135_v39 = vunpack.c.h.bf16 %v11809_v51  ;;  %v5265_v3 = vmul.f32 %v11475_v0, %v5115_v56  ;;  %v4374_v18 = vpop.f32.mrb[113].mxu0  ;;  %v4760_v43 = vpop.f32.mrb[113].mxu1  ;;  %v5131_v31 = vunpack.c.l.bf16 %v11809_v51  ;;  %v5133_v45 = vunpack.c.l.bf16 %v11812_v48 }
 0x411   : > { %v5137_v40 = vunpack.c.h.bf16 %v11812_v48  ;;  %v5118_v1 = vunpack.c.l.bf16 %v11751_v44  ;;  %v4376_v62 = vpop.f32.mrb[114].mxu0  ;;  %v4762_v46 = vpop.f32.mrb[114].mxu1  ;;  %v5132_v14 = vunpack.c.l.bf16 %v11815_v55  ;;  %v5136_v26 = vunpack.c.h.bf16 %v11815_v55 }
 0x412   : > { %v5417_v24 = vadd.f32 %v5416_v9, %v5271_v52  ;;  %v5266_v25 = vmul.f32 %v11480_v6, %v5116_v13  ;;  %v4378_v56 = vpop.f32.mrb[115].mxu0  ;;  %v4764_v7 = vpop.f32.mrb[115].mxu1  ;;  %v5285_v36 = vmul.f32 %v11475_v0, %v5135_v39  ;;  %v5138_v17 = vunpack.c.h.bf16 %v11818_v60 }
 0x413   : > { %v5267_v44 = vmul.f32 %v11483_v28, %v5117_v23  ;;  %v4845_v15 = vpack.c.bf16 %v4376_v62, %v4372_v20  ;;  %v4847_v2 = vpack.c.bf16 %v4762_v46, %v4758_v16  ;;  %v4846_v61 = vpack.c.bf16 %v4378_v56, %v4374_v18 }
 0x414   : > { %v5418_v59 = vadd.f32 %v5417_v24, %v5272_v34  ;;  %v5411_v38 = vadd.f32 %v5266_v25, %v5265_v3  ;;  %v5268_v53 = vmul.f32 %v11486_v12, %v5118_v1  ;;  %v4848_v13 = vpack.c.bf16 %v4764_v7, %v4760_v43 }
 0x415   : > { %v4963_v30 = vadd.bf16 %v11454_v5, %v4845_v15  ;;  %v5279_v42 = vmul.f32 %v11483_v28, %v5129_v10  ;;  %v4965_v49 = vadd.bf16 %v11457_v19, %v4847_v2  ;;  %v4964_v23 = vadd.bf16 %v11460_v63, %v4846_v61 }
 0x416   : > { %5419 = vadd.xlane.f32.xlu1 %v5418_v59  ;;  %v5412_v9 = vadd.f32 %v5411_v38, %v5267_v44  ;;  %v5426_v20 = vadd.f32 %v5278_v37, %v5277_v32  ;;  %v4966_v16 = vadd.bf16 %v11463_v50, %v4848_v13  ;;  %v5280_v52 = vmul.f32 %v11486_v12, %v5130_v22 }
 0x417   : > { %v11850_v39 = vmax.bf16 %v12988_v29, %v4963_v30  ;;  %v5273_v10 = vmul.f32 %v11475_v0, %v5123_v57  ;;  %v4382_v34 = vpop.f32.mrb[116].mxu0  ;;  %v4768_v3 = vpop.f32.mrb[116].mxu1  ;;  %v11860_v43 = vmax.bf16 %v12988_v29, %v4965_v49  ;;  %v11863_v32 = vmax.bf16 %v12988_v29, %v4964_v23 }
 0x418   : > { %v5413_v18 = vadd.f32 %v5412_v9, %v5268_v53  ;;  %v5427_v37 = vadd.f32 %v5426_v20, %v5279_v42  ;;  %v4384_v1 = vpop.f32.mrb[117].mxu0  ;;  %v4770_v62 = vpop.f32.mrb[117].mxu1  ;;  %v11867_v22 = vmax.bf16 %v12988_v29, %v4966_v16  ;;  %v5126_v33 = vunpack.c.l.bf16 %v11782_v11 }
 0x419   : > { %v5143_v46 = vunpack.c.h.bf16 %v11850_v39  ;;  %v5274_v57 = vmul.f32 %v11480_v6, %v5124_v27  ;;  %v4386_v24 = vpop.f32.mrb[118].mxu0  ;;  %v4772_v25 = vpop.f32.mrb[118].mxu1  ;;  %v5286_v56 = vmul.f32 %v11480_v6, %v5136_v26  ;;  %v5139_v7 = vunpack.c.l.bf16 %v11850_v39 }
 0x41a   : > { %5414 = vadd.xlane.f32.xlu0 %v5413_v18  ;;  %v5141_v44 = vunpack.c.l.bf16 %v11860_v43  ;;  %v5145_v15 = vunpack.c.h.bf16 %v11860_v43  ;;  %v4388_v59 = vpop.f32.mrb[119].mxu0  ;;  %v4774_v38 = vpop.f32.mrb[119].mxu1  ;;  %v5140_v11 = vunpack.c.l.bf16 %v11863_v32  ;;  %v5144_v47 = vunpack.c.h.bf16 %v11863_v32 }
 0x41b   : > { %v5293_v2 = vmul.f32 %v11475_v0, %v5143_v46  ;;  %v5428_v27 = vadd.f32 %v5427_v37, %v5280_v52  ;;  %v5146_v61 = vunpack.c.h.bf16 %v11867_v22  ;;  %v5275_v26 = vmul.f32 %v11483_v28, %v5125_v58 }
 0x41c   : > { %v5421_v53 = vadd.f32 %v5274_v57, %v5273_v10  ;;  %v4849_v30 = vpack.c.bf16 %v4386_v24, %v4382_v34  ;;  %v5276_v13 = vmul.f32 %v11486_v12, %v5126_v33  ;;  %v4851_v42 = vpack.c.bf16 %v4772_v25, %v4768_v3 }
 0x41d   : > { %5429 = vadd.xlane.f32.xlu1 %v5428_v27  ;;  %v4850_v9 = vpack.c.bf16 %v4388_v59, %v4384_v1  ;;  %v4852_v49 = vpack.c.bf16 %v4774_v38, %v4770_v62  ;;  %v5287_v16 = vmul.f32 %v11483_v28, %v5137_v40  ;;  %v5436_v52 = vadd.f32 %v5286_v56, %v5285_v36 }
 0x41e   : > { %v5422_v23 = vadd.f32 %v5421_v53, %v5275_v26  ;;  %v4967_v20 = vadd.bf16 %v11454_v5, %v4849_v30  ;;  %v4969_v4 = vadd.bf16 %v11457_v19, %v4851_v42  ;;  %v5288_v34 = vmul.f32 %v11486_v12, %v5138_v17 }
 0x41f   : > { %v4968_v58 = vadd.bf16 %v11460_v63, %v4850_v9  ;;  %v4970_v10 = vadd.bf16 %v11463_v50, %v4852_v49  ;;  %v4392_v18 = vpop.f32.mrb[120].mxu0  ;;  %v4778_v3 = vpop.f32.mrb[120].mxu1  ;;  %v5437_v62 = vadd.f32 %v5436_v52, %v5287_v16  ;;  %v5281_v40 = vmul.f32 %v11475_v0, %v5131_v31 }
 0x420   : > { %v5423_v37 = vadd.f32 %v5422_v23, %v5276_v13  ;;  %v11894_v1 = vmax.bf16 %v12988_v29, %v4967_v20  ;;  %v4394_v36 = vpop.f32.mrb[121].mxu0  ;;  %v4780_v46 = vpop.f32.mrb[121].mxu1  ;;  %v11900_v33 = vmax.bf16 %v12988_v29, %v4969_v4  ;;  %v5282_v24 = vmul.f32 %v11480_v6, %v5132_v14 }
 0x421   : > { %v11903_v57 = vmax.bf16 %v12988_v29, %v4968_v58  ;;  %v11906_v17 = vmax.bf16 %v12988_v29, %v4970_v10  ;;  %v4396_v25 = vpop.f32.mrb[122].mxu0  ;;  %v4782_v56 = vpop.f32.mrb[122].mxu1  ;;  %v5294_v51 = vmul.f32 %v11480_v6, %v5144_v47  ;;  %v5438_v59 = vadd.f32 %v5437_v62, %v5288_v34 }
 0x422   : > { %5424 = vadd.xlane.f32.xlu0 %v5423_v37  ;;  %v5151_v31 = vunpack.c.h.bf16 %v11894_v1  ;;  %v5134_v38 = vunpack.c.l.bf16 %v11818_v60  ;;  %v4398_v27 = vpop.f32.mrb[123].mxu0  ;;  %v4784_v26 = vpop.f32.mrb[123].mxu1  ;;  %v5147_v53 = vunpack.c.l.bf16 %v11894_v1  ;;  %v5149_v30 = vunpack.c.l.bf16 %v11900_v33 }
 0x423   : > { %v5153_v55 = vunpack.c.h.bf16 %v11900_v33  ;;  %v5283_v14 = vmul.f32 %v11483_v28, %v5133_v45  ;;  %v5148_v13 = vunpack.c.l.bf16 %v11903_v57  ;;  %v5152_v42 = vunpack.c.h.bf16 %v11903_v57  ;;  %5439 = vadd.xlane.f32.xlu1 %v5438_v59 }
 0x424   : > { %v5301_v47 = vmul.f32 %v11475_v0, %v5151_v31  ;;  %v5431_v60 = vadd.f32 %v5282_v24, %v5281_v40  ;;  %v5154_v9 = vunpack.c.h.bf16 %v11906_v17  ;;  %v4853_v49 = vpack.c.bf16 %v4396_v25, %v4392_v18 }
 0x425   : > { %v4855_v23 = vpack.c.bf16 %v4782_v56, %v4778_v3  ;;  %v4854_v20 = vpack.c.bf16 %v4398_v27, %v4394_v36  ;;  %v5284_v16 = vmul.f32 %v11486_v12, %v5134_v38  ;;  %v4856_v4 = vpack.c.bf16 %v4784_v26, %v4780_v46 }
 0x426   : > { %v5432_v52 = vadd.f32 %v5431_v60, %v5283_v14  ;;  %v5295_v48 = vmul.f32 %v11483_v28, %v5145_v15  ;;  %v4971_v45 = vadd.bf16 %v11454_v5, %v4853_v49  ;;  %v5446_v34 = vadd.f32 %v5294_v51, %v5293_v2 }
 0x427   : > { %v4973_v58 = vadd.bf16 %v11457_v19, %v4855_v23  ;;  %v4972_v10 = vadd.bf16 %v11460_v63, %v4854_v20  ;;  %v4402_v37 = vpop.f32.mrb[124].mxu0  ;;  %v4788_v62 = vpop.f32.mrb[124].mxu1  ;;  %v4974_v18 = vadd.bf16 %v11463_v50, %v4856_v4  ;;  %v5142_v3 = vunpack.c.l.bf16 %v11867_v22 }
 0x428   : > { %v5433_v40 = vadd.f32 %v5432_v52, %v5284_v16  ;;  %v5289_v36 = vmul.f32 %v11475_v0, %v5139_v7  ;;  %v4404_v46 = vpop.f32.mrb[125].mxu0  ;;  %v4790_v15 = vpop.f32.mrb[125].mxu1  ;;  %v11935_v24 = vmax.bf16 %v12988_v29, %v4971_v45  ;;  %v5447_v56 = vadd.f32 %v5446_v34, %v5295_v48 }
 0x429   : > { %v11938_v25 = vmax.bf16 %v12988_v29, %v4973_v58  ;;  %v11941_v2 = vmax.bf16 %v12988_v29, %v4972_v10  ;;  %v4406_v51 = vpop.f32.mrb[126].mxu0  ;;  %v4792_v31 = vpop.f32.mrb[126].mxu1  ;;  %v5302_v59 = vmul.f32 %v11480_v6, %v5152_v42  ;;  %v11945_v39 = vmax.bf16 %v12988_v29, %v4974_v18 }
 0x42a   : > { %5434 = vadd.xlane.f32.xlu0 %v5433_v40  ;;  %v5296_v7 = vmul.f32 %v11486_v12, %v5146_v61  ;;  %v5290_v38 = vmul.f32 %v11480_v6, %v5140_v11  ;;  %v4408_v27 = vpop.f32.mrb[127].mxu0  ;;  %v4794_v26 = vpop.f32.mrb[127].mxu1  ;;  %v5155_v14 = vunpack.c.l.bf16 %v11935_v24  ;;  %v5159_v60 = vunpack.c.h.bf16 %v11935_v24 }
 0x42b   : > { %v5291_v42 = vmul.f32 %v11483_v28, %v5141_v44  ;;  %v5292_v49 = vmul.f32 %v11486_v12, %v5142_v3  ;;  %v5157_v22 = vunpack.c.l.bf16 %v11938_v25  ;;  %v5161_v61 = vunpack.c.h.bf16 %v11938_v25 }
 0x42c   : > { %v5160_v32 = vunpack.c.h.bf16 %v11941_v2  ;;  %v5448_v23 = vadd.f32 %v5447_v56, %v5296_v7  ;;  %v5309_v11 = vmul.f32 %v11475_v0, %v5159_v60  ;;  %v5441_v20 = vadd.f32 %v5290_v38, %v5289_v36 }
 0x42d   : > { %v4857_v16 = vpack.c.bf16 %v4406_v51, %v4402_v37  ;;  %v4859_v52 = vpack.c.bf16 %v4792_v31, %v4788_v62  ;;  %v4858_v43 = vpack.c.bf16 %v4408_v27, %v4404_v46  ;;  %v4860_v48 = vpack.c.bf16 %v4794_v26, %v4790_v15 }
 0x42e   : > { %v5310_v4 = vmul.f32 %v11480_v6, %v5160_v32  ;;  %5449 = vadd.xlane.f32.xlu1 %v5448_v23  ;;  %v5303_v44 = vmul.f32 %v11483_v28, %v5153_v55  ;;  %v5442_v45 = vadd.f32 %v5441_v20, %v5291_v42  ;;  %v5304_v34 = vmul.f32 %v11486_v12, %v5154_v9 }
 0x42f   : > { %v4975_v58 = vadd.bf16 %v11454_v5, %v4857_v16  ;;  %v4977_v10 = vadd.bf16 %v11457_v19, %v4859_v52  ;;  %v4976_v40 = vadd.bf16 %v11460_v63, %v4858_v43  ;;  %v4978_v18 = vadd.bf16 %v11463_v50, %v4860_v48 }
 0x430   : > { %v5456_v37 = vadd.f32 %v5302_v59, %v5301_v47  ;;  %v5150_v62 = vunpack.c.l.bf16 %v11906_v17  ;;  %v5443_v3 = vadd.f32 %v5442_v45, %v5292_v49  ;;  %v5297_v5 = vmul.f32 %v11475_v0, %v5147_v53 }
 0x431   : > { %v5039_v36 = vmax.bf16 %v12988_v29, %v4975_v58  ;;  %v5041_v46 = vmax.bf16 %v12988_v29, %v4977_v10  ;;  %v5040_v19 = vmax.bf16 %v12988_v29, %v4976_v40  ;;  %v5042_v55 = vmax.bf16 %v12988_v29, %v4978_v18 }
 0x432   : > { %v5457_v9 = vadd.f32 %v5456_v37, %v5303_v44  ;;  %v5298_v63 = vmul.f32 %v11480_v6, %v5148_v13  ;;  %v5156_v50 = vunpack.c.l.bf16 %v11941_v2  ;;  %v5162_v17 = vunpack.c.h.bf16 %v11945_v39  ;;  %5444 = vadd.xlane.f32.xlu0 %v5443_v3 }
 0x433   : > { %v5163_v47 = vunpack.c.l.bf16 %v5039_v36  ;;  %v5167_v15 = vunpack.c.h.bf16 %v5039_v36  ;;  %v5169_v24 = vunpack.c.h.bf16 %v5041_v46  ;;  %v5164_v1 = vunpack.c.l.bf16 %v5040_v19  ;;  %v13062_v36 = vld [vmem:[#allocation17_spill] sm:$0xff] }
 0x434   : > { %v5168_v25 = vunpack.c.h.bf16 %v5040_v19  ;;  %v5458_v53 = vadd.f32 %v5457_v9, %v5304_v34  ;;  %v5170_v51 = vunpack.c.h.bf16 %v5042_v55  ;;  %v5299_v29 = vmul.f32 %v11483_v28, %v5149_v30 }
 0x435   : > { %v5317_v56 = vmul.f32 %v11475_v0, %v5167_v15  ;;  %v5451_v57 = vadd.f32 %v5298_v63, %v5297_v5  ;;  %v5300_v2 = vmul.f32 %v11486_v12, %v5150_v62  ;;  %v5311_v31 = vmul.f32 %v11483_v28, %v5161_v61  ;;  %v13063_v5 = vld [vmem:[#allocation15_spill] sm:$0xff]  ;;  %v13065_v63 = vld [vmem:[#allocation16_spill] sm:$0xff] }
 0x436   : > { %v5318_v13 = vmul.f32 %v11480_v6, %v5168_v25  ;;  %5459 = vadd.xlane.f32.xlu1 %v5458_v53  ;;  %v5466_v59 = vadd.f32 %v5310_v4, %v5309_v11  ;;  %v5158_v38 = vunpack.c.l.bf16 %v11945_v39  ;;  %v5305_v27 = vmul.f32 %v11475_v0, %v5155_v14 }
 0x437   : > { %v5452_v7 = vadd.f32 %v5451_v57, %v5299_v29  ;;  %v5306_v26 = vmul.f32 %v11480_v6, %v5156_v50  ;;  %v5165_v60 = vunpack.c.l.bf16 %v5041_v46  ;;  %v5312_v33 = vmul.f32 %v11486_v12, %v5162_v17 }
 0x438   : > { %v5467_v30 = vadd.f32 %v5466_v59, %v5311_v31  ;;  %v5307_v42 = vmul.f32 %v11483_v28, %v5157_v22  ;;  %v5319_v23 = vmul.f32 %v11483_v28, %v5169_v24  ;;  %v5476_v20 = vadd.f32 %v5318_v13, %v5317_v56 }
 0x439   : > { %v5453_v49 = vadd.f32 %v5452_v7, %v5300_v2  ;;  %v5461_v32 = vadd.f32 %v5306_v26, %v5305_v27  ;;  %v5166_v11 = vunpack.c.l.bf16 %v5042_v55  ;;  %v5313_v16 = vmul.f32 %v11475_v0, %v5163_v47  ;;  %v13064_v55 = vld [vmem:[#allocation18_spill] sm:$0xff] }
 0x43a   : > { %v5468_v61 = vadd.f32 %v5467_v30, %v5312_v33  ;;  %v5314_v39 = vmul.f32 %v11480_v6, %v5164_v1  ;;  %v5308_v14 = vmul.f32 %v11486_v12, %v5158_v38  ;;  %v5320_v4 = vmul.f32 %v11486_v12, %v5170_v51 }
 0x43b   : > { %5454 = vadd.xlane.f32.xlu0 %v5453_v49  ;;  %v5462_v52 = vadd.f32 %v5461_v32, %v5307_v42  ;;  %v5477_v43 = vadd.f32 %v5476_v20, %v5319_v23  ;;  %v5315_v22 = vmul.f32 %v11483_v28, %v5165_v60  ;;  %v5316_v58 = vmul.f32 %v11486_v12, %v5166_v11 }
 0x43c   : > { %5469 = vadd.xlane.f32.xlu1 %v5468_v61  ;;  %v5471_v48 = vadd.f32 %v5314_v39, %v5313_v16  ;;  %v12002_v6 = vstv %s5481_s29 }
 0x43d   : > { %v5463_v44 = vadd.f32 %v5462_v52, %v5308_v14  ;;  %v5478_v45 = vadd.f32 %v5477_v43, %v5320_v4 }
 0x43e   : > { %v5472_v10 = vadd.f32 %v5471_v48, %v5315_v22 }
 0x43f   : > { %5464 = vadd.xlane.f32.xlu0 %v5463_v44 }
 0x440   : > { %5479 = vadd.xlane.f32.xlu1 %v5478_v45  ;;  %v5473_v0 = vadd.f32 %v5472_v10, %v5316_v58 }
 0x443   : > { %5474 = vadd.xlane.f32.xlu0 %v5473_v0 }
 0x450   : > { %v5330_v34 = vpop.xlane.xlu0 %5329 }
 0x451   : > { %v5484_v40 = vadd.f32 %v12002_v6, %v5330_v34  ;;  %v5325_v18 = vpop.xlane.xlu1 %5324 }
 0x452   : > { %v5483_v37 = vadd.f32 %v12002_v6, %v5325_v18 }
 0x453   : > { %v5582_v28 = vrot.slane %v5484_v40, %v12987_v35  ;;  %v5586_v62 = vrot.slane %v5484_v40, %v13059_v54  ;;  %v5590_v12 = vrot.slane %v5484_v40, %v13060_v8  ;;  %v5594_v3 = vrot.slane %v5484_v40, %v13061_v41 }
 0x454   : > { %v5598_v46 = vrot.slane %v5484_v40, %v13062_v36  ;;  %v5602_v19 = vrot.slane %v5484_v40, %v13063_v5  ;;  %v5606_v9 = vrot.slane %v5484_v40, %v13064_v55  ;;  %v5610_v50 = vrot.slane %v5484_v40, %v13065_v63 }
 0x455   : > { %v6620_v17 = vcombine.low %v5582_v28, %v5586_v62  ;;  %v5550_v47 = vrot.slane %v5483_v37, %v12987_v35  ;;  %v5554_v15 = vrot.slane %v5483_v37, %v13059_v54  ;;  %v6621_v24 = vcombine.low %v5590_v12, %v5594_v3 }
 0x456   : > { %v6622_v1 = vcombine.low %v5598_v46, %v5602_v19  ;;  %v5558_v25 = vrot.slane %v5483_v37, %v13060_v8  ;;  %v5562_v53 = vrot.slane %v5483_v37, %v13061_v41  ;;  %v6623_v56 = vcombine.low %v5606_v9, %v5610_v50 }
 0x457   : > { %v6630_v51 = vrot.slane %v6620_v17, %v13058_v21  ;;  %v5566_v29 = vrot.slane %v5483_v37, %v13062_v36  ;;  %v5570_v57 = vrot.slane %v5483_v37, %v13063_v5  ;;  %v6637_v2 = vrot.slane %v6621_v24, %v13058_v21 }
 0x458   : > { %v5340_v13 = vpop.xlane.xlu1 %5339  ;;  %v6644_v31 = vrot.slane %v6622_v1, %v13058_v21  ;;  %v5574_v59 = vrot.slane %v5483_v37, %v13064_v55  ;;  %v5578_v7 = vrot.slane %v5483_v37, %v13065_v63  ;;  %v6651_v27 = vrot.slane %v6623_v56, %v13058_v21 }
 0x459   : > { %v5486_v38 = vadd.f32 %v12002_v6, %v5340_v13  ;;  %v6571_v26 = vcombine.low %v5550_v47, %v5554_v15  ;;  %v6572_v60 = vcombine.low %v5558_v25, %v5562_v53  ;;  %v6652_v33 = vcombine.low %v6630_v51, %v6637_v2 }
 0x45a   : > { %v6573_v30 = vcombine.low %v5566_v29, %v5570_v57  ;;  %v6574_v42 = vcombine.low %v5574_v59, %v5578_v7  ;;  %v6653_v49 = vcombine.low %v6644_v31, %v6651_v27 }
 0x45b   : > { %v6581_v32 = vrot.slane %v6571_v26, %v13058_v21  ;;  %v6588_v23 = vrot.slane %v6572_v60, %v13058_v21  ;;  %v5646_v20 = vrot.slane %v5486_v38, %v12987_v35  ;;  %v6660_v61 = vrot.slane %v6652_v33, %v13058_v21 }
 0x45c   : > { %v6595_v11 = vrot.slane %v6573_v30, %v13058_v21  ;;  %v6602_v16 = vrot.slane %v6574_v42, %v13058_v21  ;;  %v5650_v39 = vrot.slane %v5486_v38, %v13059_v54  ;;  %v6667_v52 = vrot.slane %v6653_v49, %v13058_v21 }
 0x45d   : > { %v5335_v14 = vpop.xlane.xlu0 %5334  ;;  %v6603_v4 = vcombine.low %v6581_v32, %v6588_v23  ;;  %v5654_v43 = vrot.slane %v5486_v38, %v13060_v8  ;;  %v5658_v22 = vrot.slane %v5486_v38, %v13061_v41  ;;  %v5662_v45 = vrot.slane %v5486_v38, %v13062_v36 }
 0x45e   : > { %v5485_v48 = vadd.f32 %v12002_v6, %v5335_v14  ;;  %v6604_v44 = vcombine.low %v6595_v11, %v6602_v16  ;;  %v5666_v58 = vrot.slane %v5486_v38, %v13063_v5  ;;  %v6668_v10 = vcombine.low %v6660_v61, %v6667_v52 }
 0x45f   : > { %v6611_v0 = vrot.slane %v6603_v4, %v13058_v21  ;;  %v5670_v34 = vrot.slane %v5486_v38, %v13064_v55  ;;  %v5674_v40 = vrot.slane %v5486_v38, %v13065_v63  ;;  %v6718_v25 = vcombine.low %v5646_v20, %v5650_v39 }
 0x460   : > { %v6618_v18 = vrot.slane %v6604_v44, %v13058_v21  ;;  %v5350_v37 = vpop.xlane.xlu1 %5349  ;;  %v5614_v28 = vrot.slane %v5485_v48, %v12987_v35  ;;  %v5618_v62 = vrot.slane %v5485_v48, %v13059_v54  ;;  %v5622_v12 = vrot.slane %v5485_v48, %v13060_v8  ;;  %8143 = vperm.xlu1 %9100, %v6668_v10  }
 0x461   : > { %v12048_v3 = vadd.f32 %v12002_v6, %v5350_v37  ;;  %v5626_v46 = vrot.slane %v5485_v48, %v13061_v41  ;;  %v5630_v19 = vrot.slane %v5485_v48, %v13062_v36  ;;  %v5634_v9 = vrot.slane %v5485_v48, %v13063_v5 }
 0x462   : > { %v6619_v50 = vcombine.low %v6611_v0, %v6618_v18  ;;  %v5638_v17 = vrot.slane %v5485_v48, %v13064_v55  ;;  %v5642_v47 = vrot.slane %v5485_v48, %v13065_v63  ;;  %v6669_v15 = vcombine.low %v5614_v28, %v5618_v62 }
 0x463   : > { %v6670_v24 = vcombine.low %v5622_v12, %v5626_v46  ;;  %v6671_v1 = vcombine.low %v5630_v19, %v5634_v9  ;;  %v6719_v53 = vcombine.low %v5654_v43, %v5658_v22  ;;  %v6720_v29 = vcombine.low %v5662_v45, %v5666_v58 }
 0x464   : > { %8140 = vperm.xlu0 %9099, %v6619_v50   ;;  %v6672_v56 = vcombine.low %v5638_v17, %v5642_v47  ;;  %v6679_v51 = vrot.slane %v6669_v15, %v13058_v21  ;;  %v6721_v57 = vcombine.low %v5670_v34, %v5674_v40  ;;  %v6728_v31 = vrot.slane %v6718_v25, %v13058_v21 }
 0x465   : > { %v6686_v13 = vrot.slane %v6670_v24, %v13058_v21  ;;  %v6693_v2 = vrot.slane %v6671_v1, %v13058_v21  ;;  %v6735_v59 = vrot.slane %v6719_v53, %v13058_v21  ;;  %v5345_v7 = vpop.xlane.xlu0 %5344  ;;  %v6742_v27 = vrot.slane %v6720_v29, %v13058_v21 }
 0x466   : > { %v6700_v38 = vrot.slane %v6672_v56, %v13058_v21  ;;  %v6749_v26 = vrot.slane %v6721_v57, %v13058_v21  ;;  %v5710_v60 = vrot.slane %v12048_v3, %v12987_v35  ;;  %v5487_v33 = vadd.f32 %v12002_v6, %v5345_v7 }
 0x467   : > { %v6701_v30 = vcombine.low %v6679_v51, %v6686_v13  ;;  %v6750_v42 = vcombine.low %v6728_v31, %v6735_v59  ;;  %v5714_v49 = vrot.slane %v12048_v3, %v13059_v54  ;;  %v5718_v20 = vrot.slane %v12048_v3, %v13060_v8 }
 0x468   : > { %v6702_v32 = vcombine.low %v6693_v2, %v6700_v38  ;;  %v6751_v23 = vcombine.low %v6742_v27, %v6749_v26  ;;  %v5722_v61 = vrot.slane %v12048_v3, %v13061_v41  ;;  %v5678_v39 = vrot.slane %v5487_v33, %v12987_v35 }
 0x469   : > { %v6709_v11 = vrot.slane %v6701_v30, %v13058_v21  ;;  %v6758_v16 = vrot.slane %v6750_v42, %v13058_v21  ;;  %v5682_v14 = vrot.slane %v5487_v33, %v13059_v54  ;;  %v5360_v4 = vpop.xlane.xlu1 %5359  ;;  %v5686_v22 = vrot.slane %v5487_v33, %v13060_v8 }
 0x46a   : > { %v6716_v52 = vrot.slane %v6702_v32, %v13058_v21  ;;  %v6765_v43 = vrot.slane %v6751_v23, %v13058_v21  ;;  %v5690_v48 = vrot.slane %v5487_v33, %v13061_v41  ;;  %v12081_v44 = vadd.f32 %v12002_v6, %v5360_v4 }
 0x46b   : > { %v5694_v45 = vrot.slane %v5487_v33, %v13062_v36  ;;  %v5698_v58 = vrot.slane %v5487_v33, %v13063_v5  ;;  %v5702_v10 = vrot.slane %v5487_v33, %v13064_v55  ;;  %v5706_v40 = vrot.slane %v5487_v33, %v13065_v63 }
 0x46c   : > { %v6717_v0 = vcombine.low %v6709_v11, %v6716_v52  ;;  %v6766_v34 = vcombine.low %v6758_v16, %v6765_v43  ;;  %v6767_v18 = vcombine.low %v5678_v39, %v5682_v14  ;;  %v6768_v37 = vcombine.low %v5686_v22, %v5690_v48 }
 0x46d   : > { %v6769_v28 = vcombine.low %v5694_v45, %v5698_v58  ;;  %v5726_v62 = vrot.slane %v12048_v3, %v13062_v36  ;;  %v5730_v12 = vrot.slane %v12048_v3, %v13063_v5  ;;  %v6770_v46 = vcombine.low %v5702_v10, %v5706_v40 }
 0x46e   : > { %8146 = vperm.xlu1 %9100, %v6717_v0   ;;  %v6777_v19 = vrot.slane %v6767_v18, %v13058_v21  ;;  %v5734_v9 = vrot.slane %v12048_v3, %v13064_v55  ;;  %v5738_v50 = vrot.slane %v12048_v3, %v13065_v63  ;;  %v6784_v17 = vrot.slane %v6768_v37, %v13058_v21 }
 0x46f   : > { %v6791_v47 = vrot.slane %v6769_v28, %v13058_v21  ;;  %v6816_v15 = vcombine.low %v5710_v60, %v5714_v49  ;;  %v6817_v24 = vcombine.low %v5718_v20, %v5722_v61  ;;  %v5355_v1 = vpop.xlane.xlu0 %5354  ;;  %v6798_v25 = vrot.slane %v6770_v46, %v13058_v21 }
 0x470   : > { %v6818_v53 = vcombine.low %v5726_v62, %v5730_v12  ;;  %v6819_v56 = vcombine.low %v5734_v9, %v5738_v50  ;;  %v5774_v51 = vrot.slane %v12081_v44, %v12987_v35  ;;  %v5489_v29 = vadd.f32 %v12002_v6, %v5355_v1 }
 0x471   : > { %v6799_v57 = vcombine.low %v6777_v19, %v6784_v17  ;;  %v6826_v13 = vrot.slane %v6816_v15, %v13058_v21  ;;  %v6833_v3 = vrot.slane %v6817_v24, %v13058_v21  ;;  %v6800_v2 = vcombine.low %v6791_v47, %v6798_v25 }
 0x472   : > { %8149 = vperm.xlu1 %9100, %v6766_v34   ;;  %v5370_v31 = vpop.xlane.xlu1 %5369  ;;  %v6840_v59 = vrot.slane %v6818_v53, %v13058_v21  ;;  %v6847_v7 = vrot.slane %v6819_v56, %v13058_v21  ;;  %v5778_v38 = vrot.slane %v12081_v44, %v13059_v54  ;;  %v5742_v33 = vrot.slane %v5489_v29, %v12987_v35 }
 0x473   : > { %v6807_v27 = vrot.slane %v6799_v57, %v13058_v21  ;;  %v12110_v26 = vadd.f32 %v12002_v6, %v5370_v31  ;;  %v6848_v60 = vcombine.low %v6826_v13, %v6833_v3  ;;  %v6814_v30 = vrot.slane %v6800_v2, %v13058_v21 }
 0x474   : > { %v6849_v42 = vcombine.low %v6840_v59, %v6847_v7  ;;  %v5746_v49 = vrot.slane %v5489_v29, %v13059_v54  ;;  %v5750_v32 = vrot.slane %v5489_v29, %v13060_v8  ;;  %v5754_v20 = vrot.slane %v5489_v29, %v13061_v41 }
 0x475   : > { %v6856_v23 = vrot.slane %v6848_v60, %v13058_v21  ;;  %v5758_v61 = vrot.slane %v5489_v29, %v13062_v36  ;;  %v5762_v11 = vrot.slane %v5489_v29, %v13063_v5  ;;  %v6815_v16 = vcombine.low %v6807_v27, %v6814_v30 }
 0x476   : > { %v6863_v39 = vrot.slane %v6849_v42, %v13058_v21  ;;  %v5766_v14 = vrot.slane %v5489_v29, %v13064_v55  ;;  %v5770_v52 = vrot.slane %v5489_v29, %v13065_v63  ;;  %v6865_v4 = vcombine.low %v5742_v33, %v5746_v49 }
 0x477   : > { %v6866_v43 = vcombine.low %v5750_v32, %v5754_v20  ;;  %v6867_v22 = vcombine.low %v5758_v61, %v5762_v11  ;;  %v5782_v48 = vrot.slane %v12081_v44, %v13060_v8  ;;  %8152 = vperm.xlu1 %9100, %v6815_v16   ;;  %v5786_v0 = vrot.slane %v12081_v44, %v13061_v41 }
 0x478   : > { %v5365_v45 = vpop.xlane.xlu0 %5364  ;;  %v6864_v58 = vcombine.low %v6856_v23, %v6863_v39  ;;  %v6868_v10 = vcombine.low %v5766_v14, %v5770_v52  ;;  %v5790_v34 = vrot.slane %v12081_v44, %v13062_v36  ;;  %v6875_v18 = vrot.slane %v6865_v4, %v13058_v21 }
 0x479   : > { %v5491_v40 = vadd.f32 %v12002_v6, %v5365_v45  ;;  %v6882_v37 = vrot.slane %v6866_v43, %v13058_v21  ;;  %v6889_v28 = vrot.slane %v6867_v22, %v13058_v21  ;;  %v5794_v12 = vrot.slane %v12081_v44, %v13063_v5 }
 0x47a   : > { %v6896_v62 = vrot.slane %v6868_v10, %v13058_v21  ;;  %v5798_v46 = vrot.slane %v12081_v44, %v13064_v55  ;;  %v5802_v19 = vrot.slane %v12081_v44, %v13065_v63  ;;  %v6914_v50 = vcombine.low %v5774_v51, %v5778_v38 }
 0x47b   : > { %v6897_v9 = vcombine.low %v6875_v18, %v6882_v37  ;;  %v6915_v17 = vcombine.low %v5782_v48, %v5786_v0  ;;  %v5806_v47 = vrot.slane %v5491_v40, %v12987_v35  ;;  %8155 = vperm.xlu1 %9100, %v6864_v58   ;;  %v6916_v24 = vcombine.low %v5790_v34, %v5794_v12 }
 0x47c   : > { %v6898_v15 = vcombine.low %v6889_v28, %v6896_v62  ;;  %v6917_v1 = vcombine.low %v5798_v46, %v5802_v19  ;;  %v5810_v25 = vrot.slane %v5491_v40, %v13059_v54  ;;  %v5380_v56 = vpop.xlane.xlu1 %5379  ;;  %v6924_v29 = vrot.slane %v6914_v50, %v13058_v21 }
 0x47d   : > { %v6905_v53 = vrot.slane %v6897_v9, %v13058_v21  ;;  %v6931_v57 = vrot.slane %v6915_v17, %v13058_v21  ;;  %v5814_v44 = vrot.slane %v5491_v40, %v13060_v8  ;;  %v12148_v13 = vadd.f32 %v12002_v6, %v5380_v56 }
 0x47e   : > { %v6912_v51 = vrot.slane %v6898_v15, %v13058_v21  ;;  %v6938_v3 = vrot.slane %v6916_v24, %v13058_v21  ;;  %v6945_v2 = vrot.slane %v6917_v1, %v13058_v21  ;;  %v5818_v59 = vrot.slane %v5491_v40, %v13061_v41 }
 0x47f   : > { %v6946_v31 = vcombine.low %v6924_v29, %v6931_v57  ;;  %v5822_v7 = vrot.slane %v5491_v40, %v13062_v36  ;;  %v5826_v38 = vrot.slane %v5491_v40, %v13063_v5  ;;  %v5830_v30 = vrot.slane %v5491_v40, %v13064_v55 }
 0x480   : > { %v6913_v27 = vcombine.low %v6905_v53, %v6912_v51  ;;  %v5375_v60 = vpop.xlane.xlu0 %5374  ;;  %v6947_v33 = vcombine.low %v6938_v3, %v6945_v2  ;;  %v5834_v42 = vrot.slane %v5491_v40, %v13065_v63  ;;  %v6963_v23 = vcombine.low %v5806_v47, %v5810_v25 }
 0x481   : > { %v5493_v49 = vadd.f32 %v12002_v6, %v5375_v60  ;;  %v6954_v32 = vrot.slane %v6946_v31, %v13058_v21  ;;  %v6964_v20 = vcombine.low %v5814_v44, %v5818_v59  ;;  %v6965_v11 = vcombine.low %v5822_v7, %v5826_v38 }
 0x482   : > { %8158 = vperm.xlu1 %9100, %v6913_v27   ;;  %v6961_v61 = vrot.slane %v6947_v33, %v13058_v21  ;;  %v6966_v16 = vcombine.low %v5830_v30, %v5834_v42  ;;  %v5838_v39 = vrot.slane %v12110_v26, %v12987_v35  ;;  %v6973_v14 = vrot.slane %v6963_v23, %v13058_v21 }
 0x483   : > { %v6980_v52 = vrot.slane %v6964_v20, %v13058_v21  ;;  %v5842_v4 = vrot.slane %v12110_v26, %v13059_v54  ;;  %v5846_v43 = vrot.slane %v12110_v26, %v13060_v8  ;;  %v6987_v48 = vrot.slane %v6965_v11, %v13058_v21 }
 0x484   : > { %v6962_v22 = vcombine.low %v6954_v32, %v6961_v61  ;;  %v6994_v45 = vrot.slane %v6966_v16, %v13058_v21  ;;  %v5850_v58 = vrot.slane %v12110_v26, %v13061_v41  ;;  %v5854_v0 = vrot.slane %v12110_v26, %v13062_v36 }
 0x485   : > { %v6995_v10 = vcombine.low %v6973_v14, %v6980_v52  ;;  %v5858_v34 = vrot.slane %v12110_v26, %v13063_v5  ;;  %v5862_v40 = vrot.slane %v12110_v26, %v13064_v55  ;;  %v5866_v37 = vrot.slane %v12110_v26, %v13065_v63 }
 0x486   : > { %8161 = vperm.xlu1 %9100, %v6962_v22   ;;  %v6996_v18 = vcombine.low %v6987_v48, %v6994_v45  ;;  %v7012_v28 = vcombine.low %v5838_v39, %v5842_v4  ;;  %v7013_v62 = vcombine.low %v5846_v43, %v5850_v58  ;;  %v5390_v12 = vpop.xlane.xlu1 %5389  ;;  %v5870_v50 = vrot.slane %v5493_v49, %v12987_v35 }
 0x487   : > { %v7003_v46 = vrot.slane %v6995_v10, %v13058_v21  ;;  %v7014_v19 = vcombine.low %v5854_v0, %v5858_v34  ;;  %v12182_v9 = vadd.f32 %v12002_v6, %v5390_v12  ;;  %v7015_v47 = vcombine.low %v5862_v40, %v5866_v37 }
 0x488   : > { %v7010_v17 = vrot.slane %v6996_v18, %v13058_v21  ;;  %v7022_v15 = vrot.slane %v7012_v28, %v13058_v21  ;;  %v7029_v24 = vrot.slane %v7013_v62, %v13058_v21  ;;  %v5874_v1 = vrot.slane %v5493_v49, %v13059_v54 }
 0x489   : > { %v7036_v26 = vrot.slane %v7014_v19, %v13058_v21  ;;  %v5878_v25 = vrot.slane %v5493_v49, %v13060_v8  ;;  %v5882_v53 = vrot.slane %v5493_v49, %v13061_v41  ;;  %v7043_v29 = vrot.slane %v7015_v47, %v13058_v21 }
 0x48a   : > { %v7011_v56 = vcombine.low %v7003_v46, %v7010_v17  ;;  %v7044_v57 = vcombine.low %v7022_v15, %v7029_v24  ;;  %v5385_v44 = vpop.xlane.xlu0 %5384  ;;  %v5886_v51 = vrot.slane %v5493_v49, %v13062_v36  ;;  %v5890_v2 = vrot.slane %v5493_v49, %v13063_v5 }
 0x48b   : > { %v5495_v3 = vadd.f32 %v12002_v6, %v5385_v44  ;;  %v5894_v31 = vrot.slane %v5493_v49, %v13064_v55  ;;  %v5898_v59 = vrot.slane %v5493_v49, %v13065_v63  ;;  %v7045_v7 = vcombine.low %v7036_v26, %v7043_v29 }
 0x48c   : > { %8164 = vperm.xlu1 %9100, %v7011_v56   ;;  %v7052_v38 = vrot.slane %v7044_v57, %v13058_v21  ;;  %v7061_v27 = vcombine.low %v5870_v50, %v5874_v1  ;;  %v7062_v60 = vcombine.low %v5878_v25, %v5882_v53  ;;  %v7063_v33 = vcombine.low %v5886_v51, %v5890_v2 }
 0x48d   : > { %v7064_v30 = vcombine.low %v5894_v31, %v5898_v59  ;;  %v5902_v42 = vrot.slane %v12148_v13, %v12987_v35  ;;  %v5906_v32 = vrot.slane %v12148_v13, %v13059_v54  ;;  %v7059_v23 = vrot.slane %v7045_v7, %v13058_v21 }
 0x48e   : > { %v7071_v20 = vrot.slane %v7061_v27, %v13058_v21  ;;  %v7078_v49 = vrot.slane %v7062_v60, %v13058_v21  ;;  %v5910_v61 = vrot.slane %v12148_v13, %v13060_v8  ;;  %v7085_v11 = vrot.slane %v7063_v33, %v13058_v21 }
 0x48f   : > { %v7092_v16 = vrot.slane %v7064_v30, %v13058_v21  ;;  %v5914_v39 = vrot.slane %v12148_v13, %v13061_v41  ;;  %v5918_v14 = vrot.slane %v12148_v13, %v13062_v36  ;;  %v7060_v52 = vcombine.low %v7052_v38, %v7059_v23 }
 0x490   : > { %v7093_v4 = vcombine.low %v7071_v20, %v7078_v49  ;;  %v5400_v43 = vpop.xlane.xlu1 %5399  ;;  %v5922_v22 = vrot.slane %v12148_v13, %v13063_v5  ;;  %v5926_v48 = vrot.slane %v12148_v13, %v13064_v55  ;;  %v5930_v10 = vrot.slane %v12148_v13, %v13065_v63 }
 0x491   : > { %v7094_v45 = vcombine.low %v7085_v11, %v7092_v16  ;;  %v12219_v58 = vadd.f32 %v12002_v6, %v5400_v43  ;;  %v7110_v0 = vcombine.low %v5902_v42, %v5906_v32  ;;  %8167 = vperm.xlu0 %9099, %v7060_v52   ;;  %v7111_v18 = vcombine.low %v5910_v61, %v5914_v39 }
 0x492   : > { %v7101_v34 = vrot.slane %v7093_v4, %v13058_v21  ;;  %v5395_v40 = vpop.xlane.xlu0 %5394  ;;  %v7112_v37 = vcombine.low %v5918_v14, %v5922_v22  ;;  %v5934_v28 = vrot.slane %v5495_v3, %v12987_v35  ;;  %v7113_v46 = vcombine.low %v5926_v48, %v5930_v10 }
 0x493   : > { %v7108_v62 = vrot.slane %v7094_v45, %v13058_v21  ;;  %v12227_v12 = vadd.f32 %v12002_v6, %v5395_v40  ;;  %v7120_v19 = vrot.slane %v7110_v0, %v13058_v21  ;;  %v7127_v50 = vrot.slane %v7111_v18, %v13058_v21 }
 0x494   : > { %v7134_v13 = vrot.slane %v7112_v37, %v13058_v21  ;;  %v5938_v17 = vrot.slane %v5495_v3, %v13059_v54  ;;  %v5942_v47 = vrot.slane %v5495_v3, %v13060_v8  ;;  %v7141_v24 = vrot.slane %v7113_v46, %v13058_v21 }
 0x495   : > { %v7109_v15 = vcombine.low %v7101_v34, %v7108_v62  ;;  %v5946_v26 = vrot.slane %v5495_v3, %v13061_v41  ;;  %v5950_v1 = vrot.slane %v5495_v3, %v13062_v36  ;;  %v7142_v25 = vcombine.low %v7120_v19, %v7127_v50 }
 0x496   : > { %v5954_v53 = vrot.slane %v5495_v3, %v13063_v5  ;;  %v5958_v56 = vrot.slane %v5495_v3, %v13064_v55  ;;  %v5962_v29 = vrot.slane %v5495_v3, %v13065_v63  ;;  %v7143_v57 = vcombine.low %v7134_v13, %v7141_v24 }
 0x497   : > { %8170 = vperm.xlu1 %9100, %v7109_v15   ;;  %v7159_v44 = vcombine.low %v5934_v28, %v5938_v17  ;;  %v7160_v51 = vcombine.low %v5942_v47, %v5946_v26  ;;  %v5966_v2 = vrot.slane %v12182_v9, %v12987_v35  ;;  %v7150_v31 = vrot.slane %v7142_v25, %v13058_v21 }
 0x498   : > { %v7161_v59 = vcombine.low %v5950_v1, %v5954_v53  ;;  %v7162_v7 = vcombine.low %v5958_v56, %v5962_v29  ;;  %v5410_v38 = vpop.xlane.xlu1 %5409  ;;  %v5970_v27 = vrot.slane %v12182_v9, %v13059_v54  ;;  %v7157_v60 = vrot.slane %v7143_v57, %v13058_v21 }
 0x499   : > { %v7169_v33 = vrot.slane %v7159_v44, %v13058_v21  ;;  %v7176_v3 = vrot.slane %v7160_v51, %v13058_v21  ;;  %v12249_v30 = vadd.f32 %v12002_v6, %v5410_v38  ;;  %v5974_v23 = vrot.slane %v12182_v9, %v13060_v8 }
 0x49a   : > { %v7183_v42 = vrot.slane %v7161_v59, %v13058_v21  ;;  %v7190_v32 = vrot.slane %v7162_v7, %v13058_v21  ;;  %v5978_v20 = vrot.slane %v12182_v9, %v13061_v41  ;;  %v7158_v49 = vcombine.low %v7150_v31, %v7157_v60 }
 0x49b   : > { %v7191_v61 = vcombine.low %v7169_v33, %v7176_v3  ;;  %v5982_v11 = vrot.slane %v12182_v9, %v13062_v36  ;;  %v5986_v16 = vrot.slane %v12182_v9, %v13063_v5  ;;  %v5990_v14 = vrot.slane %v12182_v9, %v13064_v55 }
 0x49c   : > { %v7192_v39 = vcombine.low %v7183_v42, %v7190_v32  ;;  %v5994_v52 = vrot.slane %v12182_v9, %v13065_v63  ;;  %v7208_v4 = vcombine.low %v5966_v2, %v5970_v27  ;;  %8173 = vperm.xlu1 %9100, %v7158_v49   ;;  %v7209_v48 = vcombine.low %v5974_v23, %v5978_v20 }
 0x49d   : > { %v7199_v43 = vrot.slane %v7191_v61, %v13058_v21  ;;  %v5405_v22 = vpop.xlane.xlu0 %5404  ;;  %v7210_v45 = vcombine.low %v5982_v11, %v5986_v16  ;;  %v6094_v10 = vrot.slane %v12249_v30, %v12987_v35  ;;  %v6098_v28 = vrot.slane %v12249_v30, %v13059_v54 }
 0x49e   : > { %v7206_v0 = vrot.slane %v7192_v39, %v13058_v21  ;;  %v5499_v34 = vadd.f32 %v12002_v6, %v5405_v22  ;;  %v7211_v40 = vcombine.low %v5990_v14, %v5994_v52  ;;  %v7218_v18 = vrot.slane %v7208_v4, %v13058_v21 }
 0x49f   : > { %v7225_v37 = vrot.slane %v7209_v48, %v13058_v21  ;;  %v7232_v9 = vrot.slane %v7210_v45, %v13058_v21  ;;  %v6102_v62 = vrot.slane %v12249_v30, %v13060_v8  ;;  %v6106_v51 = vrot.slane %v12249_v30, %v13061_v41 }
 0x4a0   : > { %v7207_v46 = vcombine.low %v7199_v43, %v7206_v0  ;;  %v7239_v19 = vrot.slane %v7211_v40, %v13058_v21  ;;  %v6062_v50 = vrot.slane %v5499_v34, %v12987_v35  ;;  %v6066_v13 = vrot.slane %v5499_v34, %v13059_v54 }
 0x4a1   : > { %v7240_v17 = vcombine.low %v7218_v18, %v7225_v37  ;;  %v6070_v47 = vrot.slane %v5499_v34, %v13060_v8  ;;  %v6074_v15 = vrot.slane %v5499_v34, %v13061_v41  ;;  %v6078_v24 = vrot.slane %v5499_v34, %v13062_v36 }
 0x4a2   : > { %8176 = vperm.xlu1 %9100, %v7207_v46   ;;  %v7241_v26 = vcombine.low %v7232_v9, %v7239_v19  ;;  %v6082_v1 = vrot.slane %v5499_v34, %v13063_v5  ;;  %v6086_v25 = vrot.slane %v5499_v34, %v13064_v55  ;;  %v6090_v53 = vrot.slane %v5499_v34, %v13065_v63 }
 0x4a3   : > { %v7248_v56 = vrot.slane %v7240_v17, %v13058_v21  ;;  %v5420_v29 = vpop.xlane.xlu1 %5419  ;;  %v7355_v57 = vcombine.low %v6062_v50, %v6066_v13  ;;  %v7356_v44 = vcombine.low %v6070_v47, %v6074_v15  ;;  %v6110_v60 = vrot.slane %v12249_v30, %v13062_v36 }
 0x4a4   : > { %v7255_v2 = vrot.slane %v7241_v26, %v13058_v21  ;;  %v12291_v31 = vadd.f32 %v12002_v6, %v5420_v29  ;;  %v7357_v59 = vcombine.low %v6078_v24, %v6082_v1  ;;  %v7358_v7 = vcombine.low %v6086_v25, %v6090_v53 }
 0x4a5   : > { %v7365_v38 = vrot.slane %v7355_v57, %v13058_v21  ;;  %v7372_v27 = vrot.slane %v7356_v44, %v13058_v21  ;;  %v6114_v33 = vrot.slane %v12249_v30, %v13063_v5  ;;  %v6118_v23 = vrot.slane %v12249_v30, %v13064_v55 }
 0x4a6   : > { %v7256_v3 = vcombine.low %v7248_v56, %v7255_v2  ;;  %v7379_v42 = vrot.slane %v7357_v59, %v13058_v21  ;;  %v7386_v32 = vrot.slane %v7358_v7, %v13058_v21  ;;  %v6122_v61 = vrot.slane %v12249_v30, %v13065_v63 }
 0x4a7   : > { %v5415_v20 = vpop.xlane.xlu0 %5414  ;;  %v7387_v49 = vcombine.low %v7365_v38, %v7372_v27  ;;  %v7404_v11 = vcombine.low %v6094_v10, %v6098_v28  ;;  %v7405_v16 = vcombine.low %v6102_v62, %v6106_v51  ;;  %v7406_v52 = vcombine.low %v6110_v60, %v6114_v33 }
 0x4a8   : > { %8179 = vperm.xlu1 %9100, %v7256_v3   ;;  %v5501_v39 = vadd.f32 %v12002_v6, %v5415_v20  ;;  %v7388_v14 = vcombine.low %v7379_v42, %v7386_v32  ;;  %v6158_v4 = vrot.slane %v12291_v31, %v12987_v35  ;;  %v7407_v22 = vcombine.low %v6118_v23, %v6122_v61 }
 0x4a9   : > { %v7395_v43 = vrot.slane %v7387_v49, %v13058_v21  ;;  %v7414_v48 = vrot.slane %v7404_v11, %v13058_v21  ;;  %v7421_v45 = vrot.slane %v7405_v16, %v13058_v21  ;;  %v7428_v30 = vrot.slane %v7406_v52, %v13058_v21 }
 0x4aa   : > { %v7402_v0 = vrot.slane %v7388_v14, %v13058_v21  ;;  %v5430_v10 = vpop.xlane.xlu1 %5429  ;;  %v6126_v34 = vrot.slane %v5501_v39, %v12987_v35  ;;  %v6130_v40 = vrot.slane %v5501_v39, %v13059_v54  ;;  %v7435_v18 = vrot.slane %v7407_v22, %v13058_v21 }
 0x4ab   : > { %v7436_v37 = vcombine.low %v7414_v48, %v7421_v45  ;;  %v12317_v9 = vadd.f32 %v12002_v6, %v5430_v10  ;;  %v6134_v28 = vrot.slane %v5501_v39, %v13060_v8  ;;  %v6138_v46 = vrot.slane %v5501_v39, %v13061_v41 }
 0x4ac   : > { %v7403_v62 = vcombine.low %v7395_v43, %v7402_v0  ;;  %v6142_v19 = vrot.slane %v5501_v39, %v13062_v36  ;;  %v6146_v50 = vrot.slane %v5501_v39, %v13063_v5  ;;  %v7437_v13 = vcombine.low %v7428_v30, %v7435_v18 }
 0x4ad   : > { %v7444_v17 = vrot.slane %v7436_v37, %v13058_v21  ;;  %v6150_v47 = vrot.slane %v5501_v39, %v13064_v55  ;;  %v6154_v15 = vrot.slane %v5501_v39, %v13065_v63  ;;  %v7453_v24 = vcombine.low %v6126_v34, %v6130_v40 }
 0x4ae   : > { %8188 = vperm.xlu1 %9100, %v7403_v62   ;;  %v7454_v26 = vcombine.low %v6134_v28, %v6138_v46  ;;  %v7455_v1 = vcombine.low %v6142_v19, %v6146_v50  ;;  %v6162_v25 = vrot.slane %v12291_v31, %v13059_v54  ;;  %v7451_v53 = vrot.slane %v7437_v13, %v13058_v21 }
 0x4af   : > { %v5425_v56 = vpop.xlane.xlu0 %5424  ;;  %v7456_v29 = vcombine.low %v6150_v47, %v6154_v15  ;;  %v6166_v57 = vrot.slane %v12291_v31, %v13060_v8  ;;  %v6170_v44 = vrot.slane %v12291_v31, %v13061_v41  ;;  %v7463_v2 = vrot.slane %v7453_v24, %v13058_v21 }
 0x4b0   : > { %v5503_v51 = vadd.f32 %v12002_v6, %v5425_v56  ;;  %v7470_v59 = vrot.slane %v7454_v26, %v13058_v21  ;;  %v7477_v7 = vrot.slane %v7455_v1, %v13058_v21  ;;  %v7452_v38 = vcombine.low %v7444_v17, %v7451_v53  ;;  %v5440_v3 = vpop.xlane.xlu1 %5439 }
 0x4b1   : > { %v7484_v27 = vrot.slane %v7456_v29, %v13058_v21  ;;  %v6174_v60 = vrot.slane %v12291_v31, %v13062_v36  ;;  %v6178_v33 = vrot.slane %v12291_v31, %v13063_v5  ;;  %v6182_v32 = vrot.slane %v12291_v31, %v13064_v55 }
 0x4b2   : > { %v7485_v42 = vcombine.low %v7463_v2, %v7470_v59  ;;  %v6186_v23 = vrot.slane %v12291_v31, %v13065_v63  ;;  %v7502_v20 = vcombine.low %v6158_v4, %v6162_v25  ;;  %8191 = vperm.xlu0 %9099, %v7452_v38   ;;  %v7503_v61 = vcombine.low %v6166_v57, %v6170_v44 }
 0x4b3   : > { %v7486_v49 = vcombine.low %v7477_v7, %v7484_v27  ;;  %v7504_v11 = vcombine.low %v6174_v60, %v6178_v33  ;;  %v12347_v16 = vadd.f32 %v12002_v6, %v5440_v3  ;;  %v6190_v43 = vrot.slane %v5503_v51, %v12987_v35 }
 0x4b4   : > { %v7493_v39 = vrot.slane %v7485_v42, %v13058_v21  ;;  %v7505_v14 = vcombine.low %v6182_v32, %v6186_v23  ;;  %v7512_v52 = vrot.slane %v7502_v20, %v13058_v21  ;;  %v7519_v48 = vrot.slane %v7503_v61, %v13058_v21 }
 0x4b5   : > { %v7500_v22 = vrot.slane %v7486_v49, %v13058_v21  ;;  %v7526_v31 = vrot.slane %v7504_v11, %v13058_v21  ;;  %v6194_v4 = vrot.slane %v5503_v51, %v13059_v54  ;;  %v6198_v0 = vrot.slane %v5503_v51, %v13060_v8 }
 0x4b6   : > { %v7533_v45 = vrot.slane %v7505_v14, %v13058_v21  ;;  %v6202_v30 = vrot.slane %v5503_v51, %v13061_v41  ;;  %v6206_v10 = vrot.slane %v5503_v51, %v13062_v36  ;;  %v7534_v40 = vcombine.low %v7512_v52, %v7519_v48 }
 0x4b7   : > { %v7501_v34 = vcombine.low %v7493_v39, %v7500_v22  ;;  %v5435_v18 = vpop.xlane.xlu0 %5434  ;;  %v6210_v37 = vrot.slane %v5503_v51, %v13063_v5  ;;  %v6214_v28 = vrot.slane %v5503_v51, %v13064_v55  ;;  %v6218_v19 = vrot.slane %v5503_v51, %v13065_v63 }
 0x4b8   : > { %v7535_v62 = vcombine.low %v7526_v31, %v7533_v45  ;;  %v5505_v46 = vadd.f32 %v12002_v6, %v5435_v18  ;;  %v7551_v50 = vcombine.low %v6190_v43, %v6194_v4  ;;  %v7542_v13 = vrot.slane %v7534_v40, %v13058_v21 }
 0x4b9   : > { %8194 = vperm.xlu1 %9100, %v7501_v34   ;;  %v7552_v17 = vcombine.low %v6198_v0, %v6202_v30  ;;  %v7553_v47 = vcombine.low %v6206_v10, %v6210_v37  ;;  %v6222_v15 = vrot.slane %v12317_v9, %v12987_v35  ;;  %v7554_v26 = vcombine.low %v6214_v28, %v6218_v19 }
 0x4ba   : > { %v7549_v24 = vrot.slane %v7535_v62, %v13058_v21  ;;  %v7561_v1 = vrot.slane %v7551_v50, %v13058_v21  ;;  %v6226_v25 = vrot.slane %v12317_v9, %v13059_v54  ;;  %v6230_v29 = vrot.slane %v12317_v9, %v13060_v8 }
 0x4bb   : > { %v7568_v53 = vrot.slane %v7552_v17, %v13058_v21  ;;  %v7575_v56 = vrot.slane %v7553_v47, %v13058_v21  ;;  %v6234_v57 = vrot.slane %v12317_v9, %v13061_v41  ;;  %v5450_v44 = vpop.xlane.xlu1 %5449  ;;  %v7582_v2 = vrot.slane %v7554_v26, %v13058_v21 }
 0x4bc   : > { %v7550_v51 = vcombine.low %v7542_v13, %v7549_v24  ;;  %v6238_v59 = vrot.slane %v12317_v9, %v13062_v36  ;;  %v6242_v7 = vrot.slane %v12317_v9, %v13063_v5  ;;  %v6246_v27 = vrot.slane %v12317_v9, %v13064_v55 }
 0x4bd   : > { %v7583_v38 = vcombine.low %v7561_v1, %v7568_v53  ;;  %v6250_v60 = vrot.slane %v12317_v9, %v13065_v63  ;;  %v7600_v33 = vcombine.low %v6222_v15, %v6226_v25  ;;  %v7584_v3 = vcombine.low %v7575_v56, %v7582_v2 }
 0x4be   : > { %8197 = vperm.xlu0 %9099, %v7550_v51   ;;  %v7601_v42 = vcombine.low %v6230_v29, %v6234_v57  ;;  %v7602_v32 = vcombine.low %v6238_v59, %v6242_v7  ;;  %v12387_v23 = vadd.f32 %v12002_v6, %v5450_v44  ;;  %v6254_v11 = vrot.slane %v5505_v46, %v12987_v35 }
 0x4bf   : > { %v7591_v20 = vrot.slane %v7583_v38, %v13058_v21  ;;  %v7603_v49 = vcombine.low %v6246_v27, %v6250_v60  ;;  %v7610_v61 = vrot.slane %v7600_v33, %v13058_v21  ;;  %v7598_v39 = vrot.slane %v7584_v3, %v13058_v21  ;;  %v5445_v52 = vpop.xlane.xlu0 %5444 }
 0x4c0   : > { %v7617_v14 = vrot.slane %v7601_v42, %v13058_v21  ;;  %v7624_v9 = vrot.slane %v7602_v32, %v13058_v21  ;;  %v6258_v43 = vrot.slane %v5505_v46, %v13059_v54  ;;  %v12398_v48 = vadd.f32 %v12002_v6, %v5445_v52 }
 0x4c1   : > { %v7631_v22 = vrot.slane %v7603_v49, %v13058_v21  ;;  %v6262_v31 = vrot.slane %v5505_v46, %v13060_v8  ;;  %v6266_v4 = vrot.slane %v5505_v46, %v13061_v41  ;;  %v7599_v45 = vcombine.low %v7591_v20, %v7598_v39 }
 0x4c2   : > { %v7632_v0 = vcombine.low %v7610_v61, %v7617_v14  ;;  %v6270_v30 = vrot.slane %v5505_v46, %v13062_v36  ;;  %v6274_v10 = vrot.slane %v5505_v46, %v13063_v5  ;;  %v6278_v40 = vrot.slane %v5505_v46, %v13064_v55 }
 0x4c3   : > { %v7633_v34 = vcombine.low %v7624_v9, %v7631_v22  ;;  %v6282_v18 = vrot.slane %v5505_v46, %v13065_v63  ;;  %v7649_v37 = vcombine.low %v6254_v11, %v6258_v43  ;;  %8200 = vperm.xlu1 %9100, %v7599_v45   ;;  %v7650_v62 = vcombine.low %v6262_v31, %v6266_v4  ;;  %v5460_v25 = vpop.xlane.xlu1 %5459 }
 0x4c4   : > { %v7640_v28 = vrot.slane %v7632_v0, %v13058_v21  ;;  %v7651_v19 = vcombine.low %v6270_v30, %v6274_v10  ;;  %v6286_v50 = vrot.slane %v12347_v16, %v12987_v35  ;;  %v6290_v15 = vrot.slane %v12347_v16, %v13059_v54 }
 0x4c5   : > { %v7647_v13 = vrot.slane %v7633_v34, %v13058_v21  ;;  %v7652_v17 = vcombine.low %v6278_v40, %v6282_v18  ;;  %v7659_v47 = vrot.slane %v7649_v37, %v13058_v21  ;;  %v7666_v24 = vrot.slane %v7650_v62, %v13058_v21 }
 0x4c6   : > { %v7673_v46 = vrot.slane %v7651_v19, %v13058_v21  ;;  %v6294_v26 = vrot.slane %v12347_v16, %v13060_v8  ;;  %v6298_v1 = vrot.slane %v12347_v16, %v13061_v41  ;;  %v6302_v29 = vrot.slane %v12347_v16, %v13062_v36 }
 0x4c7   : > { %v7648_v53 = vcombine.low %v7640_v28, %v7647_v13  ;;  %v7680_v56 = vrot.slane %v7652_v17, %v13058_v21  ;;  %v6306_v57 = vrot.slane %v12347_v16, %v13063_v5  ;;  %v7681_v44 = vcombine.low %v7659_v47, %v7666_v24 }
 0x4c8   : > { %v6310_v51 = vrot.slane %v12347_v16, %v13064_v55  ;;  %v6314_v2 = vrot.slane %v12347_v16, %v13065_v63  ;;  %v7698_v59 = vcombine.low %v6286_v50, %v6290_v15  ;;  %v5455_v7 = vpop.xlane.xlu0 %5454  ;;  %v7699_v27 = vcombine.low %v6294_v26, %v6298_v1 }
 0x4c9   : > { %8203 = vperm.xlu0 %9099, %v7648_v53   ;;  %v7682_v38 = vcombine.low %v7673_v46, %v7680_v56  ;;  %v7700_v60 = vcombine.low %v6302_v29, %v6306_v57  ;;  %v12429_v33 = vadd.f32 %v12002_v6, %v5460_v25  ;;  %v7689_v3 = vrot.slane %v7681_v44, %v13058_v21  ;;  %v5470_v15 = vpop.xlane.xlu1 %5469 }
 0x4ca   : > { %v7701_v42 = vcombine.low %v6310_v51, %v6314_v2  ;;  %v7708_v32 = vrot.slane %v7698_v59, %v13058_v21  ;;  %v12434_v20 = vadd.f32 %v12002_v6, %v5455_v7  ;;  %v7715_v16 = vrot.slane %v7699_v27, %v13058_v21 }
 0x4cb   : > { %v7696_v49 = vrot.slane %v7682_v38, %v13058_v21  ;;  %v7722_v61 = vrot.slane %v7700_v60, %v13058_v21  ;;  %v6318_v11 = vrot.slane %v12398_v48, %v12987_v35  ;;  %v6322_v14 = vrot.slane %v12398_v48, %v13059_v54 }
 0x4cc   : > { %v7729_v39 = vrot.slane %v7701_v42, %v13058_v21  ;;  %v6326_v9 = vrot.slane %v12398_v48, %v13060_v8  ;;  %v6330_v52 = vrot.slane %v12398_v48, %v13061_v41  ;;  %v7730_v22 = vcombine.low %v7708_v32, %v7715_v16  ;;  %v5465_v25 = vpop.xlane.xlu0 %5464 }
 0x4cd   : > { %v7697_v43 = vcombine.low %v7689_v3, %v7696_v49  ;;  %v6334_v31 = vrot.slane %v12398_v48, %v13062_v36  ;;  %v6338_v4 = vrot.slane %v12398_v48, %v13063_v5  ;;  %v6342_v0 = vrot.slane %v12398_v48, %v13064_v55 }
 0x4ce   : > { %v7731_v45 = vcombine.low %v7722_v61, %v7729_v39  ;;  %v6346_v30 = vrot.slane %v12398_v48, %v13065_v63  ;;  %v7747_v10 = vcombine.low %v6318_v11, %v6322_v14  ;;  %v7738_v34 = vrot.slane %v7730_v22, %v13058_v21 }
 0x4cf   : > { %8206 = vperm.xlu1 %9100, %v7697_v43   ;;  %v7748_v40 = vcombine.low %v6326_v9, %v6330_v52  ;;  %v7749_v18 = vcombine.low %v6334_v31, %v6338_v4  ;;  %v6350_v37 = vrot.slane %v12387_v23, %v12987_v35  ;;  %v6354_v50 = vrot.slane %v12387_v23, %v13059_v54 }
 0x4d0   : > { %v7745_v28 = vrot.slane %v7731_v45, %v13058_v21  ;;  %v7750_v62 = vcombine.low %v6342_v0, %v6346_v30  ;;  %v7757_v19 = vrot.slane %v7747_v10, %v13058_v21  ;;  %v6358_v17 = vrot.slane %v12387_v23, %v13060_v8 }
 0x4d1   : > { %v7764_v13 = vrot.slane %v7748_v40, %v13058_v21  ;;  %v7771_v48 = vrot.slane %v7749_v18, %v13058_v21  ;;  %v6362_v47 = vrot.slane %v12387_v23, %v13061_v41  ;;  %v6366_v26 = vrot.slane %v12387_v23, %v13062_v36 }
 0x4d2   : > { %v7746_v24 = vcombine.low %v7738_v34, %v7745_v28  ;;  %v7778_v46 = vrot.slane %v7750_v62, %v13058_v21  ;;  %v6370_v1 = vrot.slane %v12387_v23, %v13063_v5  ;;  %v6374_v56 = vrot.slane %v12387_v23, %v13064_v55 }
 0x4d3   : > { %v7779_v53 = vcombine.low %v7757_v19, %v7764_v13  ;;  %v6378_v29 = vrot.slane %v12387_v23, %v13065_v63  ;;  %v7796_v57 = vcombine.low %v6350_v37, %v6354_v50  ;;  %v7797_v51 = vcombine.low %v6358_v17, %v6362_v47 }
 0x4d4   : > { %8209 = vperm.xlu0 %9099, %v7746_v24   ;;  %v7780_v44 = vcombine.low %v7771_v48, %v7778_v46  ;;  %v7798_v2 = vcombine.low %v6366_v26, %v6370_v1  ;;  %v12479_v59 = vadd.f32 %v12002_v6, %v5470_v15  ;;  %v12484_v60 = vadd.f32 %v12002_v6, %v5465_v25 }
 0x4d5   : > { %v7787_v7 = vrot.slane %v7779_v53, %v13058_v21  ;;  %v7799_v38 = vcombine.low %v6374_v56, %v6378_v29  ;;  %v7806_v27 = vrot.slane %v7796_v57, %v13058_v21  ;;  %v7813_v23 = vrot.slane %v7797_v51, %v13058_v21 }
 0x4d6   : > { %v7794_v3 = vrot.slane %v7780_v44, %v13058_v21  ;;  %v7820_v42 = vrot.slane %v7798_v2, %v13058_v21  ;;  %v5998_v32 = vrot.slane %v12227_v12, %v12987_v35  ;;  %v6002_v16 = vrot.slane %v12227_v12, %v13059_v54 }
 0x4d7   : > { %v7827_v49 = vrot.slane %v7799_v38, %v13058_v21  ;;  %v6006_v61 = vrot.slane %v12227_v12, %v13060_v8  ;;  %v6010_v11 = vrot.slane %v12227_v12, %v13061_v41  ;;  %v7828_v14 = vcombine.low %v7806_v27, %v7813_v23 }
 0x4d8   : > { %v7795_v39 = vcombine.low %v7787_v7, %v7794_v3  ;;  %v6014_v9 = vrot.slane %v12227_v12, %v13062_v36  ;;  %v6018_v52 = vrot.slane %v12227_v12, %v13063_v5  ;;  %v6022_v22 = vrot.slane %v12227_v12, %v13064_v55 }
 0x4d9   : > { %v7829_v43 = vcombine.low %v7820_v42, %v7827_v49  ;;  %v6026_v31 = vrot.slane %v12227_v12, %v13065_v63  ;;  %v7257_v4 = vcombine.low %v5998_v32, %v6002_v16  ;;  %v7836_v45 = vrot.slane %v7828_v14, %v13058_v21  ;;  %v5480_v42 = vpop.xlane.xlu1 %5479  ;;  %v5475_v32 = vpop.xlane.xlu0 %5474 }
 0x4da   : > { %8212 = vperm.xlu1 %9100, %v7795_v39   ;;  %v7258_v0 = vcombine.low %v6006_v61, %v6010_v11  ;;  %v7259_v30 = vcombine.low %v6014_v9, %v6018_v52  ;;  %v6030_v10 = vrot.slane %v12219_v58, %v12987_v35  ;;  %v6034_v37 = vrot.slane %v12219_v58, %v13059_v54 }
 0x4db   : > { %v7843_v34 = vrot.slane %v7829_v43, %v13058_v21  ;;  %v7260_v40 = vcombine.low %v6022_v22, %v6026_v31  ;;  %v7267_v18 = vrot.slane %v7257_v4, %v13058_v21  ;;  %v6038_v62 = vrot.slane %v12219_v58, %v13060_v8 }
 0x4dc   : > { %v7274_v28 = vrot.slane %v7258_v0, %v13058_v21  ;;  %v7281_v12 = vrot.slane %v7259_v30, %v13058_v21  ;;  %v6042_v19 = vrot.slane %v12219_v58, %v13061_v41  ;;  %v6046_v48 = vrot.slane %v12219_v58, %v13062_v36 }
 0x4dd   : > { %v7844_v50 = vcombine.low %v7836_v45, %v7843_v34  ;;  %v7288_v13 = vrot.slane %v7260_v40, %v13058_v21  ;;  %v6050_v17 = vrot.slane %v12219_v58, %v13063_v5  ;;  %v6054_v15 = vrot.slane %v12219_v58, %v13064_v55 }
 0x4de   : > { %v7289_v47 = vcombine.low %v7267_v18, %v7274_v28  ;;  %v6058_v24 = vrot.slane %v12219_v58, %v13065_v63  ;;  %v7306_v46 = vcombine.low %v6030_v10, %v6034_v37  ;;  %v7307_v1 = vcombine.low %v6038_v62, %v6042_v19 }
 0x4df   : > { %8215 = vperm.xlu0 %9099, %v7844_v50   ;;  %v7290_v26 = vcombine.low %v7281_v12, %v7288_v13  ;;  %v7308_v25 = vcombine.low %v6046_v48, %v6050_v17  ;;  %v6382_v53 = vrot.slane %v12434_v20, %v12987_v35  ;;  %v6386_v44 = vrot.slane %v12434_v20, %v13059_v54 }
 0x4e0   : > { %v7297_v56 = vrot.slane %v7289_v47, %v13058_v21  ;;  %v7309_v29 = vcombine.low %v6054_v15, %v6058_v24  ;;  %v7316_v57 = vrot.slane %v7306_v46, %v13058_v21  ;;  %v7323_v58 = vrot.slane %v7307_v1, %v13058_v21 }
 0x4e1   : > { %v7304_v51 = vrot.slane %v7290_v26, %v13058_v21  ;;  %v7330_v2 = vrot.slane %v7308_v25, %v13058_v21  ;;  %v6390_v7 = vrot.slane %v12434_v20, %v13060_v8  ;;  %v6394_v27 = vrot.slane %v12434_v20, %v13061_v41 }
 0x4e2   : > { %v7337_v38 = vrot.slane %v7309_v29, %v13058_v21  ;;  %v6398_v3 = vrot.slane %v12434_v20, %v13062_v36  ;;  %v6402_v23 = vrot.slane %v12434_v20, %v13063_v5  ;;  %v7338_v16 = vcombine.low %v7316_v57, %v7323_v58 }
 0x4e3   : > { %v7305_v49 = vcombine.low %v7297_v56, %v7304_v51  ;;  %v6406_v61 = vrot.slane %v12434_v20, %v13064_v55  ;;  %v6410_v11 = vrot.slane %v12434_v20, %v13065_v63  ;;  %v7845_v14 = vcombine.low %v6382_v53, %v6386_v44 }
 0x4e4   : > { %v7339_v39 = vcombine.low %v7330_v2, %v7337_v38  ;;  %v7846_v9 = vcombine.low %v6390_v7, %v6394_v27  ;;  %v7847_v52 = vcombine.low %v6398_v3, %v6402_v23  ;;  %v7346_v43 = vrot.slane %v7338_v16, %v13058_v21 }
 0x4e5   : > { %8182 = vperm.xlu1 %9100, %v7305_v49   ;;  %v7848_v22 = vcombine.low %v6406_v61, %v6410_v11  ;;  %v12552_v31 = vadd.f32 %v12002_v6, %v5480_v42  ;;  %v12555_v4 = vadd.f32 %v12002_v6, %v5475_v32  ;;  %v7855_v0 = vrot.slane %v7845_v14, %v13058_v21 }
 0x4e6   : > { %v7353_v45 = vrot.slane %v7339_v39, %v13058_v21  ;;  %v7862_v20 = vrot.slane %v7846_v9, %v13058_v21  ;;  %v7869_v30 = vrot.slane %v7847_v52, %v13058_v21  ;;  %v6414_v34 = vrot.slane %v12429_v33, %v12987_v35 }
 0x4e7   : > { %v7876_v10 = vrot.slane %v7848_v22, %v13058_v21  ;;  %v6418_v40 = vrot.slane %v12429_v33, %v13059_v54  ;;  %v6422_v6 = vrot.slane %v12429_v33, %v13060_v8  ;;  %v6426_v28 = vrot.slane %v12429_v33, %v13061_v41 }
 0x4e8   : > { %v7354_v18 = vcombine.low %v7346_v43, %v7353_v45  ;;  %v7877_v37 = vcombine.low %v7855_v0, %v7862_v20  ;;  %v6430_v12 = vrot.slane %v12429_v33, %v13062_v36  ;;  %v6434_v19 = vrot.slane %v12429_v33, %v13063_v5 }
 0x4e9   : > { %v7878_v62 = vcombine.low %v7869_v30, %v7876_v10  ;;  %v6438_v50 = vrot.slane %v12429_v33, %v13064_v55  ;;  %v6442_v13 = vrot.slane %v12429_v33, %v13065_v63  ;;  %v7894_v17 = vcombine.low %v6414_v34, %v6418_v40 }
 0x4ea   : > { %8185 = vperm.xlu1 %9100, %v7354_v18   ;;  %v7885_v48 = vrot.slane %v7877_v37, %v13058_v21  ;;  %v7895_v47 = vcombine.low %v6422_v6, %v6426_v28  ;;  %v6446_v15 = vrot.slane %v12484_v60, %v12987_v35  ;;  %v7896_v46 = vcombine.low %v6430_v12, %v6434_v19 }
 0x4eb   : > { %v7892_v24 = vrot.slane %v7878_v62, %v13058_v21  ;;  %v7897_v26 = vcombine.low %v6438_v50, %v6442_v13  ;;  %v6450_v1 = vrot.slane %v12484_v60, %v13059_v54  ;;  %v7904_v25 = vrot.slane %v7894_v17, %v13058_v21 }
 0x4ec   : > { %v7911_v53 = vrot.slane %v7895_v47, %v13058_v21  ;;  %v6454_v33 = vrot.slane %v12484_v60, %v13060_v8  ;;  %v6458_v56 = vrot.slane %v12484_v60, %v13061_v41  ;;  %v7918_v57 = vrot.slane %v7896_v46, %v13058_v21 }
 0x4ed   : > { %v7893_v29 = vcombine.low %v7885_v48, %v7892_v24  ;;  %v7925_v44 = vrot.slane %v7897_v26, %v13058_v21  ;;  %v6462_v51 = vrot.slane %v12484_v60, %v13062_v36  ;;  %v6466_v2 = vrot.slane %v12484_v60, %v13063_v5 }
 0x4ee   : > { %v7926_v58 = vcombine.low %v7904_v25, %v7911_v53  ;;  %v6470_v7 = vrot.slane %v12484_v60, %v13064_v55  ;;  %v6474_v38 = vrot.slane %v12484_v60, %v13065_v63  ;;  %v7943_v3 = vcombine.low %v6446_v15, %v6450_v1 }
 0x4ef   : > { %8218 = vperm.xlu0 %9099, %v7893_v29   ;;  %v7927_v27 = vcombine.low %v7918_v57, %v7925_v44  ;;  %v7944_v23 = vcombine.low %v6454_v33, %v6458_v56  ;;  %v6478_v42 = vrot.slane %v12479_v59, %v12987_v35  ;;  %v7945_v49 = vcombine.low %v6462_v51, %v6466_v2 }
 0x4f0   : > { %v7934_v32 = vrot.slane %v7926_v58, %v13058_v21  ;;  %v7946_v16 = vcombine.low %v6470_v7, %v6474_v38  ;;  %v6482_v61 = vrot.slane %v12479_v59, %v13059_v54  ;;  %v7953_v39 = vrot.slane %v7943_v3, %v13058_v21 }
 0x4f1   : > { %v7941_v11 = vrot.slane %v7927_v27, %v13058_v21  ;;  %v7960_v60 = vrot.slane %v7944_v23, %v13058_v21  ;;  %v6486_v14 = vrot.slane %v12479_v59, %v13060_v8  ;;  %v7967_v9 = vrot.slane %v7945_v49, %v13058_v21 }
 0x4f2   : > { %v7974_v52 = vrot.slane %v7946_v16, %v13058_v21  ;;  %v6490_v43 = vrot.slane %v12479_v59, %v13061_v41  ;;  %v6494_v22 = vrot.slane %v12479_v59, %v13062_v36  ;;  %v6498_v20 = vrot.slane %v12479_v59, %v13063_v5 }
 0x4f3   : > { %v7942_v45 = vcombine.low %v7934_v32, %v7941_v11  ;;  %v7975_v0 = vcombine.low %v7953_v39, %v7960_v60  ;;  %v6502_v30 = vrot.slane %v12479_v59, %v13064_v55  ;;  %v6506_v34 = vrot.slane %v12479_v59, %v13065_v63 }
 0x4f4   : > { %v7976_v10 = vcombine.low %v7967_v9, %v7974_v52  ;;  %v7992_v40 = vcombine.low %v6478_v42, %v6482_v61  ;;  %v7993_v6 = vcombine.low %v6486_v14, %v6490_v43  ;;  %v7994_v37 = vcombine.low %v6494_v22, %v6498_v20 }
 0x4f5   : > { %8221 = vperm.xlu0 %9099, %v7942_v45   ;;  %v7983_v18 = vrot.slane %v7975_v0, %v13058_v21  ;;  %v6510_v28 = vrot.slane %v12555_v4, %v12987_v35  ;;  %v6514_v12 = vrot.slane %v12555_v4, %v13059_v54  ;;  %v7995_v19 = vcombine.low %v6502_v30, %v6506_v34  ;;  %v8144_v0 = vpop.permute.xlu1 %8143 }
 0x4f6   : > { %v7990_v62 = vrot.slane %v7976_v10, %v13058_v21  ;;  %v8002_v50 = vrot.slane %v7992_v40, %v13058_v21  ;;  %v8009_v13 = vrot.slane %v7993_v6, %v13058_v21  ;;  %v8016_v59 = vrot.slane %v7994_v37, %v13058_v21  ;;  %v8141_v37 = vpop.permute.xlu0 %8140 }
 0x4f7   : > { %v6518_v48 = vrot.slane %v12555_v4, %v13060_v8  ;;  %v6522_v17 = vrot.slane %v12555_v4, %v13061_v41  ;;  %v6526_v47 = vrot.slane %v12555_v4, %v13062_v36  ;;  %v8023_v24 = vrot.slane %v7995_v19, %v13058_v21 }
 0x4f8   : > { %v7991_v15 = vcombine.low %v7983_v18, %v7990_v62  ;;  %v8024_v46 = vcombine.low %v8002_v50, %v8009_v13  ;;  %v6530_v26 = vrot.slane %v12555_v4, %v13063_v5  ;;  %v6534_v1 = vrot.slane %v12555_v4, %v13064_v55 }
 0x4f9   : > { %v6538_v25 = vrot.slane %v12555_v4, %v13065_v63  ;;  %v8041_v53 = vcombine.low %v6510_v28, %v6514_v12  ;;  %v8042_v33 = vcombine.low %v6518_v48, %v6522_v17  ;;  %v8025_v56 = vcombine.low %v8016_v59, %v8023_v24  ;;  %v8147_v20 = vpop.permute.xlu1 %8146 }
 0x4fa   : > { %8224 = vperm.xlu0 %9099, %v7991_v15   ;;  %v8032_v29 = vrot.slane %v8024_v46, %v13058_v21  ;;  %v8043_v57 = vcombine.low %v6526_v47, %v6530_v26  ;;  %v6542_v44 = vrot.slane %v12552_v31, %v12987_v35  ;;  %v6546_v7 = vrot.slane %v12552_v31, %v13059_v54 }
 0x4fb   : > { %v8044_v51 = vcombine.low %v6534_v1, %v6538_v25  ;;  %v8051_v58 = vrot.slane %v8041_v53, %v13058_v21  ;;  %v8058_v2 = vrot.slane %v8042_v33, %v13058_v21  ;;  %v8039_v4 = vrot.slane %v8025_v56, %v13058_v21 }
 0x4fc   : > { %v8065_v38 = vrot.slane %v8043_v57, %v13058_v21  ;;  %v6550_v27 = vrot.slane %v12552_v31, %v13060_v8  ;;  %v6554_v3 = vrot.slane %v12552_v31, %v13061_v41  ;;  %v6558_v42 = vrot.slane %v12552_v31, %v13062_v36 }
 0x4fd   : > { %v8072_v35 = vrot.slane %v8044_v51, %v13058_v21  ;;  %v8073_v23 = vcombine.low %v8051_v58, %v8058_v2  ;;  %v6562_v32 = vrot.slane %v12552_v31, %v13063_v5  ;;  %v8040_v54 = vcombine.low %v8032_v29, %v8039_v4  ;;  %v12674_v30 = vpop.permute.xlu1 %8149  ;;  %v13067_v29 = vld [vmem:[#allocation6_spill] sm:$0xff] }
 0x4fe   : > { %v6566_v49 = vrot.slane %v12552_v31, %v13064_v55  ;;  %v6570_v16 = vrot.slane %v12552_v31, %v13065_v63  ;;  %v8090_v8 = vcombine.low %v6542_v44, %v6546_v7  ;;  %v8091_v11 = vcombine.low %v6550_v27, %v6554_v3 }
 0x4ff   : > { %v8074_v61 = vcombine.low %v8065_v38, %v8072_v35  ;;  %v8081_v41 = vrot.slane %v8073_v23, %v13058_v21  ;;  %v8092_v39 = vcombine.low %v6558_v42, %v6562_v32  ;;  %8227 = vperm.xlu0 %9099, %v8040_v54   ;;  %v13066_v47 = vlaneseq }
 0x500   : > { %v8093_v60 = vcombine.low %v6566_v49, %v6570_v16  ;;  %v8100_v36 = vrot.slane %v8090_v8, %v13058_v21  ;;  %v8107_v5 = vrot.slane %v8091_v11, %v13058_v21 }
 0x501   : > { %v8088_v14 = vrot.slane %v8074_v61, %v13058_v21  ;;  %v8114_v9 = vrot.slane %v8092_v39, %v13058_v21  ;;  %v12676_v10 = vpop.permute.xlu1 %8152  ;;  %v12701_v15 = vand.u32 127, %v13066_v47  ;;  %vm8443_vm15 = vcmp.lt.s32.totalorder %v13066_v47, 256 }
 0x502   : > { %v8121_v55 = vrot.slane %v8093_v60, %v13058_v21  ;;  %v8122_v63 = vcombine.low %v8100_v36, %v8107_v5 }
 0x503   : > { %v8089_v52 = vcombine.low %v8081_v41, %v8088_v14  ;;  %v8241_v26 = vadd.s32 4294967288, %v12701_v15  ;;  %v8248_v1 = vadd.s32 4294967280, %v12701_v15  ;;  %v8255_v53 = vadd.s32 4294967272, %v12701_v15 }
 0x504   : > { %v8123_v31 = vcombine.low %v8114_v9, %v8121_v55  ;;  %v8130_v43 = vrot.slane %v8122_v63, %v13058_v21  ;;  %v8262_v56 = vadd.s32 4294967264, %v12701_v15  ;;  %v8239_v44 = vsub.s32 %v12701_v15, %v13067_v29 }
 0x505   : > { %8230 = vperm.xlu0 %9099, %v8089_v52   ;;  %v12678_v34 = vpop.permute.xlu1 %8155  ;;  %v8244_v57 = vsub.s32 %v8241_v26, %v13067_v29  ;;  %v8269_v51 = vadd.s32 4294967256, %v12701_v15  ;;  %v8251_v58 = vsub.s32 %v8248_v1, %v13067_v29  ;;  %v8276_v2 = vadd.s32 4294967248, %v12701_v15 }
 0x506   : > { %v8137_v22 = vrot.slane %v8123_v31, %v13058_v21  ;;  %v8258_v4 = vsub.s32 %v8255_v53, %v13067_v29  ;;  %v8265_v3 = vsub.s32 %v8262_v56, %v13067_v29  ;;  %v8240_v42 = vrot.slane %v8141_v37, %v8239_v44 }
 0x507   : > { %v8245_v23 = vrot.slane %v8144_v0, %v8244_v57  ;;  %v8272_v32 = vsub.s32 %v8269_v51, %v13067_v29  ;;  %v8283_v54 = vadd.s32 4294967240, %v12701_v15  ;;  %v8252_v16 = vrot.slane %v8147_v20, %v8251_v58 }
 0x508   : > { %v8138_v45 = vcombine.low %v8130_v43, %v8137_v22  ;;  %v8279_v8 = vsub.s32 %v8276_v2, %v13067_v29  ;;  %v8290_v61 = vadd.s32 4294967232, %v12701_v15  ;;  %v8259_v11 = vrot.slane %v12674_v30, %v8258_v4 }
 0x509   : > { %v12680_v40 = vpop.permute.xlu1 %8158  ;;  %v8266_v36 = vrot.slane %v12676_v10, %v8265_v3  ;;  %v8247_v9 = vsel %vm8246_vm0, %v8245_v23, %v8240_v42  ;;  %v8273_v55 = vrot.slane %v12678_v34, %v8272_v32  ;;  %v8286_v52 = vsub.s32 %v8283_v54, %v13067_v29 }
 0x50a   : > { %8233 = vperm.xlu0 %9099, %v8138_v45   ;;  %v8254_v63 = vsel %vm8253_vm1, %v8252_v16, %v8247_v9  ;;  %v8280_v31 = vrot.slane %v12680_v40, %v8279_v8  ;;  %v8293_v43 = vsub.s32 %v8290_v61, %v13067_v29  ;;  %v8297_v20 = vadd.s32 4294967224, %v12701_v15 }
 0x50b   : > { %v8261_v0 = vsel %vm8260_vm2, %v8259_v11, %v8254_v63  ;;  %v8304_v37 = vadd.s32 4294967216, %v12701_v15  ;;  %v8311_v26 = vadd.s32 4294967208, %v12701_v15  ;;  %v8325_v56 = vadd.s32 4294967192, %v12701_v15 }
 0x50c   : > { %v8268_v34 = vsel %vm8267_vm3, %v8266_v36, %v8261_v0  ;;  %v8300_v53 = vsub.s32 %v8297_v20, %v13067_v29  ;;  %v8332_v2 = vadd.s32 4294967184, %v12701_v15 }
 0x50d   : > { %v12682_v6 = vpop.permute.xlu1 %8161  ;;  %v8307_v51 = vsub.s32 %v8304_v37, %v13067_v29  ;;  %v8328_v23 = vsub.s32 %v8325_v56, %v13067_v29 }
 0x510   : > { %v12688_v12 = vpop.permute.xlu0 %8167 }
 0x511   : > { %v12684_v18 = vpop.permute.xlu1 %8164 }
 0x516   : > { %v12686_v28 = vpop.permute.xlu1 %8170 }
 0x517   : > { %v8308_v54 = vrot.slane %v12686_v28, %v8307_v51 }
 0x51b   : > { %v12690_v62 = vpop.permute.xlu1 %8173 }
 0x521   : > { %v12692_v13 = vpop.permute.xlu1 %8176 }
 0x527   : > { %v12696_v48 = vpop.permute.xlu1 %8179 }
 0x52d   : > { %v8189_v24 = vpop.permute.xlu1 %8188 }
 0x52e   : > { %v8349_v38 = vrot.slane %v8189_v24, %v8239_v44  ;;  %v8287_v24 = vrot.slane %v12682_v6, %v8286_v52 }
 0x531   : > { %v8192_v19 = vpop.permute.xlu0 %8191 }
 0x532   : > { %v8353_v27 = vrot.slane %v8192_v19, %v8244_v57 }
 0x534   : > { %v8354_v39 = vsel %vm8246_vm0, %v8353_v27, %v8349_v38  ;;  %v8314_v38 = vsub.s32 %v8311_v26, %v13067_v29  ;;  %v8339_v27 = vadd.s32 4294967176, %v12701_v15 }
 0x536   : > { %v8315_v61 = vrot.slane %v12690_v62, %v8314_v38 }
 0x538   : > { %v8195_v25 = vpop.permute.xlu1 %8194 }
 0x539   : > { %v8358_v35 = vrot.slane %v8195_v25, %v8251_v58  ;;  %v8294_v25 = vrot.slane %v12684_v18, %v8293_v43 }
 0x53b   : > { %v8359_v14 = vsel %vm8253_vm1, %v8358_v35, %v8354_v39  ;;  %v8301_v35 = vrot.slane %v12688_v12, %v8300_v53  ;;  %v8342_v12 = vsub.s32 %v8339_v27, %v13067_v29 }
 0x53d   : > { %v8198_v50 = vpop.permute.xlu0 %8197 }
 0x53e   : > { %v8363_v60 = vrot.slane %v8198_v50, %v8258_v4  ;;  %v8275_v50 = vsel %vm8274_vm4, %v8273_v55, %v8268_v34 }
 0x53f   : > { %v8282_v1 = vsel %vm8281_vm5, %v8280_v31, %v8275_v50 }
 0x540   : > { %v8364_v30 = vsel %vm8260_vm2, %v8363_v60, %v8359_v14  ;;  %v8289_v18 = vsel %vm8288_vm6, %v8287_v24, %v8282_v1 }
 0x542   : > { %v8201_v7 = vpop.permute.xlu1 %8200 }
 0x543   : > { %v8368_v5 = vrot.slane %v8201_v7, %v8265_v3  ;;  %v8296_v3 = vsel %vm8295_vm7, %v8294_v25, %v8289_v18 }
 0x544   : > { %v8303_v60 = vsel %vm8302_vm8, %v8301_v35, %v8296_v3 }
 0x545   : > { %v8369_v19 = vsel %vm8267_vm3, %v8368_v5, %v8364_v30 }
 0x548   : > { %v12694_v59 = vpop.permute.xlu0 %8203 }
 0x549   : > { %v8373_v10 = vrot.slane %v12694_v59, %v8272_v32  ;;  %v8318_v59 = vadd.s32 4294967200, %v12701_v15  ;;  %v8335_v15 = vsub.s32 %v8332_v2, %v13067_v29 }
 0x54b   : > { %v8374_v57 = vsel %vm8274_vm4, %v8373_v10, %v8369_v19 }
 0x54e   : > { %v8207_v41 = vpop.permute.xlu1 %8206 }
 0x54f   : > { %v8378_v40 = vrot.slane %v8207_v41, %v8279_v8 }
 0x551   : > { %v8379_v6 = vsel %vm8281_vm5, %v8378_v40, %v8374_v57 }
 0x553   : > { %v12698_v17 = vpop.permute.xlu0 %8209 }
 0x554   : > { %v8383_v44 = vrot.slane %v12698_v17, %v8286_v52  ;;  %v8321_v17 = vsub.s32 %v8318_v59, %v13067_v29  ;;  %v8310_v29 = vsel %vm8309_vm9, %v8308_v54, %v8303_v60 }
 0x556   : > { %v8384_v42 = vsel %vm8288_vm6, %v8383_v44, %v8379_v6  ;;  %v8322_v39 = vrot.slane %v12692_v13, %v8321_v17  ;;  %v8317_v13 = vsel %vm8316_vm10, %v8315_v61, %v8310_v29 }
 0x558   : > { %v8324_v52 = vsel %vm8323_vm11, %v8322_v39, %v8317_v13 }
 0x559   : > { %v8213_v22 = vpop.permute.xlu1 %8212 }
 0x55a   : > { %v8388_v58 = vrot.slane %v8213_v22, %v8293_v43 }
 0x55c   : > { %v8389_v16 = vsel %vm8295_vm7, %v8388_v58, %v8384_v42 }
 0x55e   : > { %v12703_v46 = vpop.permute.xlu0 %8215 }
 0x55f   : > { %v8393_v32 = vrot.slane %v12703_v46, %v8300_v53 }
 0x561   : > { %v8394_v36 = vsel %vm8302_vm8, %v8393_v32, %v8389_v16 }
 0x564   : > { %v8183_v7 = vpop.permute.xlu1 %8182 }
 0x565   : > { %v8336_v14 = vrot.slane %v8183_v7, %v8335_v15 }
 0x569   : > { %v8186_v46 = vpop.permute.xlu1 %8185 }
 0x56a   : > { %v8343_v9 = vrot.slane %v8186_v46, %v8342_v12 }
 0x56e   : > { %v12708_v33 = vpop.permute.xlu0 %8218 }
 0x56f   : > { %v8398_v8 = vrot.slane %v12708_v33, %v8307_v51  ;;  %v8329_v33 = vrot.slane %v12696_v48, %v8328_v23 }
 0x571   : > { %v8331_v31 = vsel %vm8330_vm12, %v8329_v33, %v8324_v52 }
 0x574   : > { %v12721_v49 = vpop.permute.xlu0 %8221 }
 0x575   : > { %v8403_v41 = vrot.slane %v12721_v49, %v8314_v38  ;;  %v8399_v49 = vsel %vm8309_vm9, %v8398_v8, %v8394_v36 }
 0x577   : > { %v8404_v55 = vsel %vm8316_vm10, %v8403_v41, %v8399_v49 }
 0x579   : > { %v12735_v45 = vpop.permute.xlu0 %8224 }
 0x57a   : > { %v8408_v28 = vrot.slane %v12735_v45, %v8321_v17  ;;  %v8338_v45 = vsel %vm8337_vm13, %v8336_v14, %v8331_v31 }
 0x57b   : > { %v8345_v20 = vsel %vm8344_vm14, %v8343_v9, %v8338_v45 }
 0x57c   : > { %v8409_v48 = vsel %vm8323_vm11, %v8408_v28, %v8404_v55 }
 0x57e   : > { %v8228_v4 = vpop.permute.xlu0 %8227 }
 0x57f   : > { %v8413_v62 = vrot.slane %v8228_v4, %v8328_v23 }
 0x581   : > { %v8414_v43 = vsel %vm8330_vm12, %v8413_v62, %v8409_v48 }
 0x584   : > { %v8231_v11 = vpop.permute.xlu0 %8230 }
 0x585   : > { %v8418_v5 = vrot.slane %v8231_v11, %v8335_v15 }
 0x587   : > { %v8419_v0 = vsel %vm8337_vm13, %v8418_v5, %v8414_v43 }
 0x589   : > { %v8234_v63 = vpop.permute.xlu0 %8233 }
 0x58a   : > { %v8423_v22 = vrot.slane %v8234_v63, %v8342_v12 }
 0x58c   : > { %v8424_v30 = vsel %vm8344_vm14, %v8423_v22, %v8419_v0 }
 0x58d   : > { %v8425_v10 = vcombine.low %v8345_v20, %v8424_v30 }
 0x58f   : > { %v8432_v34 = vrot.slane %v8425_v10, %v13058_v21 }
 0x591   : > { %v8439_v37 = vrot.slane %v8432_v34, %v13058_v21 }
 0x593   : > { %8445 = vst.msk [vmem:[%s348_s14] sm:$0x3] %vm8443_vm15, %v8439_v37 }
 0x594 PF: > { %s21_s11 = sadd.s32 1, %s9524_s11  }
 0x595   : > { %p18_p5 = scmp.ge.s32.totalorder %s21_s11, 4  }
 0x597   :  { %20 = sbr.rel (!%p18_p5) target bundleno = 3 (0x3), region = 91 }
 0x59e   :  { %8466 = vsyncpa [#allocation4], 1 }
 0x59f   :  { %8468 = vsyncpa [#allocation4 + $0x1], 1 }

</bundles_post_ra>
